<compile_context>
chip_gen: v7x
topology: tpu7x:2x2x1
jax: 0.10.0
libtpu: 0.0.40
codegen_flags: <defaults>
</compile_context>

<pallas_src>
import functools

import jax
import jax.numpy as jnp
from jax import lax
from jax.experimental import pallas as pl
from jax.experimental.pallas import tpu as pltpu

NUM_FEATURE = 64


# --------------------------- fused Pallas kernel -----------------------------

def _fused_kernel(y_ref, x_ref, mask_ref, w1_ref, w2_ref, wvf_ref, wqkv_ref,
                  wo_ref, wav_ref, b1_ref, b2_ref, bvf_ref, bqkv_ref, bo_ref,
                  bav_ref, av_ref, vessel_ref, *, H, W, alpha):
    """Whole OpenAccessNet forward for one batch element (grid=(N,)).

    All activations are channels-first, spatially flattened: (C, HW).
      y_ref:    (1, 2, HW)           vessel-branch input
      x_ref:    (1, Cin, HW)         av-branch input, last channel zeroed
      mask_ref: (9, 1, HW) f32       per-tap validity mask (1 inside image)
      w*_ref:   bf16 weights; conv weights are (9, Cout, Cin) tap-major
      b*_ref:   (Cout, 1) f32 biases
      av_ref:   (1, Cout, HW);  vessel_ref: (1, 1, HW)   lane-dense outputs
    """
    HW = H * W
    f32 = jnp.float32
    bf16 = jnp.bfloat16

    def conv3x3(act, w_ref, b_ref):
        """3x3 'same' conv in (Cin, HW) layout.

        Taps are lane rolls of the flat activation (pltpu.roll == jnp.roll
        semantics); wrap-around / out-of-image positions are zeroed by the
        host-precomputed tap mask, which is equivalent to zero padding.
        """
        cout = w_ref.shape[1]
        acc = jnp.zeros((cout, HW), f32)
        for t in range(9):
            dy, dx = t // 3 - 1, t % 3 - 1
            shift = dy * W + dx
            if shift == 0:
                tap = act
            else:
                # shifted[:, i] = act[:, (i + shift) mod HW]
                tap = pltpu.roll(act, shift=(-shift) % HW, axis=1)
            tap = (tap * mask_ref[t]).astype(bf16)
            acc = acc + jnp.dot(w_ref[t], tap, preferred_element_type=f32)
        return acc + b_ref[...]

    # ------------- vessel branch: conv+relu -> conv+relu -> conv+sigmoid ----
    y0 = y_ref[0].astype(f32)                                   # (2, HW)
    h1 = jnp.maximum(conv3x3(y0, w1_ref, b1_ref), 0.0)          # (64, HW)
    h2 = jnp.maximum(conv3x3(h1, w2_ref, b2_ref), 0.0)          # (16, HW)
    vessel = jax.nn.sigmoid(conv3x3(h2, wvf_ref, bvf_ref))      # (1, HW)
    vessel_ref[0] = vessel.astype(vessel_ref.dtype)

    # ------------- av branch: attention -> gate -> conv -> channel softmax --
    cin = x_ref.shape[1]
    x0 = x_ref[0].astype(bf16)                                  # (Cin, HW)
    wqkv = wqkv_ref[...]                                        # (3F, Cin) bf16
    qkv = jnp.dot(wqkv, x0, preferred_element_type=f32)         # (3F, HW)
    # cat([x, vessel]) as a rank-1 update: vessel is the last input channel.
    qkv = qkv + wqkv[:, cin - 1:cin].astype(f32) * vessel + bqkv_ref[...]

    fdim = wo_ref.shape[1]                                      # F
    q = qkv[:fdim]                                              # (F, HW), scaled
    k = qkv[fdim:2 * fdim]
    v = qkv[2 * fdim:]

    # scores: one tiny (F, HW) -> (HW, F) transpose, then a standard matmul.
    s = jnp.dot(q.T.astype(bf16), k.astype(bf16),
                preferred_element_type=f32)                     # (HW, HW)
    m = jnp.max(s, axis=-1, keepdims=True)
    e = jnp.exp(s - m)
    p = e * pl.reciprocal(jnp.sum(e, axis=-1, keepdims=True), approx=True)
    # h[f, i] = sum_j v[f, j] * p[i, j]  (rhs fed transposed, no p.T copy)
    h = lax.dot_general(v.astype(bf16), p.astype(bf16),
                        dimension_numbers=(((1,), (1,)), ((), ())),
                        preferred_element_type=f32)             # (F, HW)
    av_feat = jnp.maximum(
        jnp.dot(wo_ref[...], h.astype(bf16), preferred_element_type=f32)
        + bo_ref[...], 0.0)                                     # (16, HW)

    # OptimizeModule gate fused as an epilogue (no separate kernel / HBM trip).
    gated = av_feat * (alpha * vessel + (1.0 - alpha))          # (16, HW)

    logits = conv3x3(gated, wav_ref, bav_ref)                   # (Cout, HW)
    mx = jnp.max(logits, axis=0, keepdims=True)
    ex = jnp.exp(logits - mx)
    av = ex / jnp.sum(ex, axis=0, keepdims=True)                # exact softmax
    av_ref[0] = av.astype(av_ref.dtype)


# --------------------------- model / wrapper ---------------------------------

def init_params(key, input_feature, output_feature, num_feature=NUM_FEATURE):
    keys = jax.random.split(key, 8)

    def w(k, shape, scale=0.1):
        return (scale * jax.random.normal(k, shape)).astype(jnp.float32)

    return {
        # ConvolutionLikeNetwork(2, 16, numFeature=64)  (HWIO conv weights)
        "vs_w1": w(keys[0], (3, 3, 2, num_feature)),
        "vs_b1": jnp.zeros((num_feature,), jnp.float32),
        "vs_w2": w(keys[1], (3, 3, num_feature, 16)),
        "vs_b2": jnp.zeros((16,), jnp.float32),
        # vesselFinalConv: Conv2d(16, 1, 3, padding=1)
        "vf_w": w(keys[2], (3, 3, 16, 1)),
        "vf_b": jnp.zeros((1,), jnp.float32),
        # TransformerLikeNetwork(inputFeature, 16, numFeature=64)
        "wq": w(keys[3], (input_feature, num_feature)),
        "bq": jnp.zeros((1, num_feature), jnp.float32),
        "wk": w(keys[4], (input_feature, num_feature)),
        "bk": jnp.zeros((1, num_feature), jnp.float32),
        "wv": w(keys[5], (input_feature, num_feature)),
        "bv": jnp.zeros((1, num_feature), jnp.float32),
        "wo": w(keys[6], (num_feature, 16)),
        "bo": jnp.zeros((1, 16), jnp.float32),
        # avFinalConv: Conv2d(16, outputFeature, 3, padding=1)
        "af_w": w(keys[7], (3, 3, 16, output_feature)),
        "af_b": jnp.zeros((output_feature,), jnp.float32),
    }


@functools.partial(jax.jit, static_argnames=("alpha",))
def open_access_net_forward(params, x_nchw, y_nchw, alpha):
    """Returns (softmax(av), vessel) in NCHW, matching the PyTorch forward."""
    n, cx, h, w = x_nchw.shape
    hw = h * w
    cy = y_nchw.shape[1]
    in_feature = params["wq"].shape[0]
    out_feature = params["af_w"].shape[-1]
    f = params["wq"].shape[1]

    # NCHW -> (N, C, HW): pure reshape, no transposes.
    y_flat = y_nchw.reshape(n, cy, hw).astype(jnp.float32)
    x_flat = x_nchw.reshape(n, cx, hw).astype(jnp.float32)
    if cx < in_feature:                       # reserve the vessel channel slot
        x_flat = jnp.pad(x_flat, ((0, 0), (0, in_feature - cx), (0, 0)))

    # Host-side packing (once, outside the grid loop): bf16 weights, tap-major
    # conv weights (9, Cout, Cin), fused QKV with 1/sqrt(F) folded into Q,
    # (C, 1) biases, and the per-tap boundary mask.
    def pack_conv(w_hwio):                    # (3,3,Cin,Cout) -> (9,Cout,Cin)
        cin, cout = w_hwio.shape[2], w_hwio.shape[3]
        return jnp.transpose(w_hwio, (0, 1, 3, 2)).reshape(
            9, cout, cin).astype(jnp.bfloat16)

    w1 = pack_conv(params["vs_w1"])
    w2 = pack_conv(params["vs_w2"])
    wvf = pack_conv(params["vf_w"])
    wav = pack_conv(params["af_w"])

    scale = 1.0 / float(f) ** 0.5
    wqkv = jnp.concatenate(
        [(params["wq"] * scale).T, params["wk"].T, params["wv"].T],
        axis=0).astype(jnp.bfloat16)                                # (3F, Cin)
    wo = params["wo"].T.astype(jnp.bfloat16)                        # (16, F)

    b1 = params["vs_b1"].reshape(-1, 1).astype(jnp.float32)
    b2 = params["vs_b2"].reshape(-1, 1).astype(jnp.float32)
    bvf = params["vf_b"].reshape(-1, 1).astype(jnp.float32)
    bqkv = jnp.concatenate(
        [(params["bq"] * scale).reshape(-1), params["bk"].reshape(-1),
         params["bv"].reshape(-1)]).reshape(-1, 1).astype(jnp.float32)
    bo = params["bo"].reshape(-1, 1).astype(jnp.float32)
    bav = params["af_b"].reshape(-1, 1).astype(jnp.float32)

    r = jnp.arange(h)[:, None]
    c = jnp.arange(w)[None, :]
    mask_rows = []
    for t in range(9):
        dy, dx = t // 3 - 1, t % 3 - 1
        m = (r + dy >= 0) & (r + dy < h) & (c + dx >= 0) & (c + dx < w)
        mask_rows.append(m.reshape(1, hw))
    tap_mask = jnp.stack(mask_rows, axis=0).astype(jnp.float32)     # (9,1,HW)

    def full(arr):
        nd = arr.ndim
        return pl.BlockSpec(arr.shape, lambda i, nd=nd: (0,) * nd)

    av_flat, vessel_flat = pl.pallas_call(
        functools.partial(_fused_kernel, H=h, W=w, alpha=float(alpha)),
        out_shape=(jax.ShapeDtypeStruct((n, out_feature, hw), jnp.float32),
                   jax.ShapeDtypeStruct((n, 1, hw), jnp.float32)),
        grid_spec=pltpu.PrefetchScalarGridSpec(
            num_scalar_prefetch=0, grid=(n,),
            in_specs=[
                pl.BlockSpec((1, cy, hw), lambda i: (i, 0, 0)),
                pl.BlockSpec((1, in_feature, hw), lambda i: (i, 0, 0)),
                full(tap_mask),
                full(w1), full(w2), full(wvf), full(wqkv), full(wo), full(wav),
                full(b1), full(b2), full(bvf), full(bqkv), full(bo), full(bav),
            ],
            out_specs=(
                pl.BlockSpec((1, out_feature, hw), lambda i: (i, 0, 0)),
                pl.BlockSpec((1, 1, hw), lambda i: (i, 0, 0)),
            )),
        compiler_params=pltpu.CompilerParams(
            dimension_semantics=("parallel",),
            vmem_limit_bytes=32 * 1024 * 1024),
    )(y_flat, x_flat, tap_mask, w1, w2, wvf, wqkv, wo, wav,
      b1, b2, bvf, bqkv, bo, bav)

    # (N, C, HW) is flattened NCHW already: reshape only, no transpose.
    av = av_flat.reshape(n, out_feature, h, w)
    vessel = vessel_flat.reshape(n, 1, h, w)
    return av, vessel


# --------------------------- main ---------------------------------------------

if __name__ == "__main__":
    input_feature, output_feature, alpha = 4, 4, 0.5
    N, H, W = 2, 16, 16

    key = jax.random.PRNGKey(0)
    kx, ky, kp = jax.random.split(key, 3)
    # x: NCHW with (inputFeature - 1) channels so cat([x, vessel]) has inputFeature
    x = jax.random.normal(kx, (N, input_feature - 1, H, W), jnp.float32)
    # y: NCHW with 2 channels (ConvolutionLikeNetwork(2, 16, ...))
    y = jax.random.normal(ky, (N, 2, H, W), jnp.float32)

    params = init_params(kp, input_feature, output_feature)
    av, vessel = open_access_net_forward(params, x, y, alpha)
    jax.block_until_ready((av, vessel))

    assert av.shape == (N, output_feature, H, W)
    assert vessel.shape == (N, 1, H, W)
    # channel softmax sums to 1 (exact division is used for the final softmax)
    assert jnp.allclose(jnp.sum(av, axis=1), 1.0, atol=1e-5)
    print("KERNEL_OK")
</pallas_src>

<mosaic_0001>
module attributes {stable_mosaic.version = 11 : i64} {
  func.func @_fused_kernel(%arg0: i32, %arg1: memref<1x2x256xf32, #tpu.memory_space<vmem>>, %arg2: memref<1x4x256xf32, #tpu.memory_space<vmem>>, %arg3: memref<9x1x256xf32, #tpu.memory_space<vmem>>, %arg4: memref<9x64x2xbf16, #tpu.memory_space<vmem>>, %arg5: memref<9x16x64xbf16, #tpu.memory_space<vmem>>, %arg6: memref<9x1x16xbf16, #tpu.memory_space<vmem>>, %arg7: memref<192x4xbf16, #tpu.memory_space<vmem>>, %arg8: memref<16x64xbf16, #tpu.memory_space<vmem>>, %arg9: memref<9x4x16xbf16, #tpu.memory_space<vmem>>, %arg10: memref<64x1xf32, #tpu.memory_space<vmem>>, %arg11: memref<16x1xf32, #tpu.memory_space<vmem>>, %arg12: memref<1x1xf32, #tpu.memory_space<vmem>>, %arg13: memref<192x1xf32, #tpu.memory_space<vmem>>, %arg14: memref<16x1xf32, #tpu.memory_space<vmem>>, %arg15: memref<4x1xf32, #tpu.memory_space<vmem>>, %arg16: memref<1x4x256xf32, #tpu.memory_space<vmem>>, %arg17: memref<1x1x256xf32, #tpu.memory_space<vmem>>) attributes {dimension_semantics = [#tpu.dimension_semantics<parallel>], iteration_bounds = array<i64: 2>, scalar_prefetch = 0 : i64, scratch_operands = 0 : i64, tpu.core_type = #tpu.core_type<tc>, window_params = [{transform_indices = @transform_0, window_bounds = array<i64: 1, 2, 256>}, {transform_indices = @transform_1, window_bounds = array<i64: 1, 4, 256>}, {pipeline_mode = #tpu.pipeline_mode<synchronous>, transform_indices = @transform_2, window_bounds = array<i64: 9, 1, 256>}, {pipeline_mode = #tpu.pipeline_mode<synchronous>, transform_indices = @transform_3, window_bounds = array<i64: 9, 64, 2>}, {pipeline_mode = #tpu.pipeline_mode<synchronous>, transform_indices = @transform_4, window_bounds = array<i64: 9, 16, 64>}, {pipeline_mode = #tpu.pipeline_mode<synchronous>, transform_indices = @transform_5, window_bounds = array<i64: 9, 1, 16>}, {pipeline_mode = #tpu.pipeline_mode<synchronous>, transform_indices = @transform_6, window_bounds = array<i64: 192, 4>}, {pipeline_mode = #tpu.pipeline_mode<synchronous>, transform_indices = @transform_7, window_bounds = array<i64: 16, 64>}, {pipeline_mode = #tpu.pipeline_mode<synchronous>, transform_indices = @transform_8, window_bounds = array<i64: 9, 4, 16>}, {pipeline_mode = #tpu.pipeline_mode<synchronous>, transform_indices = @transform_9, window_bounds = array<i64: 64, 1>}, {pipeline_mode = #tpu.pipeline_mode<synchronous>, transform_indices = @transform_10, window_bounds = array<i64: 16, 1>}, {pipeline_mode = #tpu.pipeline_mode<synchronous>, transform_indices = @transform_11, window_bounds = array<i64: 1, 1>}, {pipeline_mode = #tpu.pipeline_mode<synchronous>, transform_indices = @transform_12, window_bounds = array<i64: 192, 1>}, {pipeline_mode = #tpu.pipeline_mode<synchronous>, transform_indices = @transform_13, window_bounds = array<i64: 16, 1>}, {pipeline_mode = #tpu.pipeline_mode<synchronous>, transform_indices = @transform_14, window_bounds = array<i64: 4, 1>}, {transform_indices = @transform_15, window_bounds = array<i64: 1, 4, 256>}, {transform_indices = @transform_16, window_bounds = array<i64: 1, 1, 256>}]} {
    %c0 = arith.constant 0 : index
    %c0_0 = arith.constant 0 : index
    %c0_1 = arith.constant 0 : index
    %0 = vector.load %arg1[%c0, %c0_0, %c0_1] : memref<1x2x256xf32, #tpu.memory_space<vmem>>, vector<1x2x256xf32>
    %1 = vector.shape_cast %0 : vector<1x2x256xf32> to vector<2x256xf32>
    %cst = arith.constant 0.000000e+00 : f32
    %2 = vector.broadcast %cst : f32 to vector<64x256xf32>
    %c17_i32 = arith.constant 17 : i32
    %3 = tpu.dynamic_rotate %1 by %c17_i32 dim 1 : vector<2x256xf32>, i32 -> vector<2x256xf32>
    %c0_2 = arith.constant 0 : index
    %c0_3 = arith.constant 0 : index
    %c0_4 = arith.constant 0 : index
    %4 = vector.load %arg3[%c0_2, %c0_3, %c0_4] : memref<9x1x256xf32, #tpu.memory_space<vmem>>, vector<1x1x256xf32>
    %5 = vector.shape_cast %4 : vector<1x1x256xf32> to vector<1x256xf32>
    %6 = vector.broadcast %5 : vector<1x256xf32> to vector<2x256xf32>
    %7 = arith.mulf %3, %6 : vector<2x256xf32>
    %8 = arith.truncf %7 : vector<2x256xf32> to vector<2x256xbf16>
    %c0_5 = arith.constant 0 : index
    %c0_6 = arith.constant 0 : index
    %c0_7 = arith.constant 0 : index
    %9 = vector.load %arg4[%c0_5, %c0_6, %c0_7] : memref<9x64x2xbf16, #tpu.memory_space<vmem>>, vector<1x64x2xbf16>
    %10 = vector.shape_cast %9 : vector<1x64x2xbf16> to vector<64x2xbf16>
    %cst_8 = arith.constant dense<0.000000e+00> : vector<64x256xf32>
    %11 = tpu.matmul %10, %8, %cst_8 {dimension_numbers = #tpu.dot_dimension_numbers<[1], [0], [0], [1], [0, 0, 1, 1], [], []>} : vector<64x2xbf16>, vector<2x256xbf16>, vector<64x256xf32> -> vector<64x256xf32>
    %12 = arith.addf %2, %11 : vector<64x256xf32>
    %c16_i32 = arith.constant 16 : i32
    %13 = tpu.dynamic_rotate %1 by %c16_i32 dim 1 : vector<2x256xf32>, i32 -> vector<2x256xf32>
    %c1 = arith.constant 1 : index
    %c0_9 = arith.constant 0 : index
    %c0_10 = arith.constant 0 : index
    %14 = vector.load %arg3[%c1, %c0_9, %c0_10] : memref<9x1x256xf32, #tpu.memory_space<vmem>>, vector<1x1x256xf32>
    %15 = vector.shape_cast %14 : vector<1x1x256xf32> to vector<1x256xf32>
    %16 = vector.broadcast %15 : vector<1x256xf32> to vector<2x256xf32>
    %17 = arith.mulf %13, %16 : vector<2x256xf32>
    %18 = arith.truncf %17 : vector<2x256xf32> to vector<2x256xbf16>
    %c1_11 = arith.constant 1 : index
    %c0_12 = arith.constant 0 : index
    %c0_13 = arith.constant 0 : index
    %19 = vector.load %arg4[%c1_11, %c0_12, %c0_13] : memref<9x64x2xbf16, #tpu.memory_space<vmem>>, vector<1x64x2xbf16>
    %20 = vector.shape_cast %19 : vector<1x64x2xbf16> to vector<64x2xbf16>
    %cst_14 = arith.constant dense<0.000000e+00> : vector<64x256xf32>
    %21 = tpu.matmul %20, %18, %cst_14 {dimension_numbers = #tpu.dot_dimension_numbers<[1], [0], [0], [1], [0, 0, 1, 1], [], []>} : vector<64x2xbf16>, vector<2x256xbf16>, vector<64x256xf32> -> vector<64x256xf32>
    %22 = arith.addf %12, %21 : vector<64x256xf32>
    %c15_i32 = arith.constant 15 : i32
    %23 = tpu.dynamic_rotate %1 by %c15_i32 dim 1 : vector<2x256xf32>, i32 -> vector<2x256xf32>
    %c2 = arith.constant 2 : index
    %c0_15 = arith.constant 0 : index
    %c0_16 = arith.constant 0 : index
    %24 = vector.load %arg3[%c2, %c0_15, %c0_16] : memref<9x1x256xf32, #tpu.memory_space<vmem>>, vector<1x1x256xf32>
    %25 = vector.shape_cast %24 : vector<1x1x256xf32> to vector<1x256xf32>
    %26 = vector.broadcast %25 : vector<1x256xf32> to vector<2x256xf32>
    %27 = arith.mulf %23, %26 : vector<2x256xf32>
    %28 = arith.truncf %27 : vector<2x256xf32> to vector<2x256xbf16>
    %c2_17 = arith.constant 2 : index
    %c0_18 = arith.constant 0 : index
    %c0_19 = arith.constant 0 : index
    %29 = vector.load %arg4[%c2_17, %c0_18, %c0_19] : memref<9x64x2xbf16, #tpu.memory_space<vmem>>, vector<1x64x2xbf16>
    %30 = vector.shape_cast %29 : vector<1x64x2xbf16> to vector<64x2xbf16>
    %cst_20 = arith.constant dense<0.000000e+00> : vector<64x256xf32>
    %31 = tpu.matmul %30, %28, %cst_20 {dimension_numbers = #tpu.dot_dimension_numbers<[1], [0], [0], [1], [0, 0, 1, 1], [], []>} : vector<64x2xbf16>, vector<2x256xbf16>, vector<64x256xf32> -> vector<64x256xf32>
    %32 = arith.addf %22, %31 : vector<64x256xf32>
    %c1_i32 = arith.constant 1 : i32
    %33 = tpu.dynamic_rotate %1 by %c1_i32 dim 1 : vector<2x256xf32>, i32 -> vector<2x256xf32>
    %c3 = arith.constant 3 : index
    %c0_21 = arith.constant 0 : index
    %c0_22 = arith.constant 0 : index
    %34 = vector.load %arg3[%c3, %c0_21, %c0_22] : memref<9x1x256xf32, #tpu.memory_space<vmem>>, vector<1x1x256xf32>
    %35 = vector.shape_cast %34 : vector<1x1x256xf32> to vector<1x256xf32>
    %36 = vector.broadcast %35 : vector<1x256xf32> to vector<2x256xf32>
    %37 = arith.mulf %33, %36 : vector<2x256xf32>
    %38 = arith.truncf %37 : vector<2x256xf32> to vector<2x256xbf16>
    %c3_23 = arith.constant 3 : index
    %c0_24 = arith.constant 0 : index
    %c0_25 = arith.constant 0 : index
    %39 = vector.load %arg4[%c3_23, %c0_24, %c0_25] : memref<9x64x2xbf16, #tpu.memory_space<vmem>>, vector<1x64x2xbf16>
    %40 = vector.shape_cast %39 : vector<1x64x2xbf16> to vector<64x2xbf16>
    %cst_26 = arith.constant dense<0.000000e+00> : vector<64x256xf32>
    %41 = tpu.matmul %40, %38, %cst_26 {dimension_numbers = #tpu.dot_dimension_numbers<[1], [0], [0], [1], [0, 0, 1, 1], [], []>} : vector<64x2xbf16>, vector<2x256xbf16>, vector<64x256xf32> -> vector<64x256xf32>
    %42 = arith.addf %32, %41 : vector<64x256xf32>
    %c4 = arith.constant 4 : index
    %c0_27 = arith.constant 0 : index
    %c0_28 = arith.constant 0 : index
    %43 = vector.load %arg3[%c4, %c0_27, %c0_28] : memref<9x1x256xf32, #tpu.memory_space<vmem>>, vector<1x1x256xf32>
    %44 = vector.shape_cast %43 : vector<1x1x256xf32> to vector<1x256xf32>
    %45 = vector.broadcast %44 : vector<1x256xf32> to vector<2x256xf32>
    %46 = arith.mulf %1, %45 : vector<2x256xf32>
    %47 = arith.truncf %46 : vector<2x256xf32> to vector<2x256xbf16>
    %c4_29 = arith.constant 4 : index
    %c0_30 = arith.constant 0 : index
    %c0_31 = arith.constant 0 : index
    %48 = vector.load %arg4[%c4_29, %c0_30, %c0_31] : memref<9x64x2xbf16, #tpu.memory_space<vmem>>, vector<1x64x2xbf16>
    %49 = vector.shape_cast %48 : vector<1x64x2xbf16> to vector<64x2xbf16>
    %cst_32 = arith.constant dense<0.000000e+00> : vector<64x256xf32>
    %50 = tpu.matmul %49, %47, %cst_32 {dimension_numbers = #tpu.dot_dimension_numbers<[1], [0], [0], [1], [0, 0, 1, 1], [], []>} : vector<64x2xbf16>, vector<2x256xbf16>, vector<64x256xf32> -> vector<64x256xf32>
    %51 = arith.addf %42, %50 : vector<64x256xf32>
    %c255_i32 = arith.constant 255 : i32
    %52 = tpu.dynamic_rotate %1 by %c255_i32 dim 1 : vector<2x256xf32>, i32 -> vector<2x256xf32>
    %c5 = arith.constant 5 : index
    %c0_33 = arith.constant 0 : index
    %c0_34 = arith.constant 0 : index
    %53 = vector.load %arg3[%c5, %c0_33, %c0_34] : memref<9x1x256xf32, #tpu.memory_space<vmem>>, vector<1x1x256xf32>
    %54 = vector.shape_cast %53 : vector<1x1x256xf32> to vector<1x256xf32>
    %55 = vector.broadcast %54 : vector<1x256xf32> to vector<2x256xf32>
    %56 = arith.mulf %52, %55 : vector<2x256xf32>
    %57 = arith.truncf %56 : vector<2x256xf32> to vector<2x256xbf16>
    %c5_35 = arith.constant 5 : index
    %c0_36 = arith.constant 0 : index
    %c0_37 = arith.constant 0 : index
    %58 = vector.load %arg4[%c5_35, %c0_36, %c0_37] : memref<9x64x2xbf16, #tpu.memory_space<vmem>>, vector<1x64x2xbf16>
    %59 = vector.shape_cast %58 : vector<1x64x2xbf16> to vector<64x2xbf16>
    %cst_38 = arith.constant dense<0.000000e+00> : vector<64x256xf32>
    %60 = tpu.matmul %59, %57, %cst_38 {dimension_numbers = #tpu.dot_dimension_numbers<[1], [0], [0], [1], [0, 0, 1, 1], [], []>} : vector<64x2xbf16>, vector<2x256xbf16>, vector<64x256xf32> -> vector<64x256xf32>
    %61 = arith.addf %51, %60 : vector<64x256xf32>
    %c241_i32 = arith.constant 241 : i32
    %62 = tpu.dynamic_rotate %1 by %c241_i32 dim 1 : vector<2x256xf32>, i32 -> vector<2x256xf32>
    %c6 = arith.constant 6 : index
    %c0_39 = arith.constant 0 : index
    %c0_40 = arith.constant 0 : index
    %63 = vector.load %arg3[%c6, %c0_39, %c0_40] : memref<9x1x256xf32, #tpu.memory_space<vmem>>, vector<1x1x256xf32>
    %64 = vector.shape_cast %63 : vector<1x1x256xf32> to vector<1x256xf32>
    %65 = vector.broadcast %64 : vector<1x256xf32> to vector<2x256xf32>
    %66 = arith.mulf %62, %65 : vector<2x256xf32>
    %67 = arith.truncf %66 : vector<2x256xf32> to vector<2x256xbf16>
    %c6_41 = arith.constant 6 : index
    %c0_42 = arith.constant 0 : index
    %c0_43 = arith.constant 0 : index
    %68 = vector.load %arg4[%c6_41, %c0_42, %c0_43] : memref<9x64x2xbf16, #tpu.memory_space<vmem>>, vector<1x64x2xbf16>
    %69 = vector.shape_cast %68 : vector<1x64x2xbf16> to vector<64x2xbf16>
    %cst_44 = arith.constant dense<0.000000e+00> : vector<64x256xf32>
    %70 = tpu.matmul %69, %67, %cst_44 {dimension_numbers = #tpu.dot_dimension_numbers<[1], [0], [0], [1], [0, 0, 1, 1], [], []>} : vector<64x2xbf16>, vector<2x256xbf16>, vector<64x256xf32> -> vector<64x256xf32>
    %71 = arith.addf %61, %70 : vector<64x256xf32>
    %c240_i32 = arith.constant 240 : i32
    %72 = tpu.dynamic_rotate %1 by %c240_i32 dim 1 : vector<2x256xf32>, i32 -> vector<2x256xf32>
    %c7 = arith.constant 7 : index
    %c0_45 = arith.constant 0 : index
    %c0_46 = arith.constant 0 : index
    %73 = vector.load %arg3[%c7, %c0_45, %c0_46] : memref<9x1x256xf32, #tpu.memory_space<vmem>>, vector<1x1x256xf32>
    %74 = vector.shape_cast %73 : vector<1x1x256xf32> to vector<1x256xf32>
    %75 = vector.broadcast %74 : vector<1x256xf32> to vector<2x256xf32>
    %76 = arith.mulf %72, %75 : vector<2x256xf32>
    %77 = arith.truncf %76 : vector<2x256xf32> to vector<2x256xbf16>
    %c7_47 = arith.constant 7 : index
    %c0_48 = arith.constant 0 : index
    %c0_49 = arith.constant 0 : index
    %78 = vector.load %arg4[%c7_47, %c0_48, %c0_49] : memref<9x64x2xbf16, #tpu.memory_space<vmem>>, vector<1x64x2xbf16>
    %79 = vector.shape_cast %78 : vector<1x64x2xbf16> to vector<64x2xbf16>
    %cst_50 = arith.constant dense<0.000000e+00> : vector<64x256xf32>
    %80 = tpu.matmul %79, %77, %cst_50 {dimension_numbers = #tpu.dot_dimension_numbers<[1], [0], [0], [1], [0, 0, 1, 1], [], []>} : vector<64x2xbf16>, vector<2x256xbf16>, vector<64x256xf32> -> vector<64x256xf32>
    %81 = arith.addf %71, %80 : vector<64x256xf32>
    %c239_i32 = arith.constant 239 : i32
    %82 = tpu.dynamic_rotate %1 by %c239_i32 dim 1 : vector<2x256xf32>, i32 -> vector<2x256xf32>
    %c8 = arith.constant 8 : index
    %c0_51 = arith.constant 0 : index
    %c0_52 = arith.constant 0 : index
    %83 = vector.load %arg3[%c8, %c0_51, %c0_52] : memref<9x1x256xf32, #tpu.memory_space<vmem>>, vector<1x1x256xf32>
    %84 = vector.shape_cast %83 : vector<1x1x256xf32> to vector<1x256xf32>
    %85 = vector.broadcast %84 : vector<1x256xf32> to vector<2x256xf32>
    %86 = arith.mulf %82, %85 : vector<2x256xf32>
    %87 = arith.truncf %86 : vector<2x256xf32> to vector<2x256xbf16>
    %c8_53 = arith.constant 8 : index
    %c0_54 = arith.constant 0 : index
    %c0_55 = arith.constant 0 : index
    %88 = vector.load %arg4[%c8_53, %c0_54, %c0_55] : memref<9x64x2xbf16, #tpu.memory_space<vmem>>, vector<1x64x2xbf16>
    %89 = vector.shape_cast %88 : vector<1x64x2xbf16> to vector<64x2xbf16>
    %cst_56 = arith.constant dense<0.000000e+00> : vector<64x256xf32>
    %90 = tpu.matmul %89, %87, %cst_56 {dimension_numbers = #tpu.dot_dimension_numbers<[1], [0], [0], [1], [0, 0, 1, 1], [], []>} : vector<64x2xbf16>, vector<2x256xbf16>, vector<64x256xf32> -> vector<64x256xf32>
    %91 = arith.addf %81, %90 : vector<64x256xf32>
    %c0_57 = arith.constant 0 : index
    %c0_58 = arith.constant 0 : index
    %92 = vector.load %arg10[%c0_57, %c0_58] : memref<64x1xf32, #tpu.memory_space<vmem>>, vector<64x1xf32>
    %93 = vector.broadcast %92 : vector<64x1xf32> to vector<64x256xf32>
    %94 = arith.addf %91, %93 : vector<64x256xf32>
    %cst_59 = arith.constant 0.000000e+00 : f32
    %95 = vector.broadcast %cst_59 : f32 to vector<64x256xf32>
    %96 = arith.maximumf %94, %95 : vector<64x256xf32>
    %cst_60 = arith.constant 0.000000e+00 : f32
    %97 = vector.broadcast %cst_60 : f32 to vector<16x256xf32>
    %c17_i32_61 = arith.constant 17 : i32
    %98 = tpu.dynamic_rotate %96 by %c17_i32_61 dim 1 : vector<64x256xf32>, i32 -> vector<64x256xf32>
    %c0_62 = arith.constant 0 : index
    %c0_63 = arith.constant 0 : index
    %c0_64 = arith.constant 0 : index
    %99 = vector.load %arg3[%c0_62, %c0_63, %c0_64] : memref<9x1x256xf32, #tpu.memory_space<vmem>>, vector<1x1x256xf32>
    %100 = vector.shape_cast %99 : vector<1x1x256xf32> to vector<1x256xf32>
    %101 = vector.broadcast %100 : vector<1x256xf32> to vector<64x256xf32>
    %102 = arith.mulf %98, %101 : vector<64x256xf32>
    %103 = arith.truncf %102 : vector<64x256xf32> to vector<64x256xbf16>
    %c0_65 = arith.constant 0 : index
    %c0_66 = arith.constant 0 : index
    %c0_67 = arith.constant 0 : index
    %104 = vector.load %arg5[%c0_65, %c0_66, %c0_67] : memref<9x16x64xbf16, #tpu.memory_space<vmem>>, vector<1x16x64xbf16>
    %105 = vector.shape_cast %104 : vector<1x16x64xbf16> to vector<16x64xbf16>
    %cst_68 = arith.constant dense<0.000000e+00> : vector<16x256xf32>
    %106 = tpu.matmul %105, %103, %cst_68 {dimension_numbers = #tpu.dot_dimension_numbers<[1], [0], [0], [1], [0, 0, 1, 1], [], []>} : vector<16x64xbf16>, vector<64x256xbf16>, vector<16x256xf32> -> vector<16x256xf32>
    %107 = arith.addf %97, %106 : vector<16x256xf32>
    %c16_i32_69 = arith.constant 16 : i32
    %108 = tpu.dynamic_rotate %96 by %c16_i32_69 dim 1 : vector<64x256xf32>, i32 -> vector<64x256xf32>
    %c1_70 = arith.constant 1 : index
    %c0_71 = arith.constant 0 : index
    %c0_72 = arith.constant 0 : index
    %109 = vector.load %arg3[%c1_70, %c0_71, %c0_72] : memref<9x1x256xf32, #tpu.memory_space<vmem>>, vector<1x1x256xf32>
    %110 = vector.shape_cast %109 : vector<1x1x256xf32> to vector<1x256xf32>
    %111 = vector.broadcast %110 : vector<1x256xf32> to vector<64x256xf32>
    %112 = arith.mulf %108, %111 : vector<64x256xf32>
    %113 = arith.truncf %112 : vector<64x256xf32> to vector<64x256xbf16>
    %c1_73 = arith.constant 1 : index
    %c0_74 = arith.constant 0 : index
    %c0_75 = arith.constant 0 : index
    %114 = vector.load %arg5[%c1_73, %c0_74, %c0_75] : memref<9x16x64xbf16, #tpu.memory_space<vmem>>, vector<1x16x64xbf16>
    %115 = vector.shape_cast %114 : vector<1x16x64xbf16> to vector<16x64xbf16>
    %cst_76 = arith.constant dense<0.000000e+00> : vector<16x256xf32>
    %116 = tpu.matmul %115, %113, %cst_76 {dimension_numbers = #tpu.dot_dimension_numbers<[1], [0], [0], [1], [0, 0, 1, 1], [], []>} : vector<16x64xbf16>, vector<64x256xbf16>, vector<16x256xf32> -> vector<16x256xf32>
    %117 = arith.addf %107, %116 : vector<16x256xf32>
    %c15_i32_77 = arith.constant 15 : i32
    %118 = tpu.dynamic_rotate %96 by %c15_i32_77 dim 1 : vector<64x256xf32>, i32 -> vector<64x256xf32>
    %c2_78 = arith.constant 2 : index
    %c0_79 = arith.constant 0 : index
    %c0_80 = arith.constant 0 : index
    %119 = vector.load %arg3[%c2_78, %c0_79, %c0_80] : memref<9x1x256xf32, #tpu.memory_space<vmem>>, vector<1x1x256xf32>
    %120 = vector.shape_cast %119 : vector<1x1x256xf32> to vector<1x256xf32>
    %121 = vector.broadcast %120 : vector<1x256xf32> to vector<64x256xf32>
    %122 = arith.mulf %118, %121 : vector<64x256xf32>
    %123 = arith.truncf %122 : vector<64x256xf32> to vector<64x256xbf16>
    %c2_81 = arith.constant 2 : index
    %c0_82 = arith.constant 0 : index
    %c0_83 = arith.constant 0 : index
    %124 = vector.load %arg5[%c2_81, %c0_82, %c0_83] : memref<9x16x64xbf16, #tpu.memory_space<vmem>>, vector<1x16x64xbf16>
    %125 = vector.shape_cast %124 : vector<1x16x64xbf16> to vector<16x64xbf16>
    %cst_84 = arith.constant dense<0.000000e+00> : vector<16x256xf32>
    %126 = tpu.matmul %125, %123, %cst_84 {dimension_numbers = #tpu.dot_dimension_numbers<[1], [0], [0], [1], [0, 0, 1, 1], [], []>} : vector<16x64xbf16>, vector<64x256xbf16>, vector<16x256xf32> -> vector<16x256xf32>
    %127 = arith.addf %117, %126 : vector<16x256xf32>
    %c1_i32_85 = arith.constant 1 : i32
    %128 = tpu.dynamic_rotate %96 by %c1_i32_85 dim 1 : vector<64x256xf32>, i32 -> vector<64x256xf32>
    %c3_86 = arith.constant 3 : index
    %c0_87 = arith.constant 0 : index
    %c0_88 = arith.constant 0 : index
    %129 = vector.load %arg3[%c3_86, %c0_87, %c0_88] : memref<9x1x256xf32, #tpu.memory_space<vmem>>, vector<1x1x256xf32>
    %130 = vector.shape_cast %129 : vector<1x1x256xf32> to vector<1x256xf32>
    %131 = vector.broadcast %130 : vector<1x256xf32> to vector<64x256xf32>
    %132 = arith.mulf %128, %131 : vector<64x256xf32>
    %133 = arith.truncf %132 : vector<64x256xf32> to vector<64x256xbf16>
    %c3_89 = arith.constant 3 : index
    %c0_90 = arith.constant 0 : index
    %c0_91 = arith.constant 0 : index
    %134 = vector.load %arg5[%c3_89, %c0_90, %c0_91] : memref<9x16x64xbf16, #tpu.memory_space<vmem>>, vector<1x16x64xbf16>
    %135 = vector.shape_cast %134 : vector<1x16x64xbf16> to vector<16x64xbf16>
    %cst_92 = arith.constant dense<0.000000e+00> : vector<16x256xf32>
    %136 = tpu.matmul %135, %133, %cst_92 {dimension_numbers = #tpu.dot_dimension_numbers<[1], [0], [0], [1], [0, 0, 1, 1], [], []>} : vector<16x64xbf16>, vector<64x256xbf16>, vector<16x256xf32> -> vector<16x256xf32>
    %137 = arith.addf %127, %136 : vector<16x256xf32>
    %c4_93 = arith.constant 4 : index
    %c0_94 = arith.constant 0 : index
    %c0_95 = arith.constant 0 : index
    %138 = vector.load %arg3[%c4_93, %c0_94, %c0_95] : memref<9x1x256xf32, #tpu.memory_space<vmem>>, vector<1x1x256xf32>
    %139 = vector.shape_cast %138 : vector<1x1x256xf32> to vector<1x256xf32>
    %140 = vector.broadcast %139 : vector<1x256xf32> to vector<64x256xf32>
    %141 = arith.mulf %96, %140 : vector<64x256xf32>
    %142 = arith.truncf %141 : vector<64x256xf32> to vector<64x256xbf16>
    %c4_96 = arith.constant 4 : index
    %c0_97 = arith.constant 0 : index
    %c0_98 = arith.constant 0 : index
    %143 = vector.load %arg5[%c4_96, %c0_97, %c0_98] : memref<9x16x64xbf16, #tpu.memory_space<vmem>>, vector<1x16x64xbf16>
    %144 = vector.shape_cast %143 : vector<1x16x64xbf16> to vector<16x64xbf16>
    %cst_99 = arith.constant dense<0.000000e+00> : vector<16x256xf32>
    %145 = tpu.matmul %144, %142, %cst_99 {dimension_numbers = #tpu.dot_dimension_numbers<[1], [0], [0], [1], [0, 0, 1, 1], [], []>} : vector<16x64xbf16>, vector<64x256xbf16>, vector<16x256xf32> -> vector<16x256xf32>
    %146 = arith.addf %137, %145 : vector<16x256xf32>
    %c255_i32_100 = arith.constant 255 : i32
    %147 = tpu.dynamic_rotate %96 by %c255_i32_100 dim 1 : vector<64x256xf32>, i32 -> vector<64x256xf32>
    %c5_101 = arith.constant 5 : index
    %c0_102 = arith.constant 0 : index
    %c0_103 = arith.constant 0 : index
    %148 = vector.load %arg3[%c5_101, %c0_102, %c0_103] : memref<9x1x256xf32, #tpu.memory_space<vmem>>, vector<1x1x256xf32>
    %149 = vector.shape_cast %148 : vector<1x1x256xf32> to vector<1x256xf32>
    %150 = vector.broadcast %149 : vector<1x256xf32> to vector<64x256xf32>
    %151 = arith.mulf %147, %150 : vector<64x256xf32>
    %152 = arith.truncf %151 : vector<64x256xf32> to vector<64x256xbf16>
    %c5_104 = arith.constant 5 : index
    %c0_105 = arith.constant 0 : index
    %c0_106 = arith.constant 0 : index
    %153 = vector.load %arg5[%c5_104, %c0_105, %c0_106] : memref<9x16x64xbf16, #tpu.memory_space<vmem>>, vector<1x16x64xbf16>
    %154 = vector.shape_cast %153 : vector<1x16x64xbf16> to vector<16x64xbf16>
    %cst_107 = arith.constant dense<0.000000e+00> : vector<16x256xf32>
    %155 = tpu.matmul %154, %152, %cst_107 {dimension_numbers = #tpu.dot_dimension_numbers<[1], [0], [0], [1], [0, 0, 1, 1], [], []>} : vector<16x64xbf16>, vector<64x256xbf16>, vector<16x256xf32> -> vector<16x256xf32>
    %156 = arith.addf %146, %155 : vector<16x256xf32>
    %c241_i32_108 = arith.constant 241 : i32
    %157 = tpu.dynamic_rotate %96 by %c241_i32_108 dim 1 : vector<64x256xf32>, i32 -> vector<64x256xf32>
    %c6_109 = arith.constant 6 : index
    %c0_110 = arith.constant 0 : index
    %c0_111 = arith.constant 0 : index
    %158 = vector.load %arg3[%c6_109, %c0_110, %c0_111] : memref<9x1x256xf32, #tpu.memory_space<vmem>>, vector<1x1x256xf32>
    %159 = vector.shape_cast %158 : vector<1x1x256xf32> to vector<1x256xf32>
    %160 = vector.broadcast %159 : vector<1x256xf32> to vector<64x256xf32>
    %161 = arith.mulf %157, %160 : vector<64x256xf32>
    %162 = arith.truncf %161 : vector<64x256xf32> to vector<64x256xbf16>
    %c6_112 = arith.constant 6 : index
    %c0_113 = arith.constant 0 : index
    %c0_114 = arith.constant 0 : index
    %163 = vector.load %arg5[%c6_112, %c0_113, %c0_114] : memref<9x16x64xbf16, #tpu.memory_space<vmem>>, vector<1x16x64xbf16>
    %164 = vector.shape_cast %163 : vector<1x16x64xbf16> to vector<16x64xbf16>
    %cst_115 = arith.constant dense<0.000000e+00> : vector<16x256xf32>
    %165 = tpu.matmul %164, %162, %cst_115 {dimension_numbers = #tpu.dot_dimension_numbers<[1], [0], [0], [1], [0, 0, 1, 1], [], []>} : vector<16x64xbf16>, vector<64x256xbf16>, vector<16x256xf32> -> vector<16x256xf32>
    %166 = arith.addf %156, %165 : vector<16x256xf32>
    %c240_i32_116 = arith.constant 240 : i32
    %167 = tpu.dynamic_rotate %96 by %c240_i32_116 dim 1 : vector<64x256xf32>, i32 -> vector<64x256xf32>
    %c7_117 = arith.constant 7 : index
    %c0_118 = arith.constant 0 : index
    %c0_119 = arith.constant 0 : index
    %168 = vector.load %arg3[%c7_117, %c0_118, %c0_119] : memref<9x1x256xf32, #tpu.memory_space<vmem>>, vector<1x1x256xf32>
    %169 = vector.shape_cast %168 : vector<1x1x256xf32> to vector<1x256xf32>
    %170 = vector.broadcast %169 : vector<1x256xf32> to vector<64x256xf32>
    %171 = arith.mulf %167, %170 : vector<64x256xf32>
    %172 = arith.truncf %171 : vector<64x256xf32> to vector<64x256xbf16>
    %c7_120 = arith.constant 7 : index
    %c0_121 = arith.constant 0 : index
    %c0_122 = arith.constant 0 : index
    %173 = vector.load %arg5[%c7_120, %c0_121, %c0_122] : memref<9x16x64xbf16, #tpu.memory_space<vmem>>, vector<1x16x64xbf16>
    %174 = vector.shape_cast %173 : vector<1x16x64xbf16> to vector<16x64xbf16>
    %cst_123 = arith.constant dense<0.000000e+00> : vector<16x256xf32>
    %175 = tpu.matmul %174, %172, %cst_123 {dimension_numbers = #tpu.dot_dimension_numbers<[1], [0], [0], [1], [0, 0, 1, 1], [], []>} : vector<16x64xbf16>, vector<64x256xbf16>, vector<16x256xf32> -> vector<16x256xf32>
    %176 = arith.addf %166, %175 : vector<16x256xf32>
    %c239_i32_124 = arith.constant 239 : i32
    %177 = tpu.dynamic_rotate %96 by %c239_i32_124 dim 1 : vector<64x256xf32>, i32 -> vector<64x256xf32>
    %c8_125 = arith.constant 8 : index
    %c0_126 = arith.constant 0 : index
    %c0_127 = arith.constant 0 : index
    %178 = vector.load %arg3[%c8_125, %c0_126, %c0_127] : memref<9x1x256xf32, #tpu.memory_space<vmem>>, vector<1x1x256xf32>
    %179 = vector.shape_cast %178 : vector<1x1x256xf32> to vector<1x256xf32>
    %180 = vector.broadcast %179 : vector<1x256xf32> to vector<64x256xf32>
    %181 = arith.mulf %177, %180 : vector<64x256xf32>
    %182 = arith.truncf %181 : vector<64x256xf32> to vector<64x256xbf16>
    %c8_128 = arith.constant 8 : index
    %c0_129 = arith.constant 0 : index
    %c0_130 = arith.constant 0 : index
    %183 = vector.load %arg5[%c8_128, %c0_129, %c0_130] : memref<9x16x64xbf16, #tpu.memory_space<vmem>>, vector<1x16x64xbf16>
    %184 = vector.shape_cast %183 : vector<1x16x64xbf16> to vector<16x64xbf16>
    %cst_131 = arith.constant dense<0.000000e+00> : vector<16x256xf32>
    %185 = tpu.matmul %184, %182, %cst_131 {dimension_numbers = #tpu.dot_dimension_numbers<[1], [0], [0], [1], [0, 0, 1, 1], [], []>} : vector<16x64xbf16>, vector<64x256xbf16>, vector<16x256xf32> -> vector<16x256xf32>
    %186 = arith.addf %176, %185 : vector<16x256xf32>
    %c0_132 = arith.constant 0 : index
    %c0_133 = arith.constant 0 : index
    %187 = vector.load %arg11[%c0_132, %c0_133] : memref<16x1xf32, #tpu.memory_space<vmem>>, vector<16x1xf32>
    %188 = vector.broadcast %187 : vector<16x1xf32> to vector<16x256xf32>
    %189 = arith.addf %186, %188 : vector<16x256xf32>
    %cst_134 = arith.constant 0.000000e+00 : f32
    %190 = vector.broadcast %cst_134 : f32 to vector<16x256xf32>
    %191 = arith.maximumf %189, %190 : vector<16x256xf32>
    %cst_135 = arith.constant 0.000000e+00 : f32
    %192 = vector.broadcast %cst_135 : f32 to vector<1x256xf32>
    %c17_i32_136 = arith.constant 17 : i32
    %193 = tpu.dynamic_rotate %191 by %c17_i32_136 dim 1 : vector<16x256xf32>, i32 -> vector<16x256xf32>
    %c0_137 = arith.constant 0 : index
    %c0_138 = arith.constant 0 : index
    %c0_139 = arith.constant 0 : index
    %194 = vector.load %arg3[%c0_137, %c0_138, %c0_139] : memref<9x1x256xf32, #tpu.memory_space<vmem>>, vector<1x1x256xf32>
    %195 = vector.shape_cast %194 : vector<1x1x256xf32> to vector<1x256xf32>
    %196 = vector.broadcast %195 : vector<1x256xf32> to vector<16x256xf32>
    %197 = arith.mulf %193, %196 : vector<16x256xf32>
    %198 = arith.truncf %197 : vector<16x256xf32> to vector<16x256xbf16>
    %c0_140 = arith.constant 0 : index
    %c0_141 = arith.constant 0 : index
    %c0_142 = arith.constant 0 : index
    %199 = vector.load %arg6[%c0_140, %c0_141, %c0_142] : memref<9x1x16xbf16, #tpu.memory_space<vmem>>, vector<1x1x16xbf16>
    %200 = vector.shape_cast %199 : vector<1x1x16xbf16> to vector<1x16xbf16>
    %cst_143 = arith.constant dense<0.000000e+00> : vector<1x256xf32>
    %201 = tpu.matmul %200, %198, %cst_143 {dimension_numbers = #tpu.dot_dimension_numbers<[1], [0], [0], [1], [0, 0, 1, 1], [], []>} : vector<1x16xbf16>, vector<16x256xbf16>, vector<1x256xf32> -> vector<1x256xf32>
    %202 = arith.addf %192, %201 : vector<1x256xf32>
    %c16_i32_144 = arith.constant 16 : i32
    %203 = tpu.dynamic_rotate %191 by %c16_i32_144 dim 1 : vector<16x256xf32>, i32 -> vector<16x256xf32>
    %c1_145 = arith.constant 1 : index
    %c0_146 = arith.constant 0 : index
    %c0_147 = arith.constant 0 : index
    %204 = vector.load %arg3[%c1_145, %c0_146, %c0_147] : memref<9x1x256xf32, #tpu.memory_space<vmem>>, vector<1x1x256xf32>
    %205 = vector.shape_cast %204 : vector<1x1x256xf32> to vector<1x256xf32>
    %206 = vector.broadcast %205 : vector<1x256xf32> to vector<16x256xf32>
    %207 = arith.mulf %203, %206 : vector<16x256xf32>
    %208 = arith.truncf %207 : vector<16x256xf32> to vector<16x256xbf16>
    %c1_148 = arith.constant 1 : index
    %c0_149 = arith.constant 0 : index
    %c0_150 = arith.constant 0 : index
    %209 = vector.load %arg6[%c1_148, %c0_149, %c0_150] : memref<9x1x16xbf16, #tpu.memory_space<vmem>>, vector<1x1x16xbf16>
    %210 = vector.shape_cast %209 : vector<1x1x16xbf16> to vector<1x16xbf16>
    %cst_151 = arith.constant dense<0.000000e+00> : vector<1x256xf32>
    %211 = tpu.matmul %210, %208, %cst_151 {dimension_numbers = #tpu.dot_dimension_numbers<[1], [0], [0], [1], [0, 0, 1, 1], [], []>} : vector<1x16xbf16>, vector<16x256xbf16>, vector<1x256xf32> -> vector<1x256xf32>
    %212 = arith.addf %202, %211 : vector<1x256xf32>
    %c15_i32_152 = arith.constant 15 : i32
    %213 = tpu.dynamic_rotate %191 by %c15_i32_152 dim 1 : vector<16x256xf32>, i32 -> vector<16x256xf32>
    %c2_153 = arith.constant 2 : index
    %c0_154 = arith.constant 0 : index
    %c0_155 = arith.constant 0 : index
    %214 = vector.load %arg3[%c2_153, %c0_154, %c0_155] : memref<9x1x256xf32, #tpu.memory_space<vmem>>, vector<1x1x256xf32>
    %215 = vector.shape_cast %214 : vector<1x1x256xf32> to vector<1x256xf32>
    %216 = vector.broadcast %215 : vector<1x256xf32> to vector<16x256xf32>
    %217 = arith.mulf %213, %216 : vector<16x256xf32>
    %218 = arith.truncf %217 : vector<16x256xf32> to vector<16x256xbf16>
    %c2_156 = arith.constant 2 : index
    %c0_157 = arith.constant 0 : index
    %c0_158 = arith.constant 0 : index
    %219 = vector.load %arg6[%c2_156, %c0_157, %c0_158] : memref<9x1x16xbf16, #tpu.memory_space<vmem>>, vector<1x1x16xbf16>
    %220 = vector.shape_cast %219 : vector<1x1x16xbf16> to vector<1x16xbf16>
    %cst_159 = arith.constant dense<0.000000e+00> : vector<1x256xf32>
    %221 = tpu.matmul %220, %218, %cst_159 {dimension_numbers = #tpu.dot_dimension_numbers<[1], [0], [0], [1], [0, 0, 1, 1], [], []>} : vector<1x16xbf16>, vector<16x256xbf16>, vector<1x256xf32> -> vector<1x256xf32>
    %222 = arith.addf %212, %221 : vector<1x256xf32>
    %c1_i32_160 = arith.constant 1 : i32
    %223 = tpu.dynamic_rotate %191 by %c1_i32_160 dim 1 : vector<16x256xf32>, i32 -> vector<16x256xf32>
    %c3_161 = arith.constant 3 : index
    %c0_162 = arith.constant 0 : index
    %c0_163 = arith.constant 0 : index
    %224 = vector.load %arg3[%c3_161, %c0_162, %c0_163] : memref<9x1x256xf32, #tpu.memory_space<vmem>>, vector<1x1x256xf32>
    %225 = vector.shape_cast %224 : vector<1x1x256xf32> to vector<1x256xf32>
    %226 = vector.broadcast %225 : vector<1x256xf32> to vector<16x256xf32>
    %227 = arith.mulf %223, %226 : vector<16x256xf32>
    %228 = arith.truncf %227 : vector<16x256xf32> to vector<16x256xbf16>
    %c3_164 = arith.constant 3 : index
    %c0_165 = arith.constant 0 : index
    %c0_166 = arith.constant 0 : index
    %229 = vector.load %arg6[%c3_164, %c0_165, %c0_166] : memref<9x1x16xbf16, #tpu.memory_space<vmem>>, vector<1x1x16xbf16>
    %230 = vector.shape_cast %229 : vector<1x1x16xbf16> to vector<1x16xbf16>
    %cst_167 = arith.constant dense<0.000000e+00> : vector<1x256xf32>
    %231 = tpu.matmul %230, %228, %cst_167 {dimension_numbers = #tpu.dot_dimension_numbers<[1], [0], [0], [1], [0, 0, 1, 1], [], []>} : vector<1x16xbf16>, vector<16x256xbf16>, vector<1x256xf32> -> vector<1x256xf32>
    %232 = arith.addf %222, %231 : vector<1x256xf32>
    %c4_168 = arith.constant 4 : index
    %c0_169 = arith.constant 0 : index
    %c0_170 = arith.constant 0 : index
    %233 = vector.load %arg3[%c4_168, %c0_169, %c0_170] : memref<9x1x256xf32, #tpu.memory_space<vmem>>, vector<1x1x256xf32>
    %234 = vector.shape_cast %233 : vector<1x1x256xf32> to vector<1x256xf32>
    %235 = vector.broadcast %234 : vector<1x256xf32> to vector<16x256xf32>
    %236 = arith.mulf %191, %235 : vector<16x256xf32>
    %237 = arith.truncf %236 : vector<16x256xf32> to vector<16x256xbf16>
    %c4_171 = arith.constant 4 : index
    %c0_172 = arith.constant 0 : index
    %c0_173 = arith.constant 0 : index
    %238 = vector.load %arg6[%c4_171, %c0_172, %c0_173] : memref<9x1x16xbf16, #tpu.memory_space<vmem>>, vector<1x1x16xbf16>
    %239 = vector.shape_cast %238 : vector<1x1x16xbf16> to vector<1x16xbf16>
    %cst_174 = arith.constant dense<0.000000e+00> : vector<1x256xf32>
    %240 = tpu.matmul %239, %237, %cst_174 {dimension_numbers = #tpu.dot_dimension_numbers<[1], [0], [0], [1], [0, 0, 1, 1], [], []>} : vector<1x16xbf16>, vector<16x256xbf16>, vector<1x256xf32> -> vector<1x256xf32>
    %241 = arith.addf %232, %240 : vector<1x256xf32>
    %c255_i32_175 = arith.constant 255 : i32
    %242 = tpu.dynamic_rotate %191 by %c255_i32_175 dim 1 : vector<16x256xf32>, i32 -> vector<16x256xf32>
    %c5_176 = arith.constant 5 : index
    %c0_177 = arith.constant 0 : index
    %c0_178 = arith.constant 0 : index
    %243 = vector.load %arg3[%c5_176, %c0_177, %c0_178] : memref<9x1x256xf32, #tpu.memory_space<vmem>>, vector<1x1x256xf32>
    %244 = vector.shape_cast %243 : vector<1x1x256xf32> to vector<1x256xf32>
    %245 = vector.broadcast %244 : vector<1x256xf32> to vector<16x256xf32>
    %246 = arith.mulf %242, %245 : vector<16x256xf32>
    %247 = arith.truncf %246 : vector<16x256xf32> to vector<16x256xbf16>
    %c5_179 = arith.constant 5 : index
    %c0_180 = arith.constant 0 : index
    %c0_181 = arith.constant 0 : index
    %248 = vector.load %arg6[%c5_179, %c0_180, %c0_181] : memref<9x1x16xbf16, #tpu.memory_space<vmem>>, vector<1x1x16xbf16>
    %249 = vector.shape_cast %248 : vector<1x1x16xbf16> to vector<1x16xbf16>
    %cst_182 = arith.constant dense<0.000000e+00> : vector<1x256xf32>
    %250 = tpu.matmul %249, %247, %cst_182 {dimension_numbers = #tpu.dot_dimension_numbers<[1], [0], [0], [1], [0, 0, 1, 1], [], []>} : vector<1x16xbf16>, vector<16x256xbf16>, vector<1x256xf32> -> vector<1x256xf32>
    %251 = arith.addf %241, %250 : vector<1x256xf32>
    %c241_i32_183 = arith.constant 241 : i32
    %252 = tpu.dynamic_rotate %191 by %c241_i32_183 dim 1 : vector<16x256xf32>, i32 -> vector<16x256xf32>
    %c6_184 = arith.constant 6 : index
    %c0_185 = arith.constant 0 : index
    %c0_186 = arith.constant 0 : index
    %253 = vector.load %arg3[%c6_184, %c0_185, %c0_186] : memref<9x1x256xf32, #tpu.memory_space<vmem>>, vector<1x1x256xf32>
    %254 = vector.shape_cast %253 : vector<1x1x256xf32> to vector<1x256xf32>
    %255 = vector.broadcast %254 : vector<1x256xf32> to vector<16x256xf32>
    %256 = arith.mulf %252, %255 : vector<16x256xf32>
    %257 = arith.truncf %256 : vector<16x256xf32> to vector<16x256xbf16>
    %c6_187 = arith.constant 6 : index
    %c0_188 = arith.constant 0 : index
    %c0_189 = arith.constant 0 : index
    %258 = vector.load %arg6[%c6_187, %c0_188, %c0_189] : memref<9x1x16xbf16, #tpu.memory_space<vmem>>, vector<1x1x16xbf16>
    %259 = vector.shape_cast %258 : vector<1x1x16xbf16> to vector<1x16xbf16>
    %cst_190 = arith.constant dense<0.000000e+00> : vector<1x256xf32>
    %260 = tpu.matmul %259, %257, %cst_190 {dimension_numbers = #tpu.dot_dimension_numbers<[1], [0], [0], [1], [0, 0, 1, 1], [], []>} : vector<1x16xbf16>, vector<16x256xbf16>, vector<1x256xf32> -> vector<1x256xf32>
    %261 = arith.addf %251, %260 : vector<1x256xf32>
    %c240_i32_191 = arith.constant 240 : i32
    %262 = tpu.dynamic_rotate %191 by %c240_i32_191 dim 1 : vector<16x256xf32>, i32 -> vector<16x256xf32>
    %c7_192 = arith.constant 7 : index
    %c0_193 = arith.constant 0 : index
    %c0_194 = arith.constant 0 : index
    %263 = vector.load %arg3[%c7_192, %c0_193, %c0_194] : memref<9x1x256xf32, #tpu.memory_space<vmem>>, vector<1x1x256xf32>
    %264 = vector.shape_cast %263 : vector<1x1x256xf32> to vector<1x256xf32>
    %265 = vector.broadcast %264 : vector<1x256xf32> to vector<16x256xf32>
    %266 = arith.mulf %262, %265 : vector<16x256xf32>
    %267 = arith.truncf %266 : vector<16x256xf32> to vector<16x256xbf16>
    %c7_195 = arith.constant 7 : index
    %c0_196 = arith.constant 0 : index
    %c0_197 = arith.constant 0 : index
    %268 = vector.load %arg6[%c7_195, %c0_196, %c0_197] : memref<9x1x16xbf16, #tpu.memory_space<vmem>>, vector<1x1x16xbf16>
    %269 = vector.shape_cast %268 : vector<1x1x16xbf16> to vector<1x16xbf16>
    %cst_198 = arith.constant dense<0.000000e+00> : vector<1x256xf32>
    %270 = tpu.matmul %269, %267, %cst_198 {dimension_numbers = #tpu.dot_dimension_numbers<[1], [0], [0], [1], [0, 0, 1, 1], [], []>} : vector<1x16xbf16>, vector<16x256xbf16>, vector<1x256xf32> -> vector<1x256xf32>
    %271 = arith.addf %261, %270 : vector<1x256xf32>
    %c239_i32_199 = arith.constant 239 : i32
    %272 = tpu.dynamic_rotate %191 by %c239_i32_199 dim 1 : vector<16x256xf32>, i32 -> vector<16x256xf32>
    %c8_200 = arith.constant 8 : index
    %c0_201 = arith.constant 0 : index
    %c0_202 = arith.constant 0 : index
    %273 = vector.load %arg3[%c8_200, %c0_201, %c0_202] : memref<9x1x256xf32, #tpu.memory_space<vmem>>, vector<1x1x256xf32>
    %274 = vector.shape_cast %273 : vector<1x1x256xf32> to vector<1x256xf32>
    %275 = vector.broadcast %274 : vector<1x256xf32> to vector<16x256xf32>
    %276 = arith.mulf %272, %275 : vector<16x256xf32>
    %277 = arith.truncf %276 : vector<16x256xf32> to vector<16x256xbf16>
    %c8_203 = arith.constant 8 : index
    %c0_204 = arith.constant 0 : index
    %c0_205 = arith.constant 0 : index
    %278 = vector.load %arg6[%c8_203, %c0_204, %c0_205] : memref<9x1x16xbf16, #tpu.memory_space<vmem>>, vector<1x1x16xbf16>
    %279 = vector.shape_cast %278 : vector<1x1x16xbf16> to vector<1x16xbf16>
    %cst_206 = arith.constant dense<0.000000e+00> : vector<1x256xf32>
    %280 = tpu.matmul %279, %277, %cst_206 {dimension_numbers = #tpu.dot_dimension_numbers<[1], [0], [0], [1], [0, 0, 1, 1], [], []>} : vector<1x16xbf16>, vector<16x256xbf16>, vector<1x256xf32> -> vector<1x256xf32>
    %281 = arith.addf %271, %280 : vector<1x256xf32>
    %c0_207 = arith.constant 0 : index
    %c0_208 = arith.constant 0 : index
    %282 = vector.load %arg12[%c0_207, %c0_208] : memref<1x1xf32, #tpu.memory_space<vmem>>, vector<1x1xf32>
    %283 = vector.broadcast %282 : vector<1x1xf32> to vector<1x256xf32>
    %284 = arith.addf %281, %283 : vector<1x256xf32>
    %285 = arith.negf %284 : vector<1x256xf32>
    %286 = math.exp %285 : vector<1x256xf32>
    %cst_209 = arith.constant 1.000000e+00 : f32
    %287 = vector.broadcast %cst_209 : f32 to vector<1x256xf32>
    %288 = arith.addf %287, %286 : vector<1x256xf32>
    %289 = arith.divf %287, %288 : vector<1x256xf32>
    %c0_210 = arith.constant 0 : index
    %c0_211 = arith.constant 0 : index
    %c0_212 = arith.constant 0 : index
    %290 = vector.load %arg17[%c0_210, %c0_211, %c0_212] : memref<1x1x256xf32, #tpu.memory_space<vmem>>, vector<1x1x256xf32>
    %291 = vector.shape_cast %290 : vector<1x1x256xf32> to vector<1x256xf32>
    %292 = vector.shape_cast %289 : vector<1x256xf32> to vector<1x1x256xf32>
    tpu.vector_store %arg17[%c0_210, %c0_211, %c0_212], %292 {strides = array<i32>} : memref<1x1x256xf32, #tpu.memory_space<vmem>>, vector<1x1x256xf32>,
    %c0_213 = arith.constant 0 : index
    %c0_214 = arith.constant 0 : index
    %c0_215 = arith.constant 0 : index
    %293 = vector.load %arg2[%c0_213, %c0_214, %c0_215] : memref<1x4x256xf32, #tpu.memory_space<vmem>>, vector<1x4x256xf32>
    %294 = vector.shape_cast %293 : vector<1x4x256xf32> to vector<4x256xf32>
    %295 = arith.truncf %294 : vector<4x256xf32> to vector<4x256xbf16>
    %c0_216 = arith.constant 0 : index
    %c0_217 = arith.constant 0 : index
    %296 = vector.load %arg7[%c0_216, %c0_217] : memref<192x4xbf16, #tpu.memory_space<vmem>>, vector<192x4xbf16>
    %cst_218 = arith.constant dense<0.000000e+00> : vector<192x256xf32>
    %297 = tpu.matmul %296, %295, %cst_218 {dimension_numbers = #tpu.dot_dimension_numbers<[1], [0], [0], [1], [0, 0, 1, 1], [], []>} : vector<192x4xbf16>, vector<4x256xbf16>, vector<192x256xf32> -> vector<192x256xf32>
    %298 = vector.extract_strided_slice %296 {offsets = [0, 3], sizes = [192, 1], strides = [1, 1]} : vector<192x4xbf16> to vector<192x1xbf16>
    %299 = arith.extf %298 : vector<192x1xbf16> to vector<192x1xf32>
    %300 = vector.broadcast %299 : vector<192x1xf32> to vector<192x256xf32>
    %301 = vector.broadcast %289 : vector<1x256xf32> to vector<192x256xf32>
    %302 = arith.mulf %300, %301 : vector<192x256xf32>
    %303 = arith.addf %297, %302 : vector<192x256xf32>
    %c0_219 = arith.constant 0 : index
    %c0_220 = arith.constant 0 : index
    %304 = vector.load %arg13[%c0_219, %c0_220] : memref<192x1xf32, #tpu.memory_space<vmem>>, vector<192x1xf32>
    %305 = vector.broadcast %304 : vector<192x1xf32> to vector<192x256xf32>
    %306 = arith.addf %303, %305 : vector<192x256xf32>
    %307 = vector.extract_strided_slice %306 {offsets = [0, 0], sizes = [64, 256], strides = [1, 1]} : vector<192x256xf32> to vector<64x256xf32>
    %308 = vector.extract_strided_slice %306 {offsets = [64, 0], sizes = [64, 256], strides = [1, 1]} : vector<192x256xf32> to vector<64x256xf32>
    %309 = vector.extract_strided_slice %306 {offsets = [128, 0], sizes = [64, 256], strides = [1, 1]} : vector<192x256xf32> to vector<64x256xf32>
    %310 = tpu.transpose %307, [1, 0] : vector<64x256xf32> -> vector<256x64xf32>
    %311 = arith.truncf %310 : vector<256x64xf32> to vector<256x64xbf16>
    %312 = arith.truncf %308 : vector<64x256xf32> to vector<64x256xbf16>
    %cst_221 = arith.constant dense<0.000000e+00> : vector<256x256xf32>
    %313 = tpu.matmul %311, %312, %cst_221 {dimension_numbers = #tpu.dot_dimension_numbers<[1], [0], [0], [1], [0, 0, 1, 1], [], []>} : vector<256x64xbf16>, vector<64x256xbf16>, vector<256x256xf32> -> vector<256x256xf32>
    %cst_222 = arith.constant dense<0xFF800000> : vector<256xf32>
    %314 = vector.multi_reduction <maximumf>, %313, %cst_222 [1] : vector<256x256xf32> to vector<256xf32>
    %315 = vector.shape_cast %314 : vector<256xf32> to vector<256x1xf32>
    %316 = vector.broadcast %315 : vector<256x1xf32> to vector<256x256xf32>
    %317 = arith.subf %313, %316 : vector<256x256xf32>
    %318 = math.exp %317 : vector<256x256xf32>
    %cst_223 = arith.constant dense<0.000000e+00> : vector<256xf32>
    %319 = vector.multi_reduction <add>, %318, %cst_223 [1] : vector<256x256xf32> to vector<256xf32>
    %320 = vector.shape_cast %319 : vector<256xf32> to vector<256x1xf32>
    %321 = tpu.reciprocal %320 {approx = true} : vector<256x1xf32> -> vector<256x1xf32>
    %322 = vector.broadcast %321 : vector<256x1xf32> to vector<256x256xf32>
    %323 = arith.mulf %318, %322 : vector<256x256xf32>
    %324 = arith.truncf %309 : vector<64x256xf32> to vector<64x256xbf16>
    %325 = arith.truncf %323 : vector<256x256xf32> to vector<256x256xbf16>
    %cst_224 = arith.constant dense<0.000000e+00> : vector<64x256xf32>
    %326 = tpu.matmul %324, %325, %cst_224 {dimension_numbers = #tpu.dot_dimension_numbers<[1], [1], [0], [0], [0, 0, 1, 0], [], []>} : vector<64x256xbf16>, vector<256x256xbf16>, vector<64x256xf32> -> vector<64x256xf32>
    %c0_225 = arith.constant 0 : index
    %c0_226 = arith.constant 0 : index
    %327 = vector.load %arg8[%c0_225, %c0_226] : memref<16x64xbf16, #tpu.memory_space<vmem>>, vector<16x64xbf16>
    %328 = arith.truncf %326 : vector<64x256xf32> to vector<64x256xbf16>
    %cst_227 = arith.constant dense<0.000000e+00> : vector<16x256xf32>
    %329 = tpu.matmul %327, %328, %cst_227 {dimension_numbers = #tpu.dot_dimension_numbers<[1], [0], [0], [1], [0, 0, 1, 1], [], []>} : vector<16x64xbf16>, vector<64x256xbf16>, vector<16x256xf32> -> vector<16x256xf32>
    %c0_228 = arith.constant 0 : index
    %c0_229 = arith.constant 0 : index
    %330 = vector.load %arg14[%c0_228, %c0_229] : memref<16x1xf32, #tpu.memory_space<vmem>>, vector<16x1xf32>
    %331 = vector.broadcast %330 : vector<16x1xf32> to vector<16x256xf32>
    %332 = arith.addf %329, %331 : vector<16x256xf32>
    %cst_230 = arith.constant 0.000000e+00 : f32
    %333 = vector.broadcast %cst_230 : f32 to vector<16x256xf32>
    %334 = arith.maximumf %332, %333 : vector<16x256xf32>
    %cst_231 = arith.constant 5.000000e-01 : f32
    %335 = vector.broadcast %cst_231 : f32 to vector<1x256xf32>
    %336 = arith.mulf %335, %289 : vector<1x256xf32>
    %cst_232 = arith.constant 5.000000e-01 : f32
    %337 = vector.broadcast %cst_232 : f32 to vector<1x256xf32>
    %338 = arith.addf %336, %337 : vector<1x256xf32>
    %339 = vector.broadcast %338 : vector<1x256xf32> to vector<16x256xf32>
    %340 = arith.mulf %334, %339 : vector<16x256xf32>
    %cst_233 = arith.constant 0.000000e+00 : f32
    %341 = vector.broadcast %cst_233 : f32 to vector<4x256xf32>
    %c17_i32_234 = arith.constant 17 : i32
    %342 = tpu.dynamic_rotate %340 by %c17_i32_234 dim 1 : vector<16x256xf32>, i32 -> vector<16x256xf32>
    %c0_235 = arith.constant 0 : index
    %c0_236 = arith.constant 0 : index
    %c0_237 = arith.constant 0 : index
    %343 = vector.load %arg3[%c0_235, %c0_236, %c0_237] : memref<9x1x256xf32, #tpu.memory_space<vmem>>, vector<1x1x256xf32>
    %344 = vector.shape_cast %343 : vector<1x1x256xf32> to vector<1x256xf32>
    %345 = vector.broadcast %344 : vector<1x256xf32> to vector<16x256xf32>
    %346 = arith.mulf %342, %345 : vector<16x256xf32>
    %347 = arith.truncf %346 : vector<16x256xf32> to vector<16x256xbf16>
    %c0_238 = arith.constant 0 : index
    %c0_239 = arith.constant 0 : index
    %c0_240 = arith.constant 0 : index
    %348 = vector.load %arg9[%c0_238, %c0_239, %c0_240] : memref<9x4x16xbf16, #tpu.memory_space<vmem>>, vector<1x4x16xbf16>
    %349 = vector.shape_cast %348 : vector<1x4x16xbf16> to vector<4x16xbf16>
    %cst_241 = arith.constant dense<0.000000e+00> : vector<4x256xf32>
    %350 = tpu.matmul %349, %347, %cst_241 {dimension_numbers = #tpu.dot_dimension_numbers<[1], [0], [0], [1], [0, 0, 1, 1], [], []>} : vector<4x16xbf16>, vector<16x256xbf16>, vector<4x256xf32> -> vector<4x256xf32>
    %351 = arith.addf %341, %350 : vector<4x256xf32>
    %c16_i32_242 = arith.constant 16 : i32
    %352 = tpu.dynamic_rotate %340 by %c16_i32_242 dim 1 : vector<16x256xf32>, i32 -> vector<16x256xf32>
    %c1_243 = arith.constant 1 : index
    %c0_244 = arith.constant 0 : index
    %c0_245 = arith.constant 0 : index
    %353 = vector.load %arg3[%c1_243, %c0_244, %c0_245] : memref<9x1x256xf32, #tpu.memory_space<vmem>>, vector<1x1x256xf32>
    %354 = vector.shape_cast %353 : vector<1x1x256xf32> to vector<1x256xf32>
    %355 = vector.broadcast %354 : vector<1x256xf32> to vector<16x256xf32>
    %356 = arith.mulf %352, %355 : vector<16x256xf32>
    %357 = arith.truncf %356 : vector<16x256xf32> to vector<16x256xbf16>
    %c1_246 = arith.constant 1 : index
    %c0_247 = arith.constant 0 : index
    %c0_248 = arith.constant 0 : index
    %358 = vector.load %arg9[%c1_246, %c0_247, %c0_248] : memref<9x4x16xbf16, #tpu.memory_space<vmem>>, vector<1x4x16xbf16>
    %359 = vector.shape_cast %358 : vector<1x4x16xbf16> to vector<4x16xbf16>
    %cst_249 = arith.constant dense<0.000000e+00> : vector<4x256xf32>
    %360 = tpu.matmul %359, %357, %cst_249 {dimension_numbers = #tpu.dot_dimension_numbers<[1], [0], [0], [1], [0, 0, 1, 1], [], []>} : vector<4x16xbf16>, vector<16x256xbf16>, vector<4x256xf32> -> vector<4x256xf32>
    %361 = arith.addf %351, %360 : vector<4x256xf32>
    %c15_i32_250 = arith.constant 15 : i32
    %362 = tpu.dynamic_rotate %340 by %c15_i32_250 dim 1 : vector<16x256xf32>, i32 -> vector<16x256xf32>
    %c2_251 = arith.constant 2 : index
    %c0_252 = arith.constant 0 : index
    %c0_253 = arith.constant 0 : index
    %363 = vector.load %arg3[%c2_251, %c0_252, %c0_253] : memref<9x1x256xf32, #tpu.memory_space<vmem>>, vector<1x1x256xf32>
    %364 = vector.shape_cast %363 : vector<1x1x256xf32> to vector<1x256xf32>
    %365 = vector.broadcast %364 : vector<1x256xf32> to vector<16x256xf32>
    %366 = arith.mulf %362, %365 : vector<16x256xf32>
    %367 = arith.truncf %366 : vector<16x256xf32> to vector<16x256xbf16>
    %c2_254 = arith.constant 2 : index
    %c0_255 = arith.constant 0 : index
    %c0_256 = arith.constant 0 : index
    %368 = vector.load %arg9[%c2_254, %c0_255, %c0_256] : memref<9x4x16xbf16, #tpu.memory_space<vmem>>, vector<1x4x16xbf16>
    %369 = vector.shape_cast %368 : vector<1x4x16xbf16> to vector<4x16xbf16>
    %cst_257 = arith.constant dense<0.000000e+00> : vector<4x256xf32>
    %370 = tpu.matmul %369, %367, %cst_257 {dimension_numbers = #tpu.dot_dimension_numbers<[1], [0], [0], [1], [0, 0, 1, 1], [], []>} : vector<4x16xbf16>, vector<16x256xbf16>, vector<4x256xf32> -> vector<4x256xf32>
    %371 = arith.addf %361, %370 : vector<4x256xf32>
    %c1_i32_258 = arith.constant 1 : i32
    %372 = tpu.dynamic_rotate %340 by %c1_i32_258 dim 1 : vector<16x256xf32>, i32 -> vector<16x256xf32>
    %c3_259 = arith.constant 3 : index
    %c0_260 = arith.constant 0 : index
    %c0_261 = arith.constant 0 : index
    %373 = vector.load %arg3[%c3_259, %c0_260, %c0_261] : memref<9x1x256xf32, #tpu.memory_space<vmem>>, vector<1x1x256xf32>
    %374 = vector.shape_cast %373 : vector<1x1x256xf32> to vector<1x256xf32>
    %375 = vector.broadcast %374 : vector<1x256xf32> to vector<16x256xf32>
    %376 = arith.mulf %372, %375 : vector<16x256xf32>
    %377 = arith.truncf %376 : vector<16x256xf32> to vector<16x256xbf16>
    %c3_262 = arith.constant 3 : index
    %c0_263 = arith.constant 0 : index
    %c0_264 = arith.constant 0 : index
    %378 = vector.load %arg9[%c3_262, %c0_263, %c0_264] : memref<9x4x16xbf16, #tpu.memory_space<vmem>>, vector<1x4x16xbf16>
    %379 = vector.shape_cast %378 : vector<1x4x16xbf16> to vector<4x16xbf16>
    %cst_265 = arith.constant dense<0.000000e+00> : vector<4x256xf32>
    %380 = tpu.matmul %379, %377, %cst_265 {dimension_numbers = #tpu.dot_dimension_numbers<[1], [0], [0], [1], [0, 0, 1, 1], [], []>} : vector<4x16xbf16>, vector<16x256xbf16>, vector<4x256xf32> -> vector<4x256xf32>
    %381 = arith.addf %371, %380 : vector<4x256xf32>
    %c4_266 = arith.constant 4 : index
    %c0_267 = arith.constant 0 : index
    %c0_268 = arith.constant 0 : index
    %382 = vector.load %arg3[%c4_266, %c0_267, %c0_268] : memref<9x1x256xf32, #tpu.memory_space<vmem>>, vector<1x1x256xf32>
    %383 = vector.shape_cast %382 : vector<1x1x256xf32> to vector<1x256xf32>
    %384 = vector.broadcast %383 : vector<1x256xf32> to vector<16x256xf32>
    %385 = arith.mulf %340, %384 : vector<16x256xf32>
    %386 = arith.truncf %385 : vector<16x256xf32> to vector<16x256xbf16>
    %c4_269 = arith.constant 4 : index
    %c0_270 = arith.constant 0 : index
    %c0_271 = arith.constant 0 : index
    %387 = vector.load %arg9[%c4_269, %c0_270, %c0_271] : memref<9x4x16xbf16, #tpu.memory_space<vmem>>, vector<1x4x16xbf16>
    %388 = vector.shape_cast %387 : vector<1x4x16xbf16> to vector<4x16xbf16>
    %cst_272 = arith.constant dense<0.000000e+00> : vector<4x256xf32>
    %389 = tpu.matmul %388, %386, %cst_272 {dimension_numbers = #tpu.dot_dimension_numbers<[1], [0], [0], [1], [0, 0, 1, 1], [], []>} : vector<4x16xbf16>, vector<16x256xbf16>, vector<4x256xf32> -> vector<4x256xf32>
    %390 = arith.addf %381, %389 : vector<4x256xf32>
    %c255_i32_273 = arith.constant 255 : i32
    %391 = tpu.dynamic_rotate %340 by %c255_i32_273 dim 1 : vector<16x256xf32>, i32 -> vector<16x256xf32>
    %c5_274 = arith.constant 5 : index
    %c0_275 = arith.constant 0 : index
    %c0_276 = arith.constant 0 : index
    %392 = vector.load %arg3[%c5_274, %c0_275, %c0_276] : memref<9x1x256xf32, #tpu.memory_space<vmem>>, vector<1x1x256xf32>
    %393 = vector.shape_cast %392 : vector<1x1x256xf32> to vector<1x256xf32>
    %394 = vector.broadcast %393 : vector<1x256xf32> to vector<16x256xf32>
    %395 = arith.mulf %391, %394 : vector<16x256xf32>
    %396 = arith.truncf %395 : vector<16x256xf32> to vector<16x256xbf16>
    %c5_277 = arith.constant 5 : index
    %c0_278 = arith.constant 0 : index
    %c0_279 = arith.constant 0 : index
    %397 = vector.load %arg9[%c5_277, %c0_278, %c0_279] : memref<9x4x16xbf16, #tpu.memory_space<vmem>>, vector<1x4x16xbf16>
    %398 = vector.shape_cast %397 : vector<1x4x16xbf16> to vector<4x16xbf16>
    %cst_280 = arith.constant dense<0.000000e+00> : vector<4x256xf32>
    %399 = tpu.matmul %398, %396, %cst_280 {dimension_numbers = #tpu.dot_dimension_numbers<[1], [0], [0], [1], [0, 0, 1, 1], [], []>} : vector<4x16xbf16>, vector<16x256xbf16>, vector<4x256xf32> -> vector<4x256xf32>
    %400 = arith.addf %390, %399 : vector<4x256xf32>
    %c241_i32_281 = arith.constant 241 : i32
    %401 = tpu.dynamic_rotate %340 by %c241_i32_281 dim 1 : vector<16x256xf32>, i32 -> vector<16x256xf32>
    %c6_282 = arith.constant 6 : index
    %c0_283 = arith.constant 0 : index
    %c0_284 = arith.constant 0 : index
    %402 = vector.load %arg3[%c6_282, %c0_283, %c0_284] : memref<9x1x256xf32, #tpu.memory_space<vmem>>, vector<1x1x256xf32>
    %403 = vector.shape_cast %402 : vector<1x1x256xf32> to vector<1x256xf32>
    %404 = vector.broadcast %403 : vector<1x256xf32> to vector<16x256xf32>
    %405 = arith.mulf %401, %404 : vector<16x256xf32>
    %406 = arith.truncf %405 : vector<16x256xf32> to vector<16x256xbf16>
    %c6_285 = arith.constant 6 : index
    %c0_286 = arith.constant 0 : index
    %c0_287 = arith.constant 0 : index
    %407 = vector.load %arg9[%c6_285, %c0_286, %c0_287] : memref<9x4x16xbf16, #tpu.memory_space<vmem>>, vector<1x4x16xbf16>
    %408 = vector.shape_cast %407 : vector<1x4x16xbf16> to vector<4x16xbf16>
    %cst_288 = arith.constant dense<0.000000e+00> : vector<4x256xf32>
    %409 = tpu.matmul %408, %406, %cst_288 {dimension_numbers = #tpu.dot_dimension_numbers<[1], [0], [0], [1], [0, 0, 1, 1], [], []>} : vector<4x16xbf16>, vector<16x256xbf16>, vector<4x256xf32> -> vector<4x256xf32>
    %410 = arith.addf %400, %409 : vector<4x256xf32>
    %c240_i32_289 = arith.constant 240 : i32
    %411 = tpu.dynamic_rotate %340 by %c240_i32_289 dim 1 : vector<16x256xf32>, i32 -> vector<16x256xf32>
    %c7_290 = arith.constant 7 : index
    %c0_291 = arith.constant 0 : index
    %c0_292 = arith.constant 0 : index
    %412 = vector.load %arg3[%c7_290, %c0_291, %c0_292] : memref<9x1x256xf32, #tpu.memory_space<vmem>>, vector<1x1x256xf32>
    %413 = vector.shape_cast %412 : vector<1x1x256xf32> to vector<1x256xf32>
    %414 = vector.broadcast %413 : vector<1x256xf32> to vector<16x256xf32>
    %415 = arith.mulf %411, %414 : vector<16x256xf32>
    %416 = arith.truncf %415 : vector<16x256xf32> to vector<16x256xbf16>
    %c7_293 = arith.constant 7 : index
    %c0_294 = arith.constant 0 : index
    %c0_295 = arith.constant 0 : index
    %417 = vector.load %arg9[%c7_293, %c0_294, %c0_295] : memref<9x4x16xbf16, #tpu.memory_space<vmem>>, vector<1x4x16xbf16>
    %418 = vector.shape_cast %417 : vector<1x4x16xbf16> to vector<4x16xbf16>
    %cst_296 = arith.constant dense<0.000000e+00> : vector<4x256xf32>
    %419 = tpu.matmul %418, %416, %cst_296 {dimension_numbers = #tpu.dot_dimension_numbers<[1], [0], [0], [1], [0, 0, 1, 1], [], []>} : vector<4x16xbf16>, vector<16x256xbf16>, vector<4x256xf32> -> vector<4x256xf32>
    %420 = arith.addf %410, %419 : vector<4x256xf32>
    %c239_i32_297 = arith.constant 239 : i32
    %421 = tpu.dynamic_rotate %340 by %c239_i32_297 dim 1 : vector<16x256xf32>, i32 -> vector<16x256xf32>
    %c8_298 = arith.constant 8 : index
    %c0_299 = arith.constant 0 : index
    %c0_300 = arith.constant 0 : index
    %422 = vector.load %arg3[%c8_298, %c0_299, %c0_300] : memref<9x1x256xf32, #tpu.memory_space<vmem>>, vector<1x1x256xf32>
    %423 = vector.shape_cast %422 : vector<1x1x256xf32> to vector<1x256xf32>
    %424 = vector.broadcast %423 : vector<1x256xf32> to vector<16x256xf32>
    %425 = arith.mulf %421, %424 : vector<16x256xf32>
    %426 = arith.truncf %425 : vector<16x256xf32> to vector<16x256xbf16>
    %c8_301 = arith.constant 8 : index
    %c0_302 = arith.constant 0 : index
    %c0_303 = arith.constant 0 : index
    %427 = vector.load %arg9[%c8_301, %c0_302, %c0_303] : memref<9x4x16xbf16, #tpu.memory_space<vmem>>, vector<1x4x16xbf16>
    %428 = vector.shape_cast %427 : vector<1x4x16xbf16> to vector<4x16xbf16>
    %cst_304 = arith.constant dense<0.000000e+00> : vector<4x256xf32>
    %429 = tpu.matmul %428, %426, %cst_304 {dimension_numbers = #tpu.dot_dimension_numbers<[1], [0], [0], [1], [0, 0, 1, 1], [], []>} : vector<4x16xbf16>, vector<16x256xbf16>, vector<4x256xf32> -> vector<4x256xf32>
    %430 = arith.addf %420, %429 : vector<4x256xf32>
    %c0_305 = arith.constant 0 : index
    %c0_306 = arith.constant 0 : index
    %431 = vector.load %arg15[%c0_305, %c0_306] : memref<4x1xf32, #tpu.memory_space<vmem>>, vector<4x1xf32>
    %432 = vector.broadcast %431 : vector<4x1xf32> to vector<4x256xf32>
    %433 = arith.addf %430, %432 : vector<4x256xf32>
    %cst_307 = arith.constant dense<0xFF800000> : vector<256xf32>
    %434 = vector.multi_reduction <maximumf>, %433, %cst_307 [0] : vector<4x256xf32> to vector<256xf32>
    %435 = vector.shape_cast %434 : vector<256xf32> to vector<1x256xf32>
    %436 = vector.broadcast %435 : vector<1x256xf32> to vector<4x256xf32>
    %437 = arith.subf %433, %436 : vector<4x256xf32>
    %438 = math.exp %437 : vector<4x256xf32>
    %cst_308 = arith.constant dense<0.000000e+00> : vector<256xf32>
    %439 = vector.multi_reduction <add>, %438, %cst_308 [0] : vector<4x256xf32> to vector<256xf32>
    %440 = vector.shape_cast %439 : vector<256xf32> to vector<1x256xf32>
    %441 = vector.broadcast %440 : vector<1x256xf32> to vector<4x256xf32>
    %442 = arith.divf %438, %441 : vector<4x256xf32>
    %c0_309 = arith.constant 0 : index
    %c0_310 = arith.constant 0 : index
    %c0_311 = arith.constant 0 : index
    %443 = vector.load %arg16[%c0_309, %c0_310, %c0_311] : memref<1x4x256xf32, #tpu.memory_space<vmem>>, vector<1x4x256xf32>
    %444 = vector.shape_cast %443 : vector<1x4x256xf32> to vector<4x256xf32>
    %445 = vector.shape_cast %442 : vector<4x256xf32> to vector<1x4x256xf32>
    tpu.vector_store %arg16[%c0_309, %c0_310, %c0_311], %445 {strides = array<i32>} : memref<1x4x256xf32, #tpu.memory_space<vmem>>, vector<1x4x256xf32>,
    return
  }
  func.func @transform_0(%arg0: i32) -> (i32, i32, i32) {
    %c0_i32 = arith.constant 0 : i32
    %c0_i32_0 = arith.constant 0 : i32
    %c0_i32_1 = arith.constant 0 : i32
    return %arg0, %c0_i32, %c0_i32_0 : i32, i32, i32
  }
  func.func @transform_1(%arg0: i32) -> (i32, i32, i32) {
    %c0_i32 = arith.constant 0 : i32
    %c0_i32_0 = arith.constant 0 : i32
    %c0_i32_1 = arith.constant 0 : i32
    return %arg0, %c0_i32, %c0_i32_0 : i32, i32, i32
  }
  func.func @transform_2(%arg0: i32) -> (i32, i32, i32) {
    %c0_i32 = arith.constant 0 : i32
    %c0_i32_0 = arith.constant 0 : i32
    %c0_i32_1 = arith.constant 0 : i32
    %c0_i32_2 = arith.constant 0 : i32
    return %c0_i32, %c0_i32_0, %c0_i32_1 : i32, i32, i32
  }
  func.func @transform_3(%arg0: i32) -> (i32, i32, i32) {
    %c0_i32 = arith.constant 0 : i32
    %c0_i32_0 = arith.constant 0 : i32
    %c0_i32_1 = arith.constant 0 : i32
    %c0_i32_2 = arith.constant 0 : i32
    return %c0_i32, %c0_i32_0, %c0_i32_1 : i32, i32, i32
  }
  func.func @transform_4(%arg0: i32) -> (i32, i32, i32) {
    %c0_i32 = arith.constant 0 : i32
    %c0_i32_0 = arith.constant 0 : i32
    %c0_i32_1 = arith.constant 0 : i32
    %c0_i32_2 = arith.constant 0 : i32
    return %c0_i32, %c0_i32_0, %c0_i32_1 : i32, i32, i32
  }
  func.func @transform_5(%arg0: i32) -> (i32, i32, i32) {
    %c0_i32 = arith.constant 0 : i32
    %c0_i32_0 = arith.constant 0 : i32
    %c0_i32_1 = arith.constant 0 : i32
    %c0_i32_2 = arith.constant 0 : i32
    return %c0_i32, %c0_i32_0, %c0_i32_1 : i32, i32, i32
  }
  func.func @transform_6(%arg0: i32) -> (i32, i32) {
    %c0_i32 = arith.constant 0 : i32
    %c0_i32_0 = arith.constant 0 : i32
    %c0_i32_1 = arith.constant 0 : i32
    return %c0_i32, %c0_i32_0 : i32, i32
  }
  func.func @transform_7(%arg0: i32) -> (i32, i32) {
    %c0_i32 = arith.constant 0 : i32
    %c0_i32_0 = arith.constant 0 : i32
    %c0_i32_1 = arith.constant 0 : i32
    return %c0_i32, %c0_i32_0 : i32, i32
  }
  func.func @transform_8(%arg0: i32) -> (i32, i32, i32) {
    %c0_i32 = arith.constant 0 : i32
    %c0_i32_0 = arith.constant 0 : i32
    %c0_i32_1 = arith.constant 0 : i32
    %c0_i32_2 = arith.constant 0 : i32
    return %c0_i32, %c0_i32_0, %c0_i32_1 : i32, i32, i32
  }
  func.func @transform_9(%arg0: i32) -> (i32, i32) {
    %c0_i32 = arith.constant 0 : i32
    %c0_i32_0 = arith.constant 0 : i32
    %c0_i32_1 = arith.constant 0 : i32
    return %c0_i32, %c0_i32_0 : i32, i32
  }
  func.func @transform_10(%arg0: i32) -> (i32, i32) {
    %c0_i32 = arith.constant 0 : i32
    %c0_i32_0 = arith.constant 0 : i32
    %c0_i32_1 = arith.constant 0 : i32
    return %c0_i32, %c0_i32_0 : i32, i32
  }
  func.func @transform_11(%arg0: i32) -> (i32, i32) {
    %c0_i32 = arith.constant 0 : i32
    %c0_i32_0 = arith.constant 0 : i32
    %c0_i32_1 = arith.constant 0 : i32
    return %c0_i32, %c0_i32_0 : i32, i32
  }
  func.func @transform_12(%arg0: i32) -> (i32, i32) {
    %c0_i32 = arith.constant 0 : i32
    %c0_i32_0 = arith.constant 0 : i32
    %c0_i32_1 = arith.constant 0 : i32
    return %c0_i32, %c0_i32_0 : i32, i32
  }
  func.func @transform_13(%arg0: i32) -> (i32, i32) {
    %c0_i32 = arith.constant 0 : i32
    %c0_i32_0 = arith.constant 0 : i32
    %c0_i32_1 = arith.constant 0 : i32
    return %c0_i32, %c0_i32_0 : i32, i32
  }
  func.func @transform_14(%arg0: i32) -> (i32, i32) {
    %c0_i32 = arith.constant 0 : i32
    %c0_i32_0 = arith.constant 0 : i32
    %c0_i32_1 = arith.constant 0 : i32
    return %c0_i32, %c0_i32_0 : i32, i32
  }
  func.func @transform_15(%arg0: i32) -> (i32, i32, i32) {
    %c0_i32 = arith.constant 0 : i32
    %c0_i32_0 = arith.constant 0 : i32
    %c0_i32_1 = arith.constant 0 : i32
    return %arg0, %c0_i32, %c0_i32_0 : i32, i32, i32
  }
  func.func @transform_16(%arg0: i32) -> (i32, i32, i32) {
    %c0_i32 = arith.constant 0 : i32
    %c0_i32_0 = arith.constant 0 : i32
    %c0_i32_1 = arith.constant 0 : i32
    return %arg0, %c0_i32, %c0_i32_0 : i32, i32, i32
  }
}

</mosaic_0001>

<bundles_post_ra>
// kernel: open_access_net_forward.1
= control target key start
LH: loop header
LB: loop body
LE: loop exit
PB: predicated region body
PF: predicated region fallthrough
CT: control target
= control target key end

     0   :  { %s7299_s23 = smov 0   ;;  %s10278_s0 = inlined_call_operand.vmem [shape: f32[2,2,256], index: 0, kind: input, shape index: {}]   ;;  %s10279_s1 = inlined_call_operand.vmem [shape: f32[2,4,256], index: 1, kind: input, shape index: {}]   ;;  %s10280_s2 = inlined_call_operand.vmem [shape: f32[9,1,256], index: 2, kind: input, shape index: {}]   ;;  %s10281_s3 = inlined_call_operand.vmem [shape: bf16[9,64,2], index: 3, kind: input, shape index: {}]   ;;  %s10282_s4 = inlined_call_operand.vmem [shape: bf16[9,16,64], index: 4, kind: input, shape index: {}]   ;;  %s10283_s5 = inlined_call_operand.vmem [shape: bf16[9,1,16], index: 5, kind: input, shape index: {}]   ;;  %s10284_s6 = inlined_call_operand.vmem [shape: bf16[192,4], index: 6, kind: input, shape index: {}]   ;;  %s10285_s7 = inlined_call_operand.vmem [shape: bf16[16,64], index: 7, kind: input, shape index: {}]   ;;  %s10286_s8 = inlined_call_operand.vmem [shape: bf16[9,4,16], index: 8, kind: input, shape index: {}]   ;;  %s10287_s9 = inlined_call_operand.vmem [shape: f32[64,1], index: 9, kind: input, shape index: {}]   ;;  %s10288_s10 = inlined_call_operand.vmem [shape: f32[16,1], index: 10, kind: input, shape index: {}]   ;;  %s10289_s11 = inlined_call_operand.<no memory space> [shape: f32[1,1], index: 11, kind: input, shape index: {}]   ;;  %s10290_s12 = inlined_call_operand.vmem [shape: f32[192,1], index: 12, kind: input, shape index: {}]   ;;  %s10291_s13 = inlined_call_operand.vmem [shape: f32[16,1], index: 13, kind: input, shape index: {}]   ;;  %s10292_s14 = inlined_call_operand.vmem [shape: f32[4,1], index: 14, kind: input, shape index: {}]   ;;  %s10293_s15 = inlined_call_operand.vmem [shape: f32[2,4,256], index: 15, kind: output, shape index: {0}]   ;;  %s10294_s16 = inlined_call_operand.vmem [shape: f32[2,1,256], index: 16, kind: output, shape index: {1}]  }
   0x1   :  { %10407 = sst [smem:[#allocation41_spill]] %s10278_s0  ;;  %v22_v0 = vstv %s10289_s11 }
   0x2   :  { %23 = vst [vmem:[#allocation2] sm:$0x1] %v22_v0 }
   0x3 LB: > { %s6358_s24 = sadd.s32 4294967295, %s7197_s23   ;;  %p6362_p0 = scmp.ge.s32.totalorder %s7197_s23, 1  ;;  %s7197_s23 = sphi %s7299_s23, %s29_s23  }
   0x4   : > { %p477_p1 = scmp.lt.s32.totalorder %s7197_s23, 3 }
   0x6   : > { %p478_p2 = pnand %p6362_p0, %p477_p1 }
   0x8   : > { %481 = sbr.rel (%p478_p2) target bundleno = 3490 (0xda2), region = 80 }
   0xf   : > { %p536_p3 = scmp.lt.s32.totalorder %s6358_s24, 1  ;;  %v10299_v1 = vlaneseq  ;;  %v7199_v2 = vmov 1983009808   ;;  %s10409_s27 = sld [smem:[#allocation41_spill]]  ;;  %v10300_v10 = vmov 0   ;;  %vm667_vm3 = vcmask 1040384  }
  0x10   : > { %v559_v3 = vunpack.c.l.s4 %v7199_v2  ;;  %s7200_s29 = smov 16   ;;  %s7201_s30 = smov 17   ;;  %706 = vmatprep.mubr.bf16.mxu0 %v10300_v10  ;;  %6831 = vset.pattern.permute.xlu1 %v10300_v10  ;;  %v577_v14 = vld [vmem:[%s10280_s2] sm:$0x3]  ;;  %v6370_v15 = vld [vmem:[%s10280_s2 + $0x2] sm:$0x3] }
  0x11   : > { %s10580_s24 = smov (!%p536_p3, %s6358_s24), 1  ;;  %v7310_v4 = vshrl.u32 %v10299_v1, 7  ;;  %6830 = vset.pattern.permute.xlu0 %v10300_v10  ;;  %2258 = vmatprep.mubr.bf16.mxu1 %v10300_v10  ;;  %s7203_s0 = smov 15   ;;  %v7344_v11 = vand.u32 127, %v10299_v1  ;;  %v6397_v18 = vld [vmem:[%s10280_s2 + $0x4] sm:$0x3] }
  0x12   : > { %v560_v5 = vunpack.c.0.s8 %v559_v3  ;;  %s6646_s11 = sshll.u32 %s10580_s24, 2  ;;  %s7204_s17 = smov 1   ;;  %v6912_v42 = vld [vmem:[%s10281_s3 + $0x20] sm:$0xff]   ;;  %vm654_vm4 = vcmask 15360   ;;  %v6913_v46 = vld [vmem:[%s10281_s3 + $0x28] sm:$0xff]   ;;  %v6914_v47 = vld [vmem:[%s10281_s3 + $0x30] sm:$0xff]  }
  0x13   : > { %10408 = vst [vmem:[#allocation3_spill] sm:$0xff] %v7310_v4  ;;  %s10354_s18 = smov 127   ;;  %s10352_s19 = smov 113   ;;  %10410 = vst [vmem:[#allocation4_spill] sm:$0xff] %v7344_v11  ;;  %v7347_v12 = vsub.s32 0, %v7310_v4  ;;  %v7350_v13 = vsub.s32 1, %v7310_v4 }
  0x14   : > { %v7317_v6 = vsub.s32 %v560_v5, %v7310_v4  ;;  %s10297_s20 = smov 112   ;;  %s10295_s21 = smov 111   ;;  %vm574_vm0 = vcmp.lt.s32.totalorder %v7344_v11, 17  ;;  %vm605_vm1 = vcmp.lt.s32.totalorder %v7344_v11, 16  ;;  %vm862_vm2 = vcmp.lt.s32.totalorder %v7344_v11, 15  ;;  %v6915_v51 = vld [vmem:[%s10281_s3 + $0x38] sm:$0xff]  }
  0x15   : > { %s540_s28 = scalar_lea.vmem %s10409_s27, %s6646_s11  ;;  %10411 = vst [vmem:[#allocation5_spill] sm:$0xff] %v7347_v12  ;;  %10412 = vst [vmem:[#allocation6_spill] sm:$0xff] %v7350_v13  ;;  %v7364_v19 = vrot.slane %v577_v14, %v7347_v12  ;;  %v7367_v20 = vrot.slane %v577_v14, %v7350_v13  ;;  %v7370_v21 = vrot.slane %v6370_v15, %v7350_v13  ;;  %v6415_v50 = vld [vmem:[%s10280_s2 + $0x6] sm:$0x3]  ;;  %vm1022_vm5 = vcmp.lt.s32.totalorder %v7344_v11, 1  ;;  %v6917_v63 = vld [vmem:[%s10281_s3 + $0x8] sm:$0xff]  }
  0x16   : > { %v7319_v7 = vld [vmem:[%s540_s28] sm:$0xf]  ;;  %v7373_v22 = vrot.slane %v6370_v15, %v7347_v12  ;;  %v7377_v25 = vrot.slane %v6397_v18, %v7350_v13  ;;  %v7415_v48 = vrot.slane %v6397_v18, %v7347_v12  ;;  %v7428_v55 = vrot.slane %v6415_v50, %v7350_v13  ;;  %v6433_v62 = vld [vmem:[%s10280_s2 + $0x8] sm:$0x3]  ;;  %v6918_v5 = vld [vmem:[%s10281_s3 + $0x10] sm:$0xff]   ;;  %s10441_s27 = smov 112  }
  0x17   : > { %v564_v8 = vrot.slane %v7319_v7, %v7317_v6  ;;  %v6916_v59 = vld [vmem:[%s10281_s3] sm:$0xff]   ;;  %v7449_v0 = vrot.slane %v6433_v62, %v7347_v12  ;;  %v7452_v2 = vrot.slane %v6433_v62, %v7350_v13  ;;  %vm1352_vm6 = vcmp.lt.s32.totalorder %v7344_v11, 127  ;;  %v6487_v62 = vld [vmem:[%s10280_s2 + $0xe] sm:$0x3]  ;;  %s10445_s28 = smov 111   ;;  %s10576_s26 = smov 127  }
  0x18   : > { %vm1512_vm7 = vcmp.lt.s32.totalorder %v7344_v11, 113  ;;  %vm1672_vm8 = vcmp.lt.s32.totalorder %v7344_v11, 112  ;;  %vm1832_vm9 = vcmp.lt.s32.totalorder %v7344_v11, 111  ;;  %vm2222_vm10 = vcmask 523264   ;;  %s10577_s22 = smov 113  }
  0x19   : > { %601 = vrot.lane.b32.xlu0 %v564_v8, %s7200_s29  ;;  %568 = vrot.lane.b32.xlu1 %v564_v8, %s7201_s30  ;;  %v565_v9 = vcombine.high %v564_v8, %v564_v8  ;;  %10413 = vst [vmem:[#allocation7_spill] sm:$0xff] %v7449_v0  ;;  %10414 = vst [vmem:[#allocation8_spill] sm:$0xff] %v7452_v2  ;;  %v1189_v3 = vcombine.low %v7449_v0, %v7452_v2  ;;  %vm3243_vm11 = vcmask 130048   ;;  %vm4156_vm12 = vcmask 1041408  }
  0x1a   : > { %vm4119_vm13 = vcmask 31744   ;;  %vm6216_vm15 = vcmask 1043456  }
  0x1d   : > { %603 = vrot.lane.b32.xlu0 %v565_v9, %s7200_s29  ;;  %570 = vrot.lane.b32.xlu1 %v565_v9, %s7201_s30 }
  0x21   : > { %860 = vrot.lane.b32.xlu1 %v565_v9, %s7203_s0  ;;  %858 = vrot.lane.b32.xlu0 %v564_v8, %s7203_s0 }
  0x25   : > { %1020 = vrot.lane.b32.xlu1 %v565_v9, %s7204_s17  ;;  %1018 = vrot.lane.b32.xlu0 %v564_v8, %s7204_s17 }
  0x29   : > { %1350 = vrot.lane.b32.xlu1 %v565_v9, %s10354_s18  ;;  %1348 = vrot.lane.b32.xlu0 %v564_v8, %s10354_s18 }
  0x2d   : > { %1510 = vrot.lane.b32.xlu1 %v565_v9, %s10352_s19  ;;  %1508 = vrot.lane.b32.xlu0 %v564_v8, %s10352_s19 }
  0x31   : > { %1670 = vrot.lane.b32.xlu1 %v565_v9, %s10297_s20  ;;  %1668 = vrot.lane.b32.xlu0 %v564_v8, %s10297_s20  ;;  %s6647_s20 = sshll.u32 %s10580_s24, 3 }
  0x32   : > { %s545_s11 = scalar_lea.vmem %s10279_s1, %s6647_s20 }
  0x35   : > { %1830 = vrot.lane.b32.xlu1 %v565_v9, %s10295_s21  ;;  %1828 = vrot.lane.b32.xlu0 %v564_v8, %s10295_s21  ;;  %v1196_v8 = vrot.slane %v1189_v3, %v7317_v6  ;;  %v7465_v9 = vrot.slane %v6415_v50, %v7347_v12 }
  0x37   : > { %10415 = vst [vmem:[#allocation9_spill] sm:$0xff] %v7465_v9  ;;  %v1198_v14 = vmul.f32 %v1196_v8, %v7319_v7  ;;  %v6920_v7 = vld [vmem:[%s10281_s3 + $0x40] sm:$0xff]  }
  0x39   : > { %v1206_v18 = vrot.slane %v1198_v14, %v7317_v6  ;;  %v6921_v6 = vld [vmem:[%s10281_s3 + $0x48] sm:$0xff]   ;;  %v7578_v14 = vrot.slane %v6487_v62, %v7350_v13 }
  0x3b   : > { %10420 = vst [vmem:[#allocation14_spill] sm:$0xff] %v7578_v14 }
  0x8b   : > { %v602_v16 = vpop.permute.xlu0 %601  ;;  %v569_v17 = vpop.permute.xlu1 %568 }
  0x8f   : > { %v604_v23 = vpop.permute.xlu0 %603  ;;  %v571_v24 = vpop.permute.xlu1 %570 }
  0x90   : > { %v607_v26 = vsel %vm605_vm1, %v604_v23, %v602_v16  ;;  %v575_v27 = vsel %vm574_vm0, %v569_v17, %v571_v24  ;;  %v576_v28 = vsel %vm574_vm0, %v571_v24, %v569_v17  ;;  %v606_v29 = vsel %vm605_vm1, %v602_v16, %v604_v23  ;;  %v6919_v16 = vld [vmem:[%s10281_s3 + $0x18] sm:$0xff]  }
  0x91   : > { %v589_v30 = vmul.f32 %v7364_v19, %v576_v28  ;;  %v590_v31 = vmul.f32 %v7367_v20, %v575_v27  ;;  %v622_v32 = vmul.f32 %v7370_v21, %v606_v29  ;;  %v621_v33 = vmul.f32 %v7373_v22, %v607_v26  ;;  %v6922_v28 = vld [vmem:[%s10281_s3 + $0x50] sm:$0xff]   ;;  %v6451_v29 = vld [vmem:[%s10280_s2 + $0xa] sm:$0x3] }
  0x92   : > { %v1207_v24 = vcombine.high %v1206_v18, %v1206_v18 }
  0x93   : > { %v591_v34 = vpack.c.bf16 %v589_v30, %v589_v30  ;;  %v592_v35 = vpack.c.bf16 %v590_v31, %v590_v31  ;;  %v624_v36 = vpack.c.bf16 %v622_v32, %v622_v32  ;;  %v623_v37 = vpack.c.bf16 %v621_v33, %v621_v33  ;;  %v861_v38 = vpop.permute.xlu1 %860  ;;  %v859_v39 = vpop.permute.xlu0 %858  ;;  %v6923_v30 = vld [vmem:[%s10281_s3 + $0x58] sm:$0xff]  }
  0x94   : > { %v863_v40 = vsel %vm862_vm2, %v859_v39, %v861_v38  ;;  %v864_v49 = vsel %vm862_vm2, %v861_v38, %v859_v39  ;;  %v1211_v27 = vpack.c.bf16 %v1207_v24, %v1207_v24  ;;  %v7502_v33 = vrot.slane %v6451_v29, %v7350_v13  ;;  %v1990_v24 = vld [vmem:[%s10287_s9 + $0x10] sm:$0xff] }
  0x95   : > { %6383 = vmatprep.subr.msk.bf16.mxu0 %vm667_vm3, %v624_v36  ;;  %v669_v41 = vsel %vm667_vm3, %v623_v37, 0  ;;  %v879_v43 = vmul.f32 %v7377_v25, %v863_v40  ;;  %v780_v44 = vsel %vm667_vm3, %v591_v34, 0  ;;  %v878_v54 = vmul.f32 %v7415_v48, %v864_v49  ;;  %v6924_v37 = vld [vmem:[%s10281_s3 + $0x60] sm:$0xff]   ;;  %v6925_v40 = vld [vmem:[%s10281_s3 + $0x68] sm:$0xff]  }
  0x96   : > { %675 = vmatpush1.bf16.msra.mxu0 %v669_v41  ;;  %10416 = vst [vmem:[#allocation10_spill] sm:$0xff] %v7502_v33  ;;  %v6926_v41 = vld [vmem:[%s10281_s3 + $0x70] sm:$0xff]  }
  0x97   : > { %6392 = vmatprep.subr.msk.bf16.mxu0 %vm667_vm3, %v592_v35  ;;  %v881_v45 = vpack.c.bf16 %v879_v43, %v879_v43  ;;  %v1021_v52 = vpop.permute.xlu1 %1020  ;;  %v1019_v53 = vpop.permute.xlu0 %1018  ;;  %v880_v57 = vpack.c.bf16 %v878_v54, %v878_v54  ;;  %v1210_v35 = vpack.c.bf16 %v1206_v18, %v1206_v18  ;;  %v6928_v54 = vld [vmem:[%s10281_s3 + $0x80] sm:$0xff]  }
  0x98   : > { %v1023_v56 = vsel %vm1022_vm5, %v1019_v53, %v1021_v52  ;;  %v1024_v15 = vsel %vm1022_vm5, %v1021_v52, %v1019_v53 }
  0x99   : > { %6384 = vmatmul.mubr.msk.bf16.vlgmr.msra.gmra.mrb[0].mxu0 %vm654_vm4, %v6912_v42  ;;  %v1039_v58 = vmul.f32 %v7428_v55, %v1023_v56  ;;  %v924_v60 = vsel %vm667_vm3, %v880_v57, 0  ;;  %v1038_v17 = vmul.f32 %v7465_v9, %v1024_v15  ;;  %v1254_v38 = vsel %vm667_vm3, %v1210_v35, 0 }
  0x9a   : > { %786 = vmatpush1.bf16.msra.mxu0 %v780_v44  ;;  %716 = vmatprep.mubr.bf16.mxu0 %v10300_v10  ;;  %v7527_v42 = vrot.slane %v6451_v29, %v7347_v12  ;;  %v6469_v44 = vld [vmem:[%s10280_s2 + $0xc] sm:$0x3]  ;;  %v7627_v35 = vrot.slane %v6487_v62, %v7347_v12 }
  0x9b   : > { %6410 = vmatprep.subr.msk.bf16.mxu0 %vm667_vm3, %v881_v45  ;;  %v1041_v61 = vpack.c.bf16 %v1039_v58, %v1039_v58  ;;  %v1040_v23 = vpack.c.bf16 %v1038_v17, %v1038_v17  ;;  %v1351_v31 = vpop.permute.xlu1 %1350  ;;  %v1349_v32 = vpop.permute.xlu0 %1348  ;;  %v6927_v45 = vld [vmem:[%s10281_s3 + $0x78] sm:$0xff]   ;;  %v7540_v50 = vrot.slane %v6469_v44, %v7350_v13  ;;  %v6929_v58 = vld [vmem:[%s10281_s3 + $0x88] sm:$0xff]   ;;  %v1988_v17 = vld [vmem:[%s10287_s9] sm:$0xff] }
  0x9c   : > { %v1354_v34 = vsel %vm1352_vm6, %v1351_v31, %v1349_v32  ;;  %10417 = vst [vmem:[#allocation11_spill] sm:$0xff] %v7527_v42  ;;  %v1353_v43 = vsel %vm1352_vm6, %v1349_v32, %v1351_v31  ;;  %1998 = vperm.xlu0 %6830, %v1988_v17   ;;  %v1993_v29 = vld [vmem:[%s10287_s9 + $0x28] sm:$0xff]  ;;  %v1995_v32 = vld [vmem:[%s10287_s9 + $0x38] sm:$0xff]  ;;  %10421 = vst [vmem:[#allocation15_spill] sm:$0xff] %v7627_v35 }
  0x9d   : > { %v1084_v26 = vsel %vm667_vm3, %v1040_v23, 0  ;;  %v1369_v36 = vmul.f32 %v7502_v33, %v1354_v34  ;;  %v1368_v49 = vmul.f32 %v7527_v42, %v1353_v43  ;;  %10418 = vst [vmem:[#allocation12_spill] sm:$0xff] %v7540_v50  ;;  %v6933_v31 = vld [vmem:[%s10281_s3 + $0xa8] sm:$0xff]   ;;  %v6934_v34 = vld [vmem:[%s10281_s3 + $0xb0] sm:$0xff]   ;;  %v6947_v17 = vld [vmem:[%s10281_s3 + $0x118] sm:$0xff]  }
  0x9f   : > { %v1371_v39 = vpack.c.bf16 %v1369_v36, %v1369_v36  ;;  %v1370_v52 = vpack.c.bf16 %v1368_v49, %v1368_v49 }
  0xa1   : > { %6385 = vmatmul.mubr.msk.bf16.gmra.mrb[4].mxu0 %vm654_vm4, %v6913_v46  ;;  %v1511_v46 = vpop.permute.xlu1 %1510  ;;  %v1414_v56 = vsel %vm667_vm3, %v1370_v52, 0  ;;  %v6937_v52 = vld [vmem:[%s10281_s3 + $0xc8] sm:$0xff]  }
  0xa2   : > { %726 = vmatprep.mubr.bf16.mxu0 %v10300_v10 }
  0xa5   : > { %v1671_v3 = vpop.permute.xlu1 %1670 }
  0xa9   : > { %6386 = vmatmul.mubr.msk.bf16.gmra.mrb[8].mxu0 %vm654_vm4, %v6914_v47  ;;  %v1509_v47 = vpop.permute.xlu0 %1508 }
  0xaa   : > { %736 = vmatprep.mubr.bf16.mxu0 %v10300_v10 }
  0xb1   : > { %6387 = vmatmul.mubr.msk.bf16.gmra.mrb[12].mxu0 %vm654_vm4, %v6915_v51  ;;  %v1514_v51 = vsel %vm1512_vm7, %v1511_v46, %v1509_v47 }
  0xb2   : > { %817 = vmatprep.mubr.bf16.mxu0 %v10300_v10  ;;  %v1529_v53 = vmul.f32 %v7540_v50, %v1514_v51 }
  0xb4   : > { %v1531_v57 = vpack.c.bf16 %v1529_v53, %v1529_v53  ;;  %v6938_v53 = vld [vmem:[%s10281_s3 + $0xd0] sm:$0xff]  }
  0xb9   : > { %6393 = vmatmul.mubr.msk.bf16.vlgmr.msra.gmra.mrb[0].mxu0 %vm654_vm4, %v6916_v59  ;;  %v6930_v59 = vld [vmem:[%s10281_s3 + $0x90] sm:$0xff]  }
  0xba   : > { %930 = vmatpush1.bf16.msra.mxu0 %v924_v60  ;;  %827 = vmatprep.mubr.bf16.mxu0 %v10300_v10  ;;  %v7565_v60 = vrot.slane %v6469_v44, %v7347_v12 }
  0xbb   : > { %6428 = vmatprep.subr.msk.bf16.mxu0 %vm667_vm3, %v1041_v61  ;;  %v1513_v61 = vsel %vm1512_vm7, %v1509_v47, %v1511_v46  ;;  %v6936_v47 = vld [vmem:[%s10281_s3 + $0xc0] sm:$0xff]  }
  0xbc   : > { %10419 = vst [vmem:[#allocation13_spill] sm:$0xff] %v7565_v60  ;;  %v1528_v8 = vmul.f32 %v7565_v60, %v1513_v61  ;;  %v6940_v61 = vld [vmem:[%s10281_s3 + $0xe0] sm:$0xff]  }
  0xbe   : > { %v1530_v18 = vpack.c.bf16 %v1528_v8, %v1528_v8  ;;  %v6944_v8 = vld [vmem:[%s10281_s3 + $0x100] sm:$0xff]  }
  0xc1   : > { %6394 = vmatmul.mubr.msk.bf16.gmra.mrb[4].mxu0 %vm654_vm4, %v6917_v63  ;;  %v6931_v63 = vld [vmem:[%s10281_s3 + $0x98] sm:$0xff]  }
  0xc2   : > { %837 = vmatprep.mubr.bf16.mxu0 %v10300_v10 }
  0xc9   : > { %6395 = vmatmul.mubr.msk.bf16.gmra.mrb[8].mxu0 %vm654_vm4, %v6918_v5  ;;  %v1669_v5 = vpop.permute.xlu0 %1668 }
  0xca   : > { %847 = vmatprep.mubr.bf16.mxu0 %v10300_v10  ;;  %v1674_v15 = vsel %vm1672_vm8, %v1671_v3, %v1669_v5  ;;  %v1673_v36 = vsel %vm1672_vm8, %v1669_v5, %v1671_v3  ;;  %v6942_v3 = vld [vmem:[%s10281_s3 + $0xf0] sm:$0xff]   ;;  %v6943_v5 = vld [vmem:[%s10281_s3 + $0xf8] sm:$0xff]  }
  0xcb   : > { %v1689_v23 = vmul.f32 %v7578_v14, %v1674_v15  ;;  %v6945_v15 = vld [vmem:[%s10281_s3 + $0x108] sm:$0xff]  }
  0xd1   : > { %6396 = vmatmul.mubr.msk.bf16.gmra.mrb[12].mxu0 %vm654_vm4, %v6919_v16  ;;  %v1989_v16 = vld [vmem:[%s10287_s9 + $0x8] sm:$0xff] }
  0xd2   : > { %961 = vmatprep.mubr.bf16.mxu0 %v10300_v10  ;;  %2003 = vperm.xlu1 %6831, %v1989_v16   ;;  %v6946_v16 = vld [vmem:[%s10281_s3 + $0x110] sm:$0xff]  }
  0xd6   : > { %2008 = vperm.xlu1 %6831, %v1990_v24  }
  0xd9   : > { %6411 = vmatmul.mubr.msk.bf16.vlgmr.msra.gmra.mrb[0].mxu0 %vm654_vm4, %v6920_v7  ;;  %v1991_v7 = vld [vmem:[%s10287_s9 + $0x18] sm:$0xff] }
  0xda   : > { %1090 = vmatpush1.bf16.msra.mxu0 %v1084_v26  ;;  %971 = vmatprep.mubr.bf16.mxu0 %v10300_v10  ;;  %v6932_v26 = vld [vmem:[%s10281_s3 + $0xa0] sm:$0xff]  }
  0xdb   : > { %6446 = vmatprep.subr.msk.bf16.mxu0 %vm667_vm3, %v1211_v27  ;;  %v1574_v27 = vsel %vm667_vm3, %v1530_v18, 0  ;;  %2013 = vperm.xlu0 %6830, %v1991_v7  }
  0xdf   : > { %2023 = vperm.xlu0 %6830, %v1993_v29  }
  0xe1   : > { %6412 = vmatmul.mubr.msk.bf16.gmra.mrb[4].mxu0 %vm654_vm4, %v6921_v6  ;;  %v1691_v6 = vpack.c.bf16 %v1689_v23, %v1689_v23 }
  0xe2   : > { %981 = vmatprep.mubr.bf16.mxu0 %v10300_v10 }
  0xe3   : > { %2033 = vperm.xlu0 %6830, %v1995_v32  }
  0xe9   : > { %6413 = vmatmul.mubr.msk.bf16.gmra.mrb[8].mxu0 %vm654_vm4, %v6922_v28  ;;  %v1992_v28 = vld [vmem:[%s10287_s9 + $0x20] sm:$0xff] }
  0xea   : > { %991 = vmatprep.mubr.bf16.mxu0 %v10300_v10  ;;  %2018 = vperm.xlu1 %6831, %v1992_v28  }
  0xf1   : > { %6414 = vmatmul.mubr.msk.bf16.gmra.mrb[12].mxu0 %vm654_vm4, %v6923_v30  ;;  %v1994_v30 = vld [vmem:[%s10287_s9 + $0x30] sm:$0xff] }
  0xf2   : > { %1121 = vmatprep.mubr.bf16.mxu0 %v10300_v10  ;;  %2028 = vperm.xlu1 %6831, %v1994_v30  }
  0xf9   : > { %6429 = vmatmul.mubr.msk.bf16.vlgmr.msra.gmra.mrb[0].mxu0 %vm654_vm4, %v6924_v37  ;;  %v6505_v37 = vld [vmem:[%s10280_s2 + $0x10] sm:$0x3] }
  0xfa   : > { %1260 = vmatpush1.bf16.msra.mxu0 %v1254_v38  ;;  %1131 = vmatprep.mubr.bf16.mxu0 %v10300_v10  ;;  %v6935_v38 = vld [vmem:[%s10281_s3 + $0xb8] sm:$0xff]   ;;  %v7640_v43 = vrot.slane %v6505_v37, %v7350_v13 }
  0xfb   : > { %6464 = vmatprep.subr.msk.bf16.mxu0 %vm667_vm3, %v1371_v39  ;;  %v1831_v39 = vpop.permute.xlu1 %1830 }
  0xfc   : > { %10422 = vst [vmem:[#allocation16_spill] sm:$0xff] %v7640_v43 }
 0x101   : > { %6430 = vmatmul.mubr.msk.bf16.gmra.mrb[4].mxu0 %vm654_vm4, %v6925_v40  ;;  %v1829_v40 = vpop.permute.xlu0 %1828 }
 0x102   : > { %1141 = vmatprep.mubr.bf16.mxu0 %v10300_v10  ;;  %v1834_v44 = vsel %vm1832_vm9, %v1831_v39, %v1829_v40 }
 0x103   : > { %v1849_v46 = vmul.f32 %v7640_v43, %v1834_v44 }
 0x105   : > { %v1851_v51 = vpack.c.bf16 %v1849_v46, %v1849_v46 }
 0x109   : > { %6431 = vmatmul.mubr.msk.bf16.gmra.mrb[8].mxu0 %vm654_vm4, %v6926_v41  ;;  %v1688_v41 = vmul.f32 %v7627_v35, %v1673_v36 }
 0x10a   : > { %1151 = vmatprep.mubr.bf16.mxu0 %v10300_v10 }
 0x111   : > { %6432 = vmatmul.mubr.msk.bf16.gmra.mrb[12].mxu0 %vm654_vm4, %v6927_v45  ;;  %v1690_v45 = vpack.c.bf16 %v1688_v41, %v1688_v41 }
 0x112   : > { %1291 = vmatprep.mubr.bf16.mxu0 %v10300_v10 }
 0x113   : > { %v1734_v49 = vsel %vm667_vm3, %v1690_v45, 0 }
 0x119   : > { %6447 = vmatmul.mubr.msk.bf16.vlgmr.msra.gmra.mrb[0].mxu0 %vm654_vm4, %v6928_v54  ;;  %v7665_v54 = vrot.slane %v6505_v37, %v7347_v12 }
 0x11a   : > { %1420 = vmatpush1.bf16.msra.mxu0 %v1414_v56  ;;  %1301 = vmatprep.mubr.bf16.mxu0 %v10300_v10  ;;  %v1833_v56 = vsel %vm1832_vm9, %v1829_v40, %v1831_v39 }
 0x11b   : > { %6482 = vmatprep.subr.msk.bf16.mxu0 %vm667_vm3, %v1531_v57  ;;  %10423 = vst [vmem:[#allocation17_spill] sm:$0xff] %v7665_v54  ;;  %v6939_v57 = vld [vmem:[%s10281_s3 + $0xd8] sm:$0xff]   ;;  %v1999_v18 = vpop.permute.xlu0 %1998 }
 0x121   : > { %6448 = vmatmul.mubr.msk.bf16.gmra.mrb[4].mxu0 %vm654_vm4, %v6929_v58  ;;  %v1848_v58 = vmul.f32 %v7665_v54, %v1833_v56 }
 0x122   : > { %1311 = vmatprep.mubr.bf16.mxu0 %v10300_v10 }
 0x129   : > { %6449 = vmatmul.mubr.msk.bf16.gmra.mrb[8].mxu0 %vm654_vm4, %v6930_v59  ;;  %v1850_v59 = vpack.c.bf16 %v1848_v58, %v1848_v58 }
 0x12a   : > { %1321 = vmatprep.mubr.bf16.mxu0 %v10300_v10 }
 0x12b   : > { %v1894_v62 = vsel %vm667_vm3, %v1850_v59, 0 }
 0x131   : > { %6450 = vmatmul.mubr.msk.bf16.gmra.mrb[12].mxu0 %vm654_vm4, %v6931_v63  ;;  %v6941_v63 = vld [vmem:[%s10281_s3 + $0xe8] sm:$0xff]  }
 0x132   : > { %1451 = vmatprep.mubr.bf16.mxu0 %v10300_v10 }
 0x139   : > { %6465 = vmatmul.mubr.msk.bf16.vlgmr.msra.gmra.mrb[0].mxu0 %vm654_vm4, %v6932_v26 }
 0x13a   : > { %1580 = vmatpush1.bf16.msra.mxu0 %v1574_v27  ;;  %1461 = vmatprep.mubr.bf16.mxu0 %v10300_v10 }
 0x13b   : > { %6500 = vmatprep.subr.msk.bf16.mxu0 %vm667_vm3, %v1691_v6 }
 0x141   : > { %6466 = vmatmul.mubr.msk.bf16.gmra.mrb[4].mxu0 %vm654_vm4, %v6933_v31 }
 0x142   : > { %1471 = vmatprep.mubr.bf16.mxu0 %v10300_v10 }
 0x149   : > { %6467 = vmatmul.mubr.msk.bf16.gmra.mrb[8].mxu0 %vm654_vm4, %v6934_v34 }
 0x14a   : > { %1481 = vmatprep.mubr.bf16.mxu0 %v10300_v10 }
 0x151   : > { %6468 = vmatmul.mubr.msk.bf16.gmra.mrb[12].mxu0 %vm654_vm4, %v6935_v38  ;;  %v2004_v26 = vpop.permute.xlu1 %2003 }
 0x152   : > { %1611 = vmatprep.mubr.bf16.mxu0 %v10300_v10 }
 0x159   : > { %6483 = vmatmul.mubr.msk.bf16.vlgmr.msra.gmra.mrb[0].mxu0 %vm654_vm4, %v6936_v47 }
 0x15a   : > { %1740 = vmatpush1.bf16.msra.mxu0 %v1734_v49  ;;  %1621 = vmatprep.mubr.bf16.mxu0 %v10300_v10 }
 0x15b   : > { %6518 = vmatprep.subr.msk.bf16.mxu0 %vm667_vm3, %v1851_v51 }
 0x161   : > { %6484 = vmatmul.mubr.msk.bf16.gmra.mrb[4].mxu0 %vm654_vm4, %v6937_v52 }
 0x162   : > { %1631 = vmatprep.mubr.bf16.mxu0 %v10300_v10 }
 0x169   : > { %6485 = vmatmul.mubr.msk.bf16.gmra.mrb[8].mxu0 %vm654_vm4, %v6938_v53  ;;  %v2009_v53 = vpop.permute.xlu1 %2008 }
 0x16a   : > { %1641 = vmatprep.mubr.bf16.mxu0 %v10300_v10 }
 0x171   : > { %6486 = vmatmul.mubr.msk.bf16.gmra.mrb[12].mxu0 %vm654_vm4, %v6939_v57  ;;  %v2014_v57 = vpop.permute.xlu0 %2013 }
 0x172   : > { %1771 = vmatprep.mubr.bf16.mxu0 %v10300_v10 }
 0x179   : > { %6501 = vmatmul.mubr.msk.bf16.vlgmr.msra.gmra.mrb[0].mxu0 %vm654_vm4, %v6940_v61 }
 0x17a   : > { %1900 = vmatpush1.bf16.msra.mxu0 %v1894_v62  ;;  %1781 = vmatprep.mubr.bf16.mxu0 %v10300_v10 }
 0x181   : > { %6502 = vmatmul.mubr.msk.bf16.gmra.mrb[4].mxu0 %vm654_vm4, %v6941_v63 }
 0x182   : > { %1791 = vmatprep.mubr.bf16.mxu0 %v10300_v10 }
 0x189   : > { %6503 = vmatmul.mubr.msk.bf16.gmra.mrb[8].mxu0 %vm654_vm4, %v6942_v3 }
 0x18a   : > { %1801 = vmatprep.mubr.bf16.mxu0 %v10300_v10 }
 0x191   : > { %6504 = vmatmul.mubr.msk.bf16.gmra.mrb[12].mxu0 %vm654_vm4, %v6943_v5 }
 0x192   : > { %1931 = vmatprep.mubr.bf16.mxu0 %v10300_v10 }
 0x199   : > { %6519 = vmatmul.mubr.msk.bf16.vlgmr.msra.gmra.mrb[0].mxu0 %vm654_vm4, %v6944_v8  ;;  %v2019_v8 = vpop.permute.xlu1 %2018 }
 0x19a   : > { %1941 = vmatprep.mubr.bf16.mxu0 %v10300_v10 }
 0x1a1   : > { %6520 = vmatmul.mubr.msk.bf16.gmra.mrb[4].mxu0 %vm654_vm4, %v6945_v15 }
 0x1a2   : > { %1951 = vmatprep.mubr.bf16.mxu0 %v10300_v10 }
 0x1a9   : > { %6521 = vmatmul.mubr.msk.bf16.gmra.mrb[8].mxu0 %vm654_vm4, %v6946_v16  ;;  %v2024_v16 = vpop.permute.xlu0 %2023 }
 0x1aa   : > { %1961 = vmatprep.mubr.bf16.mxu0 %v10300_v10 }
 0x1b1   : > { %6522 = vmatmul.mubr.msk.bf16.gmra.mrb[12].mxu0 %vm654_vm4, %v6947_v17 }
 0x1b2   : > { %4676 = vmatprep.mubr.bf16.mxu0 %v10300_v10 }
 0x26c   : > { %v1933_v23 = vpop.f32.mrb[0].mxu0 }
 0x26d   : > { %v2036_v24 = vadd.f32 %v1999_v18, %v1933_v23  ;;  %v1935_v7 = vpop.f32.mrb[1].mxu0 }
 0x26e   : > { %v1937_v27 = vpop.f32.mrb[2].mxu0  ;;  %v2037_v40 = vadd.f32 %v1999_v18, %v1935_v7 }
 0x26f   : > { %v7716_v6 = vmax.f32 %v2036_v24, 0.0  ;;  %v2038_v28 = vadd.f32 %v2004_v26, %v1937_v27  ;;  %v1939_v29 = vpop.f32.mrb[3].mxu0 }
 0x270   : > { %v2039_v44 = vadd.f32 %v2004_v26, %v1939_v29  ;;  %v7740_v45 = vmax.f32 %v2037_v40, 0.0 }
 0x271   : > { %10424 = vst [vmem:[#allocation18_spill] sm:$0xff] %v7716_v6  ;;  %v7718_v30 = vmax.f32 %v2038_v28, 0.0  ;;  %2142 = vrot.lane.b32.xlu1 %v7716_v6, %s7200_s29  ;;  %v2029_v28 = vpop.permute.xlu1 %2028 }
 0x272   : > { %10426 = vst [vmem:[#allocation20_spill] sm:$0xff] %v7740_v45  ;;  %v7746_v47 = vmax.f32 %v2039_v44, 0.0 }
 0x273   : > { %10425 = vst [vmem:[#allocation19_spill] sm:$0xff] %v7718_v30  ;;  %2144 = vrot.lane.b32.xlu0 %v7718_v30, %s7200_s29 }
 0x274   : > { %v1943_v31 = vpop.f32.mrb[4].mxu0  ;;  %10427 = vst [vmem:[#allocation21_spill] sm:$0xff] %v7746_v47 }
 0x275   : > { %v1945_v32 = vpop.f32.mrb[5].mxu0  ;;  %2068 = vrot.lane.b32.xlu1 %v7716_v6, %s7201_s30  ;;  %v2040_v56 = vadd.f32 %v2009_v53, %v1943_v31  ;;  %v2034_v31 = vpop.permute.xlu0 %2033 }
 0x276   : > { %v1947_v34 = vpop.f32.mrb[6].mxu0  ;;  %v2041_v62 = vadd.f32 %v2009_v53, %v1945_v32 }
 0x277   : > { %2070 = vrot.lane.b32.xlu0 %v7718_v30, %s7201_s30  ;;  %v1949_v36 = vpop.f32.mrb[7].mxu0  ;;  %v2042_v58 = vadd.f32 %v2014_v57, %v1947_v34  ;;  %v7772_v59 = vmax.f32 %v2040_v56, 0.0 }
 0x278   : > { %v2043_v63 = vadd.f32 %v2014_v57, %v1949_v36  ;;  %v7796_v3 = vmax.f32 %v2041_v62, 0.0 }
 0x279   : > { %2320 = vrot.lane.b32.xlu1 %v7716_v6, %s7203_s0  ;;  %10428 = vst [vmem:[#allocation22_spill] sm:$0xff] %v7772_v59  ;;  %v7776_v61 = vmax.f32 %v2042_v58, 0.0 }
 0x27a   : > { %10430 = vst [vmem:[#allocation24_spill] sm:$0xff] %v7796_v3  ;;  %v7800_v5 = vmax.f32 %v2043_v63, 0.0 }
 0x27b   : > { %2322 = vrot.lane.b32.xlu0 %v7718_v30, %s7203_s0  ;;  %10429 = vst [vmem:[#allocation23_spill] sm:$0xff] %v7776_v61 }
 0x27c   : > { %v1953_v37 = vpop.f32.mrb[8].mxu0  ;;  %10431 = vst [vmem:[#allocation25_spill] sm:$0xff] %v7800_v5 }
 0x27d   : > { %v7732_v38 = vpop.f32.mrb[9].mxu0  ;;  %2450 = vrot.lane.b32.xlu1 %v7716_v6, %s7204_s17  ;;  %v2044_v15 = vadd.f32 %v2019_v8, %v1953_v37 }
 0x27e   : > { %v1957_v39 = vpop.f32.mrb[10].mxu0  ;;  %v2045_v24 = vadd.f32 %v2019_v8, %v7732_v38 }
 0x27f   : > { %2452 = vrot.lane.b32.xlu0 %v7718_v30, %s7204_s17  ;;  %v1959_v41 = vpop.f32.mrb[11].mxu0  ;;  %v2046_v17 = vadd.f32 %v2024_v16, %v1957_v39  ;;  %v7816_v18 = vmax.f32 %v2044_v15, 0.0 }
 0x280   : > { %v2047_v7 = vadd.f32 %v2024_v16, %v1959_v41  ;;  %v7837_v26 = vmax.f32 %v2045_v24, 0.0 }
 0x281   : > { %2664 = vrot.lane.b32.xlu1 %v7716_v6, %s10354_s18  ;;  %10432 = vst [vmem:[#allocation26_spill] sm:$0xff] %v7816_v18  ;;  %v7820_v23 = vmax.f32 %v2046_v17, 0.0 }
 0x282   : > { %v7841_v27 = vmax.f32 %v2047_v7, 0.0 }
 0x283   : > { %2666 = vrot.lane.b32.xlu0 %v7718_v30, %s10354_s18 }
 0x284   : > { %v7744_v46 = vpop.f32.mrb[12].mxu0 }
 0x285   : > { %v7748_v49 = vpop.f32.mrb[13].mxu0  ;;  %2158 = vrot.lane.b32.xlu1 %v7740_v45, %s7200_s29  ;;  %v2048_v29 = vadd.f32 %v2029_v28, %v7744_v46 }
 0x286   : > { %v7752_v51 = vpop.f32.mrb[14].mxu0  ;;  %v2049_v39 = vadd.f32 %v2029_v28, %v7748_v49 }
 0x287   : > { %2160 = vrot.lane.b32.xlu0 %v7746_v47, %s7200_s29  ;;  %v7756_v52 = vpop.f32.mrb[15].mxu0  ;;  %v2050_v32 = vadd.f32 %v2034_v31, %v7752_v51  ;;  %v7859_v34 = vmax.f32 %v2048_v29, 0.0 }
 0x288   : > { %v2051_v41 = vadd.f32 %v2034_v31, %v7756_v52  ;;  %v7885_v46 = vmax.f32 %v2049_v39, 0.0 }
 0x289   : > { %2084 = vrot.lane.b32.xlu1 %v7740_v45, %s7201_s30  ;;  %v7863_v36 = vmax.f32 %v2050_v32, 0.0 }
 0x28a   : > { %v7891_v49 = vmax.f32 %v2051_v41, 0.0 }
 0x28b   : > { %2086 = vrot.lane.b32.xlu0 %v7746_v47, %s7201_s30 }
 0x28d   : > { %2336 = vrot.lane.b32.xlu1 %v7740_v45, %s7203_s0 }
 0x28f   : > { %2338 = vrot.lane.b32.xlu0 %v7746_v47, %s7203_s0 }
 0x291   : > { %2466 = vrot.lane.b32.xlu1 %v7740_v45, %s7204_s17 }
 0x293   : > { %2468 = vrot.lane.b32.xlu0 %v7746_v47, %s7204_s17 }
 0x295   : > { %2680 = vrot.lane.b32.xlu1 %v7740_v45, %s10354_s18 }
 0x297   : > { %2682 = vrot.lane.b32.xlu0 %v7746_v47, %s10354_s18 }
 0x299   : > { %2146 = vrot.lane.b32.xlu1 %v7772_v59, %s7200_s29 }
 0x29b   : > { %2148 = vrot.lane.b32.xlu0 %v7776_v61, %s7200_s29 }
 0x29d   : > { %2072 = vrot.lane.b32.xlu1 %v7772_v59, %s7201_s30 }
 0x29f   : > { %2074 = vrot.lane.b32.xlu0 %v7776_v61, %s7201_s30 }
 0x2a1   : > { %2324 = vrot.lane.b32.xlu1 %v7772_v59, %s7203_s0 }
 0x2a3   : > { %2326 = vrot.lane.b32.xlu0 %v7776_v61, %s7203_s0 }
 0x2a5   : > { %2454 = vrot.lane.b32.xlu1 %v7772_v59, %s7204_s17 }
 0x2a7   : > { %2456 = vrot.lane.b32.xlu0 %v7776_v61, %s7204_s17 }
 0x2a9   : > { %2668 = vrot.lane.b32.xlu1 %v7772_v59, %s10354_s18 }
 0x2ab   : > { %2670 = vrot.lane.b32.xlu0 %v7776_v61, %s10354_s18 }
 0x2ad   : > { %2162 = vrot.lane.b32.xlu1 %v7796_v3, %s7200_s29 }
 0x2af   : > { %2164 = vrot.lane.b32.xlu0 %v7800_v5, %s7200_s29 }
 0x2b1   : > { %2088 = vrot.lane.b32.xlu1 %v7796_v3, %s7201_s30 }
 0x2b3   : > { %2090 = vrot.lane.b32.xlu0 %v7800_v5, %s7201_s30 }
 0x2b5   : > { %2340 = vrot.lane.b32.xlu1 %v7796_v3, %s7203_s0 }
 0x2b7   : > { %2342 = vrot.lane.b32.xlu0 %v7800_v5, %s7203_s0 }
 0x2b9   : > { %2470 = vrot.lane.b32.xlu1 %v7796_v3, %s7204_s17 }
 0x2bb   : > { %2472 = vrot.lane.b32.xlu0 %v7800_v5, %s7204_s17 }
 0x2bd   : > { %2150 = vrot.lane.b32.xlu1 %v7816_v18, %s7200_s29 }
 0x2bf   : > { %2152 = vrot.lane.b32.xlu0 %v7820_v23, %s7200_s29 }
 0x2c1   : > { %2076 = vrot.lane.b32.xlu1 %v7816_v18, %s7201_s30 }
 0x2c3   : > { %2078 = vrot.lane.b32.xlu0 %v7820_v23, %s7201_s30 }
 0x2c5   : > { %2328 = vrot.lane.b32.xlu1 %v7816_v18, %s7203_s0 }
 0x2c7   : > { %2330 = vrot.lane.b32.xlu0 %v7820_v23, %s7203_s0 }
 0x2c9   : > { %2458 = vrot.lane.b32.xlu1 %v7816_v18, %s7204_s17 }
 0x2cb   : > { %2460 = vrot.lane.b32.xlu0 %v7820_v23, %s7204_s17 }
 0x2cd   : > { %2166 = vrot.lane.b32.xlu1 %v7837_v26, %s7200_s29 }
 0x2cf   : > { %2168 = vrot.lane.b32.xlu0 %v7841_v27, %s7200_s29 }
 0x2d1   : > { %2092 = vrot.lane.b32.xlu1 %v7837_v26, %s7201_s30 }
 0x2d3   : > { %2094 = vrot.lane.b32.xlu0 %v7841_v27, %s7201_s30 }
 0x2d5   : > { %2344 = vrot.lane.b32.xlu1 %v7837_v26, %s7203_s0 }
 0x2d7   : > { %2346 = vrot.lane.b32.xlu0 %v7841_v27, %s7203_s0 }
 0x2d9   : > { %2474 = vrot.lane.b32.xlu1 %v7837_v26, %s7204_s17 }
 0x2db   : > { %2476 = vrot.lane.b32.xlu0 %v7841_v27, %s7204_s17 }
 0x2dd   : > { %2154 = vrot.lane.b32.xlu1 %v7859_v34, %s7200_s29 }
 0x2df   : > { %2156 = vrot.lane.b32.xlu0 %v7863_v36, %s7200_s29 }
 0x2e1   : > { %2080 = vrot.lane.b32.xlu1 %v7859_v34, %s7201_s30 }
 0x2e3   : > { %v2143_v37 = vpop.permute.xlu1 %2142  ;;  %2082 = vrot.lane.b32.xlu0 %v7863_v36, %s7201_s30 }
 0x2e5   : > { %2332 = vrot.lane.b32.xlu1 %v7859_v34, %s7203_s0  ;;  %v2145_v38 = vpop.permute.xlu0 %2144 }
 0x2e7   : > { %v7876_v40 = vpop.permute.xlu1 %2068  ;;  %2334 = vrot.lane.b32.xlu0 %v7863_v36, %s7203_s0 }
 0x2e9   : > { %2462 = vrot.lane.b32.xlu1 %v7859_v34, %s7204_s17  ;;  %v7883_v44 = vpop.permute.xlu0 %2070 }
 0x2eb   : > { %v7887_v51 = vpop.permute.xlu1 %2320  ;;  %2464 = vrot.lane.b32.xlu0 %v7863_v36, %s7204_s17 }
 0x2ed   : > { %2170 = vrot.lane.b32.xlu1 %v7885_v46, %s7200_s29  ;;  %v7895_v53 = vpop.permute.xlu0 %2322 }
 0x2ef   : > { %v7897_v52 = vpop.permute.xlu1 %2450  ;;  %2172 = vrot.lane.b32.xlu0 %v7891_v49, %s7200_s29 }
 0x2f1   : > { %2684 = vrot.lane.b32.xlu1 %v7796_v3, %s10354_s18  ;;  %v7903_v56 = vpop.permute.xlu0 %2452 }
 0x2f3   : > { %v7905_v57 = vpop.permute.xlu1 %2664  ;;  %2686 = vrot.lane.b32.xlu0 %v7800_v5, %s10354_s18 }
 0x2f4   : > { %10433 = vst [vmem:[#allocation27_spill] sm:$0xff] %v7905_v57 }
 0x2f5   : > { %2096 = vrot.lane.b32.xlu1 %v7885_v46, %s7201_s30  ;;  %v7911_v58 = vpop.permute.xlu0 %2666 }
 0x2f6   : > { %10434 = vst [vmem:[#allocation28_spill] sm:$0xff] %v7911_v58 }
 0x2f7   : > { %v2159_v62 = vpop.permute.xlu1 %2158  ;;  %2674 = vrot.lane.b32.xlu0 %v7820_v23, %s10354_s18 }
 0x2f8   : > { %v2182_v63 = vsel %vm605_vm1, %v2159_v62, %v2143_v37  ;;  %v2174_v8 = vsel %vm605_vm1, %v2143_v37, %v2159_v62 }
 0x2f9   : > { %2348 = vrot.lane.b32.xlu1 %v7885_v46, %s7203_s0  ;;  %v2161_v15 = vpop.permute.xlu0 %2160  ;;  %v2191_v7 = vmul.f32 %v2174_v8, %v7370_v21  ;;  %v2190_v29 = vmul.f32 %v2182_v63, %v7373_v22 }
 0x2fa   : > { %v2183_v16 = vsel %vm605_vm1, %v2161_v15, %v2145_v38  ;;  %v2175_v17 = vsel %vm605_vm1, %v2145_v38, %v2161_v15 }
 0x2fb   : > { %v7925_v24 = vpop.permute.xlu1 %2084  ;;  %2690 = vrot.lane.b32.xlu0 %v7841_v27, %s10354_s18  ;;  %v2193_v28 = vmul.f32 %v2175_v17, %v7370_v21  ;;  %v2192_v31 = vmul.f32 %v2183_v16, %v7373_v22 }
 0x2fd   : > { %2478 = vrot.lane.b32.xlu1 %v7885_v46, %s7204_s17  ;;  %v7935_v32 = vpop.permute.xlu0 %2086  ;;  %v2207_v37 = vpack.c.bf16 %v2193_v28, %v2191_v7  ;;  %v2206_v38 = vpack.c.bf16 %v2192_v31, %v2190_v29 }
 0x2ff   : > { %v7937_v39 = vpop.permute.xlu1 %2336  ;;  %2098 = vrot.lane.b32.xlu0 %v7891_v49, %s7201_s30  ;;  %2226 = vmatprep.subr.bf16.mxu1 %v2207_v37 }
 0x300   : > { %2227 = vmatpush1.bf16.msra.mxu1 %v2206_v38 }
 0x301   : > { %2672 = vrot.lane.b32.xlu1 %v7816_v18, %s10354_s18  ;;  %v7943_v41 = vpop.permute.xlu0 %2338 }
 0x303   : > { %v7945_v62 = vpop.permute.xlu1 %2466  ;;  %2678 = vrot.lane.b32.xlu0 %v7863_v36, %s10354_s18 }
 0x305   : > { %2688 = vrot.lane.b32.xlu1 %v7837_v26, %s10354_s18  ;;  %v7951_v63 = vpop.permute.xlu0 %2468 }
 0x307   : > { %v7953_v8 = vpop.permute.xlu1 %2680  ;;  %2796 = vrot.lane.b32.xlu0 %v7718_v30, %s10352_s19 }
 0x308   : > { %10435 = vst [vmem:[#allocation29_spill] sm:$0xff] %v7953_v8 }
 0x309   : > { %2676 = vrot.lane.b32.xlu1 %v7859_v34, %s10354_s18  ;;  %v7959_v15 = vpop.permute.xlu0 %2682 }
 0x30a   : > { %10436 = vst [vmem:[#allocation30_spill] sm:$0xff] %v7959_v15 }
 0x30b   : > { %v2147_v16 = vpop.permute.xlu1 %2146  ;;  %2812 = vrot.lane.b32.xlu0 %v7746_v47, %s10352_s19 }
 0x30d   : > { %2692 = vrot.lane.b32.xlu1 %v7885_v46, %s10354_s18  ;;  %v2149_v17 = vpop.permute.xlu0 %2148 }
 0x30f   : > { %v7965_v7 = vpop.permute.xlu1 %2072  ;;  %2350 = vrot.lane.b32.xlu0 %v7891_v49, %s7203_s0 }
 0x311   : > { %2794 = vrot.lane.b32.xlu1 %v7716_v6, %s10352_s19  ;;  %v7971_v28 = vpop.permute.xlu0 %2074 }
 0x313   : > { %v7973_v29 = vpop.permute.xlu1 %2324  ;;  %2800 = vrot.lane.b32.xlu0 %v7776_v61, %s10352_s19 }
 0x315   : > { %2810 = vrot.lane.b32.xlu1 %v7740_v45, %s10352_s19  ;;  %v7979_v31 = vpop.permute.xlu0 %2326 }
 0x317   : > { %v7981_v37 = vpop.permute.xlu1 %2454  ;;  %2816 = vrot.lane.b32.xlu0 %v7800_v5, %s10352_s19 }
 0x318   : > { %10437 = vst [vmem:[#allocation31_spill] sm:$0xff] %v7981_v37 }
 0x319   : > { %2798 = vrot.lane.b32.xlu1 %v7772_v59, %s10352_s19  ;;  %v7987_v38 = vpop.permute.xlu0 %2456 }
 0x31b   : > { %v7989_v1 = vpop.permute.xlu1 %2668  ;;  %2804 = vrot.lane.b32.xlu0 %v7820_v23, %s10352_s19 }
 0x31c   : > { %10438 = vst [vmem:[#allocation32_spill] sm:$0xff] %v7989_v1 }
 0x31d   : > { %2814 = vrot.lane.b32.xlu1 %v7796_v3, %s10352_s19  ;;  %v7995_v10 = vpop.permute.xlu0 %2670 }
 0x31e   : > { %10439 = vst [vmem:[#allocation33_spill] sm:$0xff] %v7995_v10 }
 0x31f   : > { %v2163_v13 = vpop.permute.xlu1 %2162  ;;  %2480 = vrot.lane.b32.xlu0 %v7891_v49, %s7204_s17 }
 0x320   : > { %v2176_v4 = vsel %vm605_vm1, %v2147_v16, %v2163_v13  ;;  %v2184_v12 = vsel %vm605_vm1, %v2163_v13, %v2147_v16 }
 0x321   : > { %2802 = vrot.lane.b32.xlu1 %v7816_v18, %s10352_s19  ;;  %v2165_v54 = vpop.permute.xlu0 %2164  ;;  %v2194_v14 = vmul.f32 %v2184_v12, %v7373_v22  ;;  %v2195_v60 = vmul.f32 %v2176_v4, %v7370_v21 }
 0x322   : > { %v2177_v43 = vsel %vm605_vm1, %v2149_v17, %v2165_v54  ;;  %v2185_v35 = vsel %vm605_vm1, %v2165_v54, %v2149_v17 }
 0x323   : > { %v2196_v50 = vmul.f32 %v2185_v35, %v7373_v22  ;;  %v2197_v1 = vmul.f32 %v2177_v43, %v7370_v21  ;;  %v8013_v42 = vpop.permute.xlu1 %2088  ;;  %2820 = vrot.lane.b32.xlu0 %v7841_v27, %s10352_s19 }
 0x325   : > { %2818 = vrot.lane.b32.xlu1 %v7837_v26, %s10352_s19  ;;  %v8019_v13 = vpop.permute.xlu0 %2090  ;;  %v2209_v16 = vpack.c.bf16 %v2197_v1, %v2195_v60  ;;  %v2208_v54 = vpack.c.bf16 %v2196_v50, %v2194_v14 }
 0x327   : > { %v8021_v17 = vpop.permute.xlu1 %2340  ;;  %2808 = vrot.lane.b32.xlu0 %v7863_v36, %s10352_s19  ;;  %2228 = vmatprep.subr.bf16.mxu1 %v2209_v16 }
 0x328   : > { %2229 = vmatpush1.bf16.msra.mxu1 %v2208_v54 }
 0x329   : > { %2806 = vrot.lane.b32.xlu1 %v7859_v34, %s10352_s19  ;;  %v8027_v4 = vpop.permute.xlu0 %2342 }
 0x32b   : > { %v8029_v12 = vpop.permute.xlu1 %2470  ;;  %2926 = vrot.lane.b32.xlu0 %v7718_v30, %s10441_s27 }
 0x32c   : > { %10440 = vst [vmem:[#allocation34_spill] sm:$0xff] %v8029_v12 }
 0x32d   : > { %2822 = vrot.lane.b32.xlu1 %v7885_v46, %s10352_s19  ;;  %v8035_v1 = vpop.permute.xlu0 %2472 }
 0x32f   : > { %v2151_v50 = vpop.permute.xlu1 %2150  ;;  %2942 = vrot.lane.b32.xlu0 %v7746_v47, %s10441_s27 }
 0x331   : > { %2924 = vrot.lane.b32.xlu1 %v7716_v6, %s10441_s27  ;;  %v2153_v60 = vpop.permute.xlu0 %2152 }
 0x333   : > { %v8041_v14 = vpop.permute.xlu1 %2076  ;;  %2930 = vrot.lane.b32.xlu0 %v7776_v61, %s10441_s27 }
 0x335   : > { %2940 = vrot.lane.b32.xlu1 %v7740_v45, %s10441_s27  ;;  %v8047_v35 = vpop.permute.xlu0 %2078 }
 0x337   : > { %v8049_v43 = vpop.permute.xlu1 %2328  ;;  %2946 = vrot.lane.b32.xlu0 %v7800_v5, %s10441_s27 }
 0x339   : > { %2928 = vrot.lane.b32.xlu1 %v7772_v59, %s10441_s27  ;;  %v8055_v16 = vpop.permute.xlu0 %2330 }
 0x33b   : > { %v8057_v54 = vpop.permute.xlu1 %2458  ;;  %2934 = vrot.lane.b32.xlu0 %v7820_v23, %s10441_s27 }
 0x33c   : > { %10442 = vst [vmem:[#allocation35_spill] sm:$0xff] %v8057_v54 }
 0x33d   : > { %2944 = vrot.lane.b32.xlu1 %v7796_v3, %s10441_s27  ;;  %v8063_v10 = vpop.permute.xlu0 %2460 }
 0x33e   : > { %10443 = vst [vmem:[#allocation36_spill] sm:$0xff] %v8063_v10 }
 0x33f   : > { %v2167_v33 = vpop.permute.xlu1 %2166  ;;  %2694 = vrot.lane.b32.xlu0 %v7891_v49, %s10354_s18 }
 0x340   : > { %v2178_v8 = vsel %vm605_vm1, %v2151_v50, %v2167_v33  ;;  %v2186_v57 = vsel %vm605_vm1, %v2167_v33, %v2151_v50 }
 0x341   : > { %2932 = vrot.lane.b32.xlu1 %v7816_v18, %s10441_s27  ;;  %v2169_v15 = vpop.permute.xlu0 %2168  ;;  %v2198_v2 = vmul.f32 %v2186_v57, %v7373_v22  ;;  %v2199_v54 = vmul.f32 %v2178_v8, %v7370_v21 }
 0x342   : > { %v2179_v58 = vsel %vm605_vm1, %v2153_v60, %v2169_v15  ;;  %v2187_v0 = vsel %vm605_vm1, %v2169_v15, %v2153_v60 }
 0x343   : > { %v2200_v10 = vmul.f32 %v2187_v0, %v7373_v22  ;;  %v2201_v37 = vmul.f32 %v2179_v58, %v7370_v21  ;;  %v8081_v12 = vpop.permute.xlu1 %2092  ;;  %2950 = vrot.lane.b32.xlu0 %v7841_v27, %s10441_s27 }
 0x345   : > { %2948 = vrot.lane.b32.xlu1 %v7837_v26, %s10441_s27  ;;  %v8087_v33 = vpop.permute.xlu0 %2094  ;;  %v2211_v50 = vpack.c.bf16 %v2201_v37, %v2199_v54  ;;  %v2210_v15 = vpack.c.bf16 %v2200_v10, %v2198_v2 }
 0x347   : > { %v8089_v60 = vpop.permute.xlu1 %2344  ;;  %2938 = vrot.lane.b32.xlu0 %v7863_v36, %s10441_s27  ;;  %2230 = vmatprep.subr.bf16.mxu1 %v2211_v50 }
 0x348   : > { %2231 = vmatpush1.bf16.msra.mxu1 %v2210_v15 }
 0x349   : > { %2936 = vrot.lane.b32.xlu1 %v7859_v34, %s10441_s27  ;;  %v8095_v0 = vpop.permute.xlu0 %2346 }
 0x34b   : > { %v8097_v57 = vpop.permute.xlu1 %2474  ;;  %3056 = vrot.lane.b32.xlu0 %v7718_v30, %s10445_s28 }
 0x34c   : > { %10444 = vst [vmem:[#allocation37_spill] sm:$0xff] %v8097_v57 }
 0x34d   : > { %2952 = vrot.lane.b32.xlu1 %v7885_v46, %s10441_s27  ;;  %v8103_v10 = vpop.permute.xlu0 %2476 }
 0x34e   : > { %10446 = vst [vmem:[#allocation38_spill] sm:$0xff] %v8103_v10 }
 0x34f   : > { %v2155_v2 = vpop.permute.xlu1 %2154  ;;  %2824 = vrot.lane.b32.xlu0 %v7891_v49, %s10352_s19 }
 0x351   : > { %3054 = vrot.lane.b32.xlu1 %v7716_v6, %s10445_s28  ;;  %v2157_v58 = vpop.permute.xlu0 %2156 }
 0x353   : > { %v8109_v8 = vpop.permute.xlu1 %2080  ;;  %3072 = vrot.lane.b32.xlu0 %v7746_v47, %s10445_s28  ;;  %v2109_v47 = vsel %vm574_vm0, %v7935_v32, %v7883_v44 }
 0x355   : > { %3070 = vrot.lane.b32.xlu1 %v7740_v45, %s10445_s28  ;;  %v8115_v37 = vpop.permute.xlu0 %2082 }
 0x357   : > { %v8117_v54 = vpop.permute.xlu1 %2332  ;;  %3060 = vrot.lane.b32.xlu0 %v7776_v61, %s10445_s28  ;;  %v2101_v61 = vsel %vm574_vm0, %v7883_v44, %v7935_v32 }
 0x359   : > { %3058 = vrot.lane.b32.xlu1 %v7772_v59, %s10445_s28  ;;  %v8123_v50 = vpop.permute.xlu0 %2334 }
 0x35b   : > { %v8125_v15 = vpop.permute.xlu1 %2462  ;;  %3076 = vrot.lane.b32.xlu0 %v7800_v5, %s10445_s28 }
 0x35c   : > { %10447 = vst [vmem:[#allocation39_spill] sm:$0xff] %v8125_v15 }
 0x35d   : > { %3074 = vrot.lane.b32.xlu1 %v7796_v3, %s10445_s28  ;;  %v8131_v6 = vpop.permute.xlu0 %2464  ;;  %v2100_v3 = vsel %vm574_vm0, %v7876_v40, %v7925_v24 }
 0x35e   : > { %10448 = vst [vmem:[#allocation40_spill] sm:$0xff] %v8131_v6  ;;  %v2119_v6 = vmul.f32 %v2101_v61, %v7367_v20  ;;  %v2103_v61 = vsel %vm574_vm0, %v7971_v28, %v8019_v13 }
 0x35f   : > { %v2171_v30 = vpop.permute.xlu1 %2170  ;;  %2954 = vrot.lane.b32.xlu0 %v7891_v49, %s10441_s27 }
 0x360   : > { %v2180_v59 = vsel %vm605_vm1, %v2155_v2, %v2171_v30  ;;  %v2188_v5 = vsel %vm605_vm1, %v2171_v30, %v2155_v2 }
 0x361   : > { %3062 = vrot.lane.b32.xlu1 %v7816_v18, %s10445_s28  ;;  %v2173_v45 = vpop.permute.xlu0 %2172  ;;  %v2202_v2 = vmul.f32 %v2188_v5, %v7373_v22  ;;  %v2203_v57 = vmul.f32 %v2180_v59, %v7370_v21  ;;  %v2117_v59 = vmul.f32 %v2100_v3, %v7367_v20  ;;  %v2123_v3 = vmul.f32 %v2103_v61, %v7367_v20 }
 0x362   : > { %v2181_v15 = vsel %vm605_vm1, %v2157_v58, %v2173_v45  ;;  %v2189_v30 = vsel %vm605_vm1, %v2173_v45, %v2157_v58  ;;  %v2108_v45 = vsel %vm574_vm0, %v7925_v24, %v7876_v40  ;;  %v2118_v58 = vmul.f32 %v2109_v47, %v7364_v19  ;;  %v6948_v47 = vld [vmem:[%s10282_s4 + $0x8] sm:$0xff]  }
 0x363   : > { %v2204_v18 = vmul.f32 %v2189_v30, %v7373_v22  ;;  %v2205_v10 = vmul.f32 %v2181_v15, %v7370_v21  ;;  %v8162_v9 = vpop.permute.xlu1 %2684  ;;  %3064 = vrot.lane.b32.xlu0 %v7820_v23, %s10445_s28  ;;  %v2102_v15 = vsel %vm574_vm0, %v7965_v7, %v8013_v42  ;;  %v2111_v40 = vsel %vm574_vm0, %v8019_v13, %v7971_v28 }
 0x364   : > { %v2110_v28 = vsel %vm574_vm0, %v8013_v42, %v7965_v7  ;;  %v2104_v61 = vsel %vm574_vm0, %v8041_v14, %v8081_v12  ;;  %v2113_v42 = vsel %vm574_vm0, %v8087_v33, %v8047_v35 }
 0x365   : > { %3078 = vrot.lane.b32.xlu1 %v7837_v26, %s10445_s28  ;;  %v8177_v5 = vpop.permute.xlu0 %2686  ;;  %v2213_v44 = vpack.c.bf16 %v2205_v10, %v2203_v57  ;;  %v2212_v32 = vpack.c.bf16 %v2204_v18, %v2202_v2  ;;  %v2133_v18 = vpack.c.bf16 %v2119_v6, %v2117_v59  ;;  %v2116_v57 = vmul.f32 %v2108_v45, %v7364_v19 }
 0x366   : > { %v2105_v10 = vsel %vm574_vm0, %v8047_v35, %v8087_v33  ;;  %v2121_v6 = vmul.f32 %v2102_v15, %v7367_v20  ;;  %v2122_v2 = vmul.f32 %v2111_v40, %v7364_v19  ;;  %v2112_v35 = vsel %vm574_vm0, %v8081_v12, %v8041_v14 }
 0x367   : > { %v2097_v24 = vpop.permute.xlu1 %2096  ;;  %3080 = vrot.lane.b32.xlu0 %v7841_v27, %s10445_s28  ;;  %2232 = vmatprep.subr.bf16.mxu1 %v2213_v44  ;;  %v2132_v30 = vpack.c.bf16 %v2118_v58, %v2116_v57  ;;  %v2127_v7 = vmul.f32 %v2105_v10, %v7367_v20  ;;  %v2120_v44 = vmul.f32 %v2110_v28, %v7364_v19  ;;  %v3185_v28 = vld [vmem:[%s10288_s10 + $0x8] sm:$0xff] }
 0x368   : > { %2233 = vmatpush1.bf16.msra.mxu1 %v2212_v32  ;;  %v2135_v59 = vpack.c.bf16 %v2123_v3, %v2121_v6  ;;  %v10449_v32 = vmov 0   ;;  %v2125_v33 = vmul.f32 %v2104_v61, %v7367_v20  ;;  %v2126_v40 = vmul.f32 %v2113_v42, %v7364_v19  ;;  %v3184_v3 = vld [vmem:[%s10288_s10] sm:$0xff] }
 0x369   : > { %3066 = vrot.lane.b32.xlu1 %v7859_v34, %s10445_s28  ;;  %2277 = vmatprep.subr.bf16.mxu1 %v2133_v18  ;;  %v8206_v13 = vpop.permute.xlu0 %2674  ;;  %v2134_v15 = vpack.c.bf16 %v2122_v2, %v2120_v44  ;;  %v2353_v12 = vsel %vm862_vm2, %v7895_v53, %v7943_v41  ;;  %v2106_v57 = vsel %vm574_vm0, %v8109_v8, %v2097_v24 }
 0x36a   : > { %v2137_v18 = vpack.c.bf16 %v2127_v7, %v2125_v33  ;;  %v2114_v10 = vsel %vm574_vm0, %v2097_v24, %v8109_v8  ;;  %v2352_v6 = vsel %vm862_vm2, %v7887_v51, %v7937_v39  ;;  %v2371_v8 = vmul.f32 %v2353_v12, %v7377_v25 }
 0x36b   : > { %v8218_v45 = vpop.permute.xlu1 %2348  ;;  %3068 = vrot.lane.b32.xlu0 %v7863_v36, %s10445_s28  ;;  %6526 = vmatmul.mubr.msk.bf16.vlgmr.msra.gmra.mrb[0].mxu1 %vm2222_vm10, %v6948_v47  ;;  %v2124_v47 = vmul.f32 %v2112_v35, %v7364_v19  ;;  %v2128_v7 = vmul.f32 %v2114_v10, %v7364_v19  ;;  %v2355_v35 = vsel %vm862_vm2, %v7979_v31, %v8027_v4  ;;  %v6949_v10 = vld [vmem:[%s10282_s4] sm:$0xff]  }
 0x36c   : > { %2278 = vmatpush1.bf16.msra.mxu1 %v2132_v30  ;;  %2309 = vmatprep.mubr.bf16.mxu1 %v10449_v32  ;;  %v2361_v30 = vsel %vm862_vm2, %v7943_v41, %v7895_v53  ;;  %v2369_v33 = vmul.f32 %v2352_v6, %v7377_v25  ;;  %v2357_v6 = vsel %vm862_vm2, %v8055_v16, %v8095_v0 }
 0x36d   : > { %3082 = vrot.lane.b32.xlu1 %v7885_v46, %s10445_s28  ;;  %2279 = vmatprep.subr.bf16.mxu1 %v2135_v59  ;;  %v8232_v58 = vpop.permute.xlu0 %2690  ;;  %v2136_v24 = vpack.c.bf16 %v2126_v40, %v2124_v47  ;;  %v2129_v59 = vmul.f32 %v2106_v57, %v7367_v20  ;;  %v2370_v12 = vmul.f32 %v2361_v30, %v7415_v48 }
 0x36e   : > { %v2363_v47 = vsel %vm862_vm2, %v8027_v4, %v7979_v31  ;;  %v2385_v57 = vpack.c.bf16 %v2371_v8, %v2369_v33  ;;  %v2362_v31 = vsel %vm862_vm2, %v8021_v17, %v7973_v29 }
 0x36f   : > { %v8242_v14 = vpop.permute.xlu1 %2478  ;;  %3084 = vrot.lane.b32.xlu0 %v7891_v49, %s10445_s28  ;;  %v2374_v8 = vmul.f32 %v2363_v47, %v7415_v48 }
 0x370   : > { %2280 = vmatpush1.bf16.msra.mxu1 %v2134_v15 }
 0x371   : > { %3188 = vperm.xlu1 %6831, %v3184_v3   ;;  %2281 = vmatprep.subr.bf16.mxu1 %v2137_v18  ;;  %v2099_v2 = vpop.permute.xlu0 %2098  ;;  %v2354_v18 = vsel %vm862_vm2, %v7973_v29, %v8021_v17  ;;  %v2379_v29 = vmul.f32 %v2357_v6, %v7377_v25  ;;  %v2485_v6 = vsel %vm1022_vm5, %v7987_v38, %v8035_v1 }
 0x372   : > { %v2107_v61 = vsel %vm574_vm0, %v8115_v37, %v2099_v2  ;;  %v2115_v42 = vsel %vm574_vm0, %v2099_v2, %v8115_v37  ;;  %v2360_v37 = vsel %vm862_vm2, %v7937_v39, %v7887_v51  ;;  %v2375_v51 = vmul.f32 %v2355_v35, %v7377_v25 }
 0x373   : > { %v2130_v53 = vmul.f32 %v2115_v42, %v7364_v19  ;;  %v2131_v41 = vmul.f32 %v2107_v61, %v7367_v20  ;;  %v8275_v44 = vpop.permute.xlu1 %2672  ;;  %3193 = vperm.xlu0 %6830, %v3185_v28   ;;  %v2368_v28 = vmul.f32 %v2360_v37, %v7415_v48  ;;  %v2373_v4 = vmul.f32 %v2354_v18, %v7377_v25 }
 0x374   : > { %2282 = vmatpush1.bf16.msra.mxu1 %v2136_v24  ;;  %v2356_v24 = vsel %vm862_vm2, %v8049_v43, %v8089_v60  ;;  %v2365_v61 = vsel %vm862_vm2, %v8095_v0, %v8055_v16  ;;  %v2483_v35 = vsel %vm1022_vm5, %v7903_v56, %v7951_v63 }
 0x375   : > { %v2138_v15 = vpack.c.bf16 %v2130_v53, %v2128_v7  ;;  %v8286_v40 = vpop.permute.xlu0 %2678  ;;  %v2139_v3 = vpack.c.bf16 %v2131_v41, %v2129_v59  ;;  %v2384_v2 = vpack.c.bf16 %v2370_v12, %v2368_v28  ;;  %v2387_v42 = vpack.c.bf16 %v2375_v51, %v2373_v4 }
 0x376   : > { %v2372_v7 = vmul.f32 %v2362_v31, %v7415_v48  ;;  %v2364_v59 = vsel %vm862_vm2, %v8089_v60, %v8049_v43  ;;  %v2377_v53 = vmul.f32 %v2356_v24, %v7377_v25  ;;  %v2378_v41 = vmul.f32 %v2365_v61, %v7415_v48  ;;  %v10450_v24 = vld [vmem:[#allocation9_spill] sm:$0xff] }
 0x377   : > { %v8298_v39 = vpop.permute.xlu1 %2688  ;;  %2283 = vmatprep.subr.bf16.mxu1 %v2139_v3  ;;  %v2358_v43 = vsel %vm862_vm2, %v8117_v54, %v8218_v45  ;;  %v2366_v60 = vsel %vm862_vm2, %v8218_v45, %v8117_v54  ;;  %v2482_v3 = vsel %vm1022_vm5, %v7897_v52, %v7945_v62  ;;  %v2491_v12 = vsel %vm1022_vm5, %v7951_v63, %v7903_v56 }
 0x378   : > { %2284 = vmatpush1.bf16.msra.mxu1 %v2138_v15  ;;  %v2386_v0 = vpack.c.bf16 %v2374_v8, %v2372_v7  ;;  %v2389_v33 = vpack.c.bf16 %v2379_v29, %v2377_v53  ;;  %v2376_v15 = vmul.f32 %v2364_v59, %v7415_v48  ;;  %v2501_v47 = vmul.f32 %v2483_v35, %v7428_v55  ;;  %v10451_v29 = vld [vmem:[#allocation34_spill] sm:$0xff] }
 0x379   : > { %2403 = vmatprep.subr.bf16.mxu1 %v2385_v57  ;;  %v8313_v30 = vpop.permute.xlu0 %2796  ;;  %v2380_v57 = vmul.f32 %v2366_v60, %v7415_v48  ;;  %v2499_v31 = vmul.f32 %v2482_v3, %v7428_v55  ;;  %v2500_v61 = vmul.f32 %v2491_v12, %v10450_v24  ;;  %v2493_v59 = vsel %vm1022_vm5, %v8035_v1, %v7987_v38  ;;  %v10453_v35 = vld [vmem:[#allocation38_spill] sm:$0xff]  ;;  %v10455_v12 = vld [vmem:[#allocation37_spill] sm:$0xff] }
 0x37a   : > { %v2388_v51 = vpack.c.bf16 %v2378_v41, %v2376_v15  ;;  %v2504_v3 = vmul.f32 %v2493_v59, %v10450_v24 }
 0x37b   : > { %v8325_v17 = vpop.permute.xlu1 %2676  ;;  %6528 = vmatmul.mubr.msk.bf16.vlgmr.msra.gmra.mrb[0].mxu1 %vm2222_vm10, %v6949_v10  ;;  %v2381_v10 = vmul.f32 %v2358_v43, %v7377_v25  ;;  %v2515_v53 = vpack.c.bf16 %v2501_v47, %v2499_v31 }
 0x37c   : > { %2404 = vmatpush1.bf16.msra.mxu1 %v2384_v2  ;;  %2435 = vmatprep.mubr.bf16.mxu1 %v10449_v32 }
 0x37d   : > { %2405 = vmatprep.subr.bf16.mxu1 %v2387_v42  ;;  %v8335_v16 = vpop.permute.xlu0 %2812  ;;  %v10452_v42 = vld [vmem:[#allocation31_spill] sm:$0xff] }
 0x37e   : > { %v2484_v7 = vsel %vm1022_vm5, %v10452_v42, %v10451_v29  ;;  %v2492_v38 = vsel %vm1022_vm5, %v10451_v29, %v10452_v42  ;;  %v10457_v29 = vld [vmem:[#allocation39_spill] sm:$0xff] }
 0x37f   : > { %v8342_v37 = vpop.permute.xlu1 %2692  ;;  %v2503_v1 = vmul.f32 %v2484_v7, %v7428_v55  ;;  %v2488_v42 = vsel %vm1022_vm5, %v10457_v29, %v8242_v14  ;;  %v2496_v7 = vsel %vm1022_vm5, %v8242_v14, %v10457_v29  ;;  %v10465_v29 = vld [vmem:[#allocation18_spill] sm:$0xff] }
 0x380   : > { %2406 = vmatpush1.bf16.msra.mxu1 %v2386_v0  ;;  %v6950_v0 = vld [vmem:[%s10282_s4 + $0x10] sm:$0xff]  }
 0x381   : > { %2407 = vmatprep.subr.bf16.mxu1 %v2389_v33  ;;  %v2351_v18 = vpop.permute.xlu0 %2350  ;;  %v10454_v33 = vld [vmem:[#allocation36_spill] sm:$0xff] }
 0x382   : > { %v2359_v54 = vsel %vm862_vm2, %v8123_v50, %v2351_v18  ;;  %v2367_v45 = vsel %vm862_vm2, %v2351_v18, %v8123_v50  ;;  %v2490_v50 = vsel %vm1022_vm5, %v7945_v62, %v7897_v52  ;;  %v2505_v52 = vmul.f32 %v2485_v6, %v7428_v55  ;;  %v10456_v18 = vld [vmem:[#allocation35_spill] sm:$0xff] }
 0x383   : > { %v2382_v28 = vmul.f32 %v2367_v45, %v7415_v48  ;;  %v2383_v56 = vmul.f32 %v2359_v54, %v7377_v25  ;;  %v8372_v63 = vpop.permute.xlu1 %2794  ;;  %v2498_v41 = vmul.f32 %v2490_v50, %v10450_v24  ;;  %v2487_v15 = vsel %vm1022_vm5, %v10454_v33, %v10453_v35 }
 0x384   : > { %2408 = vmatpush1.bf16.msra.mxu1 %v2388_v51  ;;  %v2486_v47 = vsel %vm1022_vm5, %v10456_v18, %v10455_v12  ;;  %v2495_v51 = vsel %vm1022_vm5, %v10453_v35, %v10454_v33  ;;  %v2509_v54 = vmul.f32 %v2487_v15, %v7428_v55  ;;  %v10459_v35 = vld [vmem:[#allocation8_spill] sm:$0xff]  ;;  %v10460_v33 = vld [vmem:[#allocation21_spill] sm:$0xff] }
 0x385   : > { %v2390_v4 = vpack.c.bf16 %v2382_v28, %v2380_v57  ;;  %v8383_v2 = vpop.permute.xlu0 %2800  ;;  %v2391_v8 = vpack.c.bf16 %v2383_v56, %v2381_v10  ;;  %v2514_v60 = vpack.c.bf16 %v2500_v61, %v2498_v41  ;;  %v2517_v57 = vpack.c.bf16 %v2505_v52, %v2503_v1 }
 0x386   : > { %v2502_v10 = vmul.f32 %v2492_v38, %v10450_v24  ;;  %v2494_v28 = vsel %vm1022_vm5, %v10455_v12, %v10456_v18  ;;  %v2507_v56 = vmul.f32 %v2486_v47, %v7428_v55  ;;  %v2508_v31 = vmul.f32 %v2495_v51, %v10450_v24  ;;  %v10461_v51 = vld [vmem:[#allocation20_spill] sm:$0xff] }
 0x387   : > { %v8395_v62 = vpop.permute.xlu1 %2810  ;;  %2409 = vmatprep.subr.bf16.mxu1 %v2391_v8  ;;  %v2506_v61 = vmul.f32 %v2494_v28, %v10450_v24  ;;  %v2585_v15 = vmul.f32 %v10460_v33, %v10459_v35  ;;  %v2510_v38 = vmul.f32 %v2496_v7, %v10450_v24  ;;  %v2511_v1 = vmul.f32 %v2488_v42, %v7428_v55 }
 0x388   : > { %2410 = vmatpush1.bf16.msra.mxu1 %v2390_v4  ;;  %v2516_v50 = vpack.c.bf16 %v2504_v3, %v2502_v10  ;;  %v2519_v8 = vpack.c.bf16 %v2509_v54, %v2507_v56  ;;  %v2583_v54 = vmul.f32 %v10461_v51, %v10459_v35  ;;  %v10463_v10 = vld [vmem:[#allocation19_spill] sm:$0xff] }
 0x389   : > { %2533 = vmatprep.subr.bf16.mxu1 %v2515_v53  ;;  %v8410_v43 = vpop.permute.xlu0 %2816  ;;  %v2518_v52 = vpack.c.bf16 %v2508_v31, %v2506_v61  ;;  %v10458_v53 = vld [vmem:[#allocation40_spill] sm:$0xff]  ;;  %v6951_v31 = vld [vmem:[%s10282_s4 + $0x18] sm:$0xff]  }
 0x38b   : > { %v8422_v45 = vpop.permute.xlu1 %2798  ;;  %6532 = vmatmul.mubr.msk.bf16.vlgmr.msra.gmra.mrb[0].mxu1 %vm2222_vm10, %v6950_v0 }
 0x38c   : > { %2534 = vmatpush1.bf16.msra.mxu1 %v2514_v60  ;;  %2565 = vmatprep.mubr.bf16.mxu1 %v10449_v32 }
 0x38d   : > { %2535 = vmatprep.subr.bf16.mxu1 %v2517_v57  ;;  %v8432_v6 = vpop.permute.xlu0 %2804  ;;  %v10462_v57 = vld [vmem:[#allocation7_spill] sm:$0xff] }
 0x38e   : > { %v2584_v28 = vmul.f32 %v10463_v10, %v10462_v57  ;;  %v2582_v42 = vmul.f32 %v10465_v29, %v10462_v57  ;;  %v2592_v51 = vmul.f32 %v7820_v23, %v10462_v57  ;;  %v2595_v23 = vmul.f32 %v7885_v46, %v10459_v35  ;;  %v10472_v29 = vld [vmem:[#allocation27_spill] sm:$0xff]  ;;  %v10475_v46 = vld [vmem:[#allocation33_spill] sm:$0xff] }
 0x38f   : > { %v8435_v4 = vpop.permute.xlu1 %2814 }
 0x390   : > { %2536 = vmatpush1.bf16.msra.mxu1 %v2516_v50  ;;  %v2599_v50 = vpack.c.bf16 %v2585_v15, %v2583_v54 }
 0x391   : > { %2537 = vmatprep.subr.bf16.mxu1 %v2519_v8  ;;  %v2481_v59 = vpop.permute.xlu0 %2480  ;;  %v10464_v8 = vld [vmem:[#allocation25_spill] sm:$0xff] }
 0x392   : > { %v2489_v0 = vsel %vm1022_vm5, %v10458_v53, %v2481_v59  ;;  %v2497_v41 = vsel %vm1022_vm5, %v2481_v59, %v10458_v53  ;;  %v2589_v61 = vmul.f32 %v10464_v8, %v10459_v35  ;;  %v10466_v59 = vld [vmem:[#allocation24_spill] sm:$0xff]  ;;  %v2598_v53 = vpack.c.bf16 %v2584_v28, %v2582_v42  ;;  %v10471_v8 = vld [vmem:[#allocation26_spill] sm:$0xff]  ;;  %v10473_v42 = vld [vmem:[#allocation29_spill] sm:$0xff] }
 0x393   : > { %v2512_v14 = vmul.f32 %v2497_v41, %v10450_v24  ;;  %v2513_v60 = vmul.f32 %v2489_v0, %v7428_v55  ;;  %v8458_v3 = vpop.permute.xlu1 %2802  ;;  %v10467_v0 = vld [vmem:[#allocation23_spill] sm:$0xff]  ;;  %v10469_v28 = vld [vmem:[#allocation28_spill] sm:$0xff] }
 0x394   : > { %2538 = vmatpush1.bf16.msra.mxu1 %v2518_v52  ;;  %v2587_v52 = vmul.f32 %v10466_v59, %v10459_v35  ;;  %v2588_v41 = vmul.f32 %v10467_v0, %v10462_v57  ;;  %v10474_v0 = vld [vmem:[#allocation10_spill] sm:$0xff] }
 0x395   : > { %v2520_v12 = vpack.c.bf16 %v2512_v14, %v2510_v38  ;;  %v8460_v18 = vpop.permute.xlu0 %2820  ;;  %v2521_v47 = vpack.c.bf16 %v2513_v60, %v2511_v1  ;;  %v2593_v38 = vmul.f32 %v7841_v27, %v10459_v35  ;;  %v10468_v1 = vld [vmem:[#allocation22_spill] sm:$0xff]  ;;  %v2597_v27 = vmul.f32 %v7891_v49, %v10459_v35 }
 0x396   : > { %v2601_v15 = vpack.c.bf16 %v2589_v61, %v2587_v52  ;;  %v2586_v14 = vmul.f32 %v10468_v1, %v10462_v57  ;;  %v2590_v61 = vmul.f32 %v10471_v8, %v10462_v57  ;;  %v2704_v49 = vsel %vm1352_vm6, %v10473_v42, %v10472_v29 }
 0x397   : > { %v8466_v56 = vpop.permute.xlu1 %2818  ;;  %2539 = vmatprep.subr.bf16.mxu1 %v2521_v47  ;;  %v2596_v52 = vmul.f32 %v7863_v36, %v10462_v57  ;;  %v2707_v1 = vsel %vm1352_vm6, %v8177_v5, %v10475_v46  ;;  %v2696_v36 = vsel %vm1352_vm6, %v10472_v29, %v10473_v42  ;;  %v2708_v42 = vsel %vm1352_vm6, %v8298_v39, %v8275_v44 }
 0x398   : > { %2540 = vmatpush1.bf16.msra.mxu1 %v2520_v12  ;;  %v2591_v12 = vmul.f32 %v7837_v26, %v10459_v35  ;;  %v2600_v47 = vpack.c.bf16 %v2588_v41, %v2586_v14  ;;  %v2602_v59 = vpack.c.bf16 %v2592_v51, %v2590_v61  ;;  %v2594_v14 = vmul.f32 %v7859_v34, %v10462_v57  ;;  %v10476_v51 = vld [vmem:[#allocation11_spill] sm:$0xff] }
 0x399   : > { %2617 = vmatprep.subr.bf16.mxu1 %v2599_v50  ;;  %v8475_v7 = vpop.permute.xlu0 %2808  ;;  %v10470_v50 = vld [vmem:[#allocation30_spill] sm:$0xff]  ;;  %v2699_v34 = vsel %vm1352_vm6, %v10475_v46, %v8177_v5  ;;  %v2712_v29 = vmul.f32 %v2696_v36, %v10476_v51  ;;  %v2701_v36 = vsel %vm1352_vm6, %v8206_v13, %v8232_v58 }
 0x39a   : > { %v2603_v10 = vpack.c.bf16 %v2593_v38, %v2591_v12  ;;  %v2605_v38 = vpack.c.bf16 %v2597_v27, %v2595_v23  ;;  %v2713_v12 = vmul.f32 %v2704_v49, %v10474_v0  ;;  %v10477_v27 = vld [vmem:[#allocation32_spill] sm:$0xff]  ;;  %v6952_v23 = vld [vmem:[%s10282_s4 + $0x20] sm:$0xff]  }
 0x39b   : > { %v8481_v33 = vpop.permute.xlu1 %2806  ;;  %6536 = vmatmul.mubr.msk.bf16.vlgmr.msra.gmra.mrb[0].mxu1 %vm2222_vm10, %v6951_v31  ;;  %v2705_v31 = vsel %vm1352_vm6, %v10470_v50, %v10469_v28  ;;  %v2698_v5 = vsel %vm1352_vm6, %v10477_v27, %v8162_v9 }
 0x39c   : > { %2618 = vmatpush1.bf16.msra.mxu1 %v2598_v53  ;;  %2649 = vmatprep.mubr.bf16.mxu1 %v10449_v32  ;;  %v2697_v53 = vsel %vm1352_vm6, %v10469_v28, %v10470_v50  ;;  %v2715_v41 = vmul.f32 %v2705_v31, %v10474_v0  ;;  %v2706_v28 = vsel %vm1352_vm6, %v8162_v9, %v10477_v27 }
 0x39d   : > { %2619 = vmatprep.subr.bf16.mxu1 %v2601_v15  ;;  %v8489_v60 = vpop.permute.xlu0 %2926  ;;  %v2604_v50 = vpack.c.bf16 %v2596_v52, %v2594_v14  ;;  %v2719_v31 = vmul.f32 %v2707_v1, %v10474_v0  ;;  %v2717_v49 = vmul.f32 %v2706_v28, %v10474_v0  ;;  %v2721_v9 = vmul.f32 %v2708_v42, %v10474_v0 }
 0x39e   : > { %v2729_v61 = vpack.c.bf16 %v2715_v41, %v2713_v12  ;;  %v2709_v41 = vsel %vm1352_vm6, %v8232_v58, %v8206_v13  ;;  %v2716_v14 = vmul.f32 %v2698_v5, %v10476_v51  ;;  %v2722_v27 = vmul.f32 %v2701_v36, %v10476_v51  ;;  %v10479_v36 = vld [vmem:[#allocation13_spill] sm:$0xff] }
 0x39f   : > { %v8495_v54 = vpop.permute.xlu1 %2822  ;;  %v2731_v1 = vpack.c.bf16 %v2719_v31, %v2717_v49  ;;  %v2723_v12 = vmul.f32 %v2709_v41, %v10474_v0  ;;  %v2702_v28 = vsel %vm1352_vm6, %v8325_v17, %v8342_v37  ;;  %v2710_v13 = vsel %vm1352_vm6, %v8342_v37, %v8325_v17  ;;  %v10478_v49 = vld [vmem:[#allocation12_spill] sm:$0xff] }
 0x3a0   : > { %2620 = vmatpush1.bf16.msra.mxu1 %v2600_v47  ;;  %v2725_v17 = vmul.f32 %v2710_v13, %v10474_v0  ;;  %v2826_v5 = vsel %vm1512_vm7, %v8372_v63, %v8395_v62 }
 0x3a1   : > { %2621 = vmatprep.subr.bf16.mxu1 %v2603_v10  ;;  %v8505_v26 = vpop.permute.xlu0 %2942  ;;  %v2714_v10 = vmul.f32 %v2697_v53, %v10476_v51  ;;  %v2718_v53 = vmul.f32 %v2699_v34, %v10476_v51  ;;  %v2834_v34 = vsel %vm1512_vm7, %v8395_v62, %v8372_v63 }
 0x3a3   : > { %v8520_v15 = vpop.permute.xlu1 %2924  ;;  %v2728_v52 = vpack.c.bf16 %v2714_v10, %v2712_v29  ;;  %v2730_v10 = vpack.c.bf16 %v2718_v53, %v2716_v14  ;;  %v2724_v29 = vmul.f32 %v2702_v28, %v10476_v51  ;;  %v6953_v28 = vld [vmem:[%s10282_s4 + $0x28] sm:$0xff]  }
 0x3a4   : > { %2622 = vmatpush1.bf16.msra.mxu1 %v2602_v59 }
 0x3a5   : > { %2623 = vmatprep.subr.bf16.mxu1 %v2605_v38  ;;  %v8533_v47 = vpop.permute.xlu0 %2930  ;;  %v2700_v38 = vsel %vm1352_vm6, %v8275_v44, %v8298_v39 }
 0x3a6   : > { %v2720_v44 = vmul.f32 %v2700_v38, %v10476_v51 }
 0x3a7   : > { %v8545_v8 = vpop.permute.xlu1 %2940 }
 0x3a8   : > { %2624 = vmatpush1.bf16.msra.mxu1 %v2604_v50  ;;  %v2733_v50 = vpack.c.bf16 %v2723_v12, %v2721_v9  ;;  %v2732_v31 = vpack.c.bf16 %v2722_v27, %v2720_v44  ;;  %v2836_v9 = vsel %vm1512_vm7, %v8435_v4, %v8422_v45  ;;  %v2842_v12 = vmul.f32 %v2826_v5, %v10479_v36 }
 0x3a9   : > { %2747 = vmatprep.subr.bf16.mxu1 %v2729_v61  ;;  %v8560_v59 = vpop.permute.xlu0 %2946  ;;  %v2835_v61 = vsel %vm1512_vm7, %v8335_v16, %v8313_v30  ;;  %v2837_v44 = vsel %vm1512_vm7, %v8410_v43, %v8383_v2 }
 0x3aa   : > { %v2845_v63 = vmul.f32 %v2835_v61, %v10478_v49 }
 0x3ab   : > { %v8572_v46 = vpop.permute.xlu1 %2928  ;;  %6540 = vmatmul.mubr.msk.bf16.vlgmr.msra.gmra.mrb[0].mxu1 %vm2222_vm10, %v6952_v23 }
 0x3ac   : > { %2748 = vmatpush1.bf16.msra.mxu1 %v2728_v52  ;;  %2779 = vmatprep.mubr.bf16.mxu1 %v10449_v32  ;;  %v2843_v52 = vmul.f32 %v2834_v34, %v10478_v49 }
 0x3ad   : > { %2749 = vmatprep.subr.bf16.mxu1 %v2731_v1  ;;  %v8583_v39 = vpop.permute.xlu0 %2934 }
 0x3ae   : > { %v2859_v27 = vpack.c.bf16 %v2845_v63, %v2843_v52 }
 0x3af   : > { %v8594_v58 = vpop.permute.xlu1 %2944 }
 0x3b0   : > { %2750 = vmatpush1.bf16.msra.mxu1 %v2730_v10  ;;  %v2828_v10 = vsel %vm1512_vm7, %v8422_v45, %v8435_v4  ;;  %v2829_v45 = vsel %vm1512_vm7, %v8383_v2, %v8410_v43  ;;  %v2849_v4 = vmul.f32 %v2837_v44, %v10478_v49 }
 0x3b1   : > { %2751 = vmatprep.subr.bf16.mxu1 %v2733_v50  ;;  %v2695_v23 = vpop.permute.xlu0 %2694  ;;  %v2838_v50 = vsel %vm1512_vm7, %v8466_v56, %v8458_v3  ;;  %v2846_v61 = vmul.f32 %v2828_v10, %v10479_v36  ;;  %v2956_v10 = vsel %vm1672_vm8, %v8520_v15, %v8545_v8 }
 0x3b2   : > { %v2703_v37 = vsel %vm1352_vm6, %v8286_v40, %v2695_v23  ;;  %v2711_v42 = vsel %vm1352_vm6, %v2695_v23, %v8286_v40  ;;  %v2827_v40 = vsel %vm1512_vm7, %v8313_v30, %v8335_v16  ;;  %v2847_v30 = vmul.f32 %v2836_v9, %v10478_v49 }
 0x3b3   : > { %v2726_v53 = vmul.f32 %v2703_v37, %v10476_v51  ;;  %v2727_v41 = vmul.f32 %v2711_v42, %v10474_v0  ;;  %v8619_v38 = vpop.permute.xlu1 %2932  ;;  %v2844_v13 = vmul.f32 %v2827_v40, %v10479_v36  ;;  %v2839_v23 = vsel %vm1512_vm7, %v8460_v18, %v8432_v6 }
 0x3b4   : > { %2752 = vmatpush1.bf16.msra.mxu1 %v2732_v31  ;;  %v2851_v2 = vmul.f32 %v2838_v50, %v10478_v49  ;;  %v2848_v37 = vmul.f32 %v2829_v45, %v10479_v36  ;;  %v2831_v42 = vsel %vm1512_vm7, %v8432_v6, %v8460_v18  ;;  %v2853_v5 = vmul.f32 %v2839_v23, %v10478_v49 }
 0x3b5   : > { %v2734_v62 = vpack.c.bf16 %v2726_v53, %v2724_v29  ;;  %v8630_v1 = vpop.permute.xlu0 %2950  ;;  %v2735_v14 = vpack.c.bf16 %v2727_v41, %v2725_v17  ;;  %v2858_v31 = vpack.c.bf16 %v2844_v13, %v2842_v12  ;;  %v2830_v29 = vsel %vm1512_vm7, %v8458_v3, %v8466_v56 }
 0x3b6   : > { %v2861_v17 = vpack.c.bf16 %v2849_v4, %v2847_v30  ;;  %v2850_v3 = vmul.f32 %v2830_v29, %v10479_v36  ;;  %v2860_v52 = vpack.c.bf16 %v2848_v37, %v2846_v61  ;;  %v2832_v53 = vsel %vm1512_vm7, %v8481_v33, %v8495_v54  ;;  %v10480_v30 = vld [vmem:[#allocation14_spill] sm:$0xff]  ;;  %v10481_v61 = vld [vmem:[#allocation15_spill] sm:$0xff]  ;;  %v6954_v37 = vld [vmem:[%s10282_s4 + $0x30] sm:$0xff]  }
 0x3b7   : > { %v8642_v16 = vpop.permute.xlu1 %2948  ;;  %2753 = vmatprep.subr.bf16.mxu1 %v2735_v14  ;;  %v2852_v41 = vmul.f32 %v2831_v42, %v10479_v36  ;;  %v2840_v6 = vsel %vm1512_vm7, %v8495_v54, %v8481_v33  ;;  %v2863_v9 = vpack.c.bf16 %v2853_v5, %v2851_v2  ;;  %v2964_v40 = vsel %vm1672_vm8, %v8545_v8, %v8520_v15 }
 0x3b8   : > { %2754 = vmatpush1.bf16.msra.mxu1 %v2734_v62  ;;  %v2854_v62 = vmul.f32 %v2832_v53, %v10479_v36  ;;  %v2855_v12 = vmul.f32 %v2840_v6, %v10478_v49  ;;  %v2965_v33 = vsel %vm1672_vm8, %v8505_v26, %v8489_v60  ;;  %v2966_v45 = vsel %vm1672_vm8, %v8594_v58, %v8572_v46 }
 0x3b9   : > { %2877 = vmatprep.subr.bf16.mxu1 %v2859_v27  ;;  %v8657_v34 = vpop.permute.xlu0 %2938  ;;  %v2862_v63 = vpack.c.bf16 %v2852_v41, %v2850_v3  ;;  %v2973_v27 = vmul.f32 %v2964_v40, %v10480_v30  ;;  %v2975_v15 = vmul.f32 %v2965_v33, %v10480_v30  ;;  %v2972_v23 = vmul.f32 %v2956_v10, %v10481_v61 }
 0x3ba   : > { %v2967_v29 = vsel %vm1672_vm8, %v8560_v59, %v8533_v47  ;;  %v2958_v2 = vsel %vm1672_vm8, %v8572_v46, %v8594_v58  ;;  %v2968_v5 = vsel %vm1672_vm8, %v8642_v16, %v8619_v38  ;;  %v2959_v46 = vsel %vm1672_vm8, %v8533_v47, %v8560_v59 }
 0x3bb   : > { %v8669_v43 = vpop.permute.xlu1 %2936  ;;  %6544 = vmatmul.mubr.msk.bf16.vlgmr.msra.gmra.mrb[0].mxu1 %vm2222_vm10, %v6953_v28  ;;  %v2979_v58 = vmul.f32 %v2967_v29, %v10480_v30  ;;  %v2976_v53 = vmul.f32 %v2958_v2, %v10481_v61  ;;  %v2969_v41 = vsel %vm1672_vm8, %v8630_v1, %v8583_v39  ;;  %v2960_v6 = vsel %vm1672_vm8, %v8619_v38, %v8642_v16 }
 0x3bc   : > { %2878 = vmatpush1.bf16.msra.mxu1 %v2858_v31  ;;  %2909 = vmatprep.mubr.bf16.mxu1 %v10449_v32  ;;  %v2978_v40 = vmul.f32 %v2959_v46, %v10481_v61  ;;  %v2980_v38 = vmul.f32 %v2960_v6, %v10481_v61 }
 0x3bd   : > { %2879 = vmatprep.subr.bf16.mxu1 %v2861_v17  ;;  %v8680_v56 = vpop.permute.xlu0 %3056  ;;  %v2977_v17 = vmul.f32 %v2966_v45, %v10480_v30 }
 0x3bf   : > { %v2953_v18 = vpop.permute.xlu1 %2952  ;;  %v2991_v59 = vpack.c.bf16 %v2979_v58, %v2977_v17 }
 0x3c0   : > { %2880 = vmatpush1.bf16.msra.mxu1 %v2860_v52 }
 0x3c1   : > { %2881 = vmatprep.subr.bf16.mxu1 %v2863_v9  ;;  %v2825_v14 = vpop.permute.xlu0 %2824  ;;  %v2981_v9 = vmul.f32 %v2968_v5, %v10480_v30 }
 0x3c2   : > { %v2833_v54 = vsel %vm1512_vm7, %v8475_v7, %v2825_v14  ;;  %v2841_v44 = vsel %vm1512_vm7, %v2825_v14, %v8475_v7  ;;  %v2957_v7 = vsel %vm1672_vm8, %v8489_v60, %v8505_v26  ;;  %v2989_v26 = vpack.c.bf16 %v2975_v15, %v2973_v27  ;;  %v10482_v15 = vld [vmem:[#allocation16_spill] sm:$0xff] }
 0x3c3   : > { %v2856_v28 = vmul.f32 %v2833_v54, %v10479_v36  ;;  %v2857_v13 = vmul.f32 %v2841_v44, %v10478_v49  ;;  %v3055_v50 = vpop.permute.xlu1 %3054  ;;  %v2974_v42 = vmul.f32 %v2957_v7, %v10481_v61  ;;  %v2990_v14 = vpack.c.bf16 %v2978_v40, %v2976_v53 }
 0x3c4   : > { %2882 = vmatpush1.bf16.msra.mxu1 %v2862_v63  ;;  %v2961_v63 = vsel %vm1672_vm8, %v8583_v39, %v8630_v1  ;;  %v2970_v39 = vsel %vm1672_vm8, %v2953_v18, %v8669_v43 }
 0x3c5   : > { %v2864_v8 = vpack.c.bf16 %v2856_v28, %v2854_v62  ;;  %v3073_v4 = vpop.permute.xlu0 %3072  ;;  %v2865_v31 = vpack.c.bf16 %v2857_v13, %v2855_v12  ;;  %v2988_v52 = vpack.c.bf16 %v2974_v42, %v2972_v23  ;;  %v2983_v62 = vmul.f32 %v2969_v41, %v10480_v30 }
 0x3c6   : > { %v2962_v12 = vsel %vm1672_vm8, %v8669_v43, %v2953_v18  ;;  %v2982_v33 = vmul.f32 %v2961_v63, %v10481_v61  ;;  %v2985_v13 = vmul.f32 %v2970_v39, %v10480_v30  ;;  %v3095_v45 = vsel %vm1832_vm9, %v3073_v4, %v8680_v56 }
 0x3c7   : > { %v3071_v60 = vpop.permute.xlu1 %3070  ;;  %2883 = vmatprep.subr.bf16.mxu1 %v2865_v31  ;;  %v2993_v54 = vpack.c.bf16 %v2983_v62, %v2981_v9  ;;  %v2984_v27 = vmul.f32 %v2962_v12, %v10481_v61  ;;  %v3087_v17 = vsel %vm1832_vm9, %v8680_v56, %v3073_v4  ;;  %v6955_v56 = vld [vmem:[%s10282_s4 + $0x38] sm:$0xff]  }
 0x3c8   : > { %2884 = vmatpush1.bf16.msra.mxu1 %v2864_v8  ;;  %v3094_v44 = vsel %vm1832_vm9, %v3071_v60, %v3055_v50  ;;  %v2992_v10 = vpack.c.bf16 %v2982_v33, %v2980_v38  ;;  %v3086_v7 = vsel %vm1832_vm9, %v3055_v50, %v3071_v60  ;;  %v10483_v60 = vld [vmem:[#allocation17_spill] sm:$0xff] }
 0x3c9   : > { %3007 = vmatprep.subr.bf16.mxu1 %v2989_v26  ;;  %v3061_v3 = vpop.permute.xlu0 %3060  ;;  %v3103_v8 = vmul.f32 %v3094_v44, %v10482_v15  ;;  %v3102_v42 = vmul.f32 %v3086_v7, %v10483_v60  ;;  %v3104_v4 = vmul.f32 %v3087_v17, %v10483_v60 }
 0x3cb   : > { %v3059_v47 = vpop.permute.xlu1 %3058  ;;  %6548 = vmatmul.mubr.msk.bf16.vlgmr.msra.gmra.mrb[0].mxu1 %vm2222_vm10, %v6954_v37 }
 0x3cc   : > { %3008 = vmatpush1.bf16.msra.mxu1 %v2988_v52  ;;  %3039 = vmatprep.mubr.bf16.mxu1 %v10449_v32 }
 0x3cd   : > { %3009 = vmatprep.subr.bf16.mxu1 %v2991_v59  ;;  %v3077_v16 = vpop.permute.xlu0 %3076 }
 0x3ce   : > { %v3097_v5 = vsel %vm1832_vm9, %v3077_v16, %v3061_v3  ;;  %v3089_v41 = vsel %vm1832_vm9, %v3061_v3, %v3077_v16 }
 0x3cf   : > { %v3075_v1 = vpop.permute.xlu1 %3074  ;;  %v3109_v6 = vmul.f32 %v3097_v5, %v10482_v15  ;;  %v3108_v16 = vmul.f32 %v3089_v41, %v10483_v60 }
 0x3d0   : > { %3010 = vmatpush1.bf16.msra.mxu1 %v2990_v14  ;;  %v3096_v2 = vsel %vm1832_vm9, %v3075_v1, %v3059_v47  ;;  %v3088_v46 = vsel %vm1832_vm9, %v3059_v47, %v3075_v1  ;;  %v3118_v47 = vpack.c.bf16 %v3104_v4, %v3102_v42 }
 0x3d1   : > { %3011 = vmatprep.subr.bf16.mxu1 %v2993_v54  ;;  %v2955_v28 = vpop.permute.xlu0 %2954  ;;  %v3107_v58 = vmul.f32 %v3096_v2, %v10482_v15  ;;  %v3106_v59 = vmul.f32 %v3088_v46, %v10483_v60 }
 0x3d2   : > { %v2963_v43 = vsel %vm1672_vm8, %v8657_v34, %v2955_v28  ;;  %v2971_v18 = vsel %vm1672_vm8, %v2955_v28, %v8657_v34  ;;  %v3105_v34 = vmul.f32 %v3095_v45, %v10482_v15 }
 0x3d3   : > { %v2986_v31 = vmul.f32 %v2963_v43, %v10481_v61  ;;  %v2987_v23 = vmul.f32 %v2971_v18, %v10480_v30  ;;  %v3063_v29 = vpop.permute.xlu1 %3062  ;;  %v3121_v3 = vpack.c.bf16 %v3109_v6, %v3107_v58  ;;  %v3120_v1 = vpack.c.bf16 %v3108_v16, %v3106_v59 }
 0x3d4   : > { %3012 = vmatpush1.bf16.msra.mxu1 %v2992_v10  ;;  %v3119_v53 = vpack.c.bf16 %v3105_v34, %v3103_v8  ;;  %v6956_v34 = vld [vmem:[%s10282_s4 + $0x40] sm:$0xff]  }
 0x3d5   : > { %v2994_v26 = vpack.c.bf16 %v2986_v31, %v2984_v27  ;;  %v3065_v37 = vpop.permute.xlu0 %3064  ;;  %v2995_v50 = vpack.c.bf16 %v2987_v23, %v2985_v13 }
 0x3d7   : > { %v3079_v52 = vpop.permute.xlu1 %3078  ;;  %3013 = vmatprep.subr.bf16.mxu1 %v2995_v50 }
 0x3d8   : > { %3014 = vmatpush1.bf16.msra.mxu1 %v2994_v26  ;;  %v3098_v40 = vsel %vm1832_vm9, %v3079_v52, %v3063_v29  ;;  %v3090_v12 = vsel %vm1832_vm9, %v3063_v29, %v3079_v52 }
 0x3d9   : > { %3137 = vmatprep.subr.bf16.mxu1 %v3119_v53  ;;  %v3081_v9 = vpop.permute.xlu0 %3080  ;;  %v3111_v33 = vmul.f32 %v3098_v40, %v10482_v15  ;;  %v3110_v27 = vmul.f32 %v3090_v12, %v10483_v60 }
 0x3da   : > { %v3099_v63 = vsel %vm1832_vm9, %v3081_v9, %v3065_v37  ;;  %v3091_v62 = vsel %vm1832_vm9, %v3065_v37, %v3081_v9 }
 0x3db   : > { %v3113_v38 = vmul.f32 %v3099_v63, %v10482_v15  ;;  %v3067_v14 = vpop.permute.xlu1 %3066  ;;  %6552 = vmatmul.mubr.msk.bf16.vlgmr.msra.gmra.mrb[0].mxu1 %vm2222_vm10, %v6955_v56  ;;  %v3112_v54 = vmul.f32 %v3091_v62, %v10483_v60 }
 0x3dc   : > { %3138 = vmatpush1.bf16.msra.mxu1 %v3118_v47  ;;  %3169 = vmatprep.mubr.bf16.mxu1 %v10449_v32 }
 0x3dd   : > { %3139 = vmatprep.subr.bf16.mxu1 %v3121_v3  ;;  %v3069_v39 = vpop.permute.xlu0 %3068  ;;  %v3123_v10 = vpack.c.bf16 %v3113_v38, %v3111_v33  ;;  %v3122_v43 = vpack.c.bf16 %v3112_v54, %v3110_v27 }
 0x3df   : > { %v3083_v44 = vpop.permute.xlu1 %3082 }
 0x3e0   : > { %v3092_v28 = vsel %vm1832_vm9, %v3067_v14, %v3083_v44  ;;  %v3100_v13 = vsel %vm1832_vm9, %v3083_v44, %v3067_v14  ;;  %3140 = vmatpush1.bf16.msra.mxu1 %v3120_v1 }
 0x3e1   : > { %3141 = vmatprep.subr.bf16.mxu1 %v3123_v10  ;;  %v3085_v45 = vpop.permute.xlu0 %3084  ;;  %v3114_v8 = vmul.f32 %v3092_v28, %v10483_v60  ;;  %v3115_v31 = vmul.f32 %v3100_v13, %v10482_v15  ;;  %v8903_v10 = vld [vmem:[%s10284_s6 + $0x8] sm:$0xff]  }
 0x3e2   : > { %v3093_v18 = vsel %vm1832_vm9, %v3069_v39, %v3085_v45  ;;  %v3101_v7 = vsel %vm1832_vm9, %v3085_v45, %v3069_v39  ;;  %v3861_v45 = vunpack.c.l.bf16 %v8903_v10 }
 0x3e3   : > { %v3116_v23 = vmul.f32 %v3093_v18, %v10483_v60  ;;  %v3117_v29 = vmul.f32 %v3101_v7, %v10482_v15  ;;  %v3862_v18 = vunpack.c.h.bf16 %v8903_v10 }
 0x3e4   : > { %3142 = vmatpush1.bf16.msra.mxu1 %v3122_v43  ;;  %v10356_v43 = vmov 3  }
 0x3e5   : > { %v3124_v2 = vpack.c.bf16 %v3116_v23, %v3114_v8  ;;  %v3125_v17 = vpack.c.bf16 %v3117_v29, %v3115_v31  ;;  %6832 = vset.pattern.permute.xlu0 %v10356_v43  ;;  %v6839_v23 = vpack.i.bf16 %v3862_v18, %v3861_v45 }
 0x3e7   : > { %3143 = vmatprep.subr.bf16.mxu1 %v3125_v17 }
 0x3e8   : > { %3144 = vmatpush1.bf16.msra.mxu1 %v3124_v2  ;;  %v6557_v2 = vld [vmem:[%s10283_s5 + $0x1] sm:$0x1] }
 0x3eb   : > { %6556 = vmatmul.mubr.msk.bf16.vlgmr.msra.gmra.mrb[0].mxu1 %vm2222_vm10, %v6956_v34 }
 0x3ec   : > { %3279 = vmatprep.mubr.bf16.mxu1 %v10449_v32 }
 0x3f0   : > { %v3189_v26 = vpop.permute.xlu1 %3188 }
 0x3f2   : > { %v3194_v5 = vpop.permute.xlu0 %3193 }
 0x4be   : > { %v3171_v37 = vpop.f32.mrb[0].mxu1 }
 0x4bf   : > { %v3196_v50 = vadd.f32 %v3189_v26, %v3171_v37  ;;  %v3173_v42 = vpop.f32.mrb[1].mxu1 }
 0x4c0   : > { %v3197_v46 = vadd.f32 %v3189_v26, %v3173_v42  ;;  %v3175_v58 = vpop.f32.mrb[2].mxu1  ;;  %v8927_v42 = vld [vmem:[%s10284_s6 + $0x10] sm:$0xff]  }
 0x4c1   : > { %v3200_v52 = vmax.f32 %v3196_v50, 0.0  ;;  %v3198_v53 = vadd.f32 %v3194_v5, %v3175_v58  ;;  %v3177_v56 = vpop.f32.mrb[3].mxu1 }
 0x4c2   : > { %v3201_v4 = vmax.f32 %v3197_v46, 0.0  ;;  %v3199_v41 = vadd.f32 %v3194_v5, %v3177_v56  ;;  %v3863_v56 = vunpack.c.l.bf16 %v8927_v42 }
 0x4c3   : > { %v3202_v6 = vmax.f32 %v3198_v53, 0.0  ;;  %3223 = vrot.lane.b32.xlu1 %v3200_v52, %s7200_s29  ;;  %v8845_v47 = vmul.f32 %v3200_v52, %v10462_v57  ;;  %v4316_v53 = vld [vmem:[%s10290_s12] sm:$0xff] }
 0x4c4   : > { %v3203_v9 = vmax.f32 %v3199_v41, 0.0  ;;  %v8851_v40 = vmul.f32 %v3201_v4, %v10459_v35 }
 0x4c5   : > { %3225 = vrot.lane.b32.xlu0 %v3202_v6, %s7200_s29  ;;  %v8848_v59 = vmul.f32 %v3202_v6, %v10462_v57 }
 0x4c6   : > { %v8854_v63 = vmul.f32 %v3203_v9, %v10459_v35  ;;  %v3782_v35 = vld [vmem:[#allocation2] sm:$0x1] }
 0x4c7   : > { %3227 = vrot.lane.b32.xlu1 %v3201_v4, %s7200_s29  ;;  %v3468_v62 = vpack.c.bf16 %v8848_v59, %v8845_v47 }
 0x4c8   : > { %v3469_v38 = vpack.c.bf16 %v8854_v63, %v8851_v40 }
 0x4c9   : > { %3229 = vrot.lane.b32.xlu0 %v3203_v9, %s7200_s29 }
 0x4cb   : > { %3204 = vrot.lane.b32.xlu1 %v3200_v52, %s7201_s30 }
 0x4cd   : > { %3206 = vrot.lane.b32.xlu0 %v3202_v6, %s7201_s30 }
 0x4cf   : > { %3208 = vrot.lane.b32.xlu1 %v3201_v4, %s7201_s30 }
 0x4d1   : > { %3210 = vrot.lane.b32.xlu0 %v3203_v9, %s7201_s30 }
 0x4d3   : > { %3332 = vrot.lane.b32.xlu1 %v3200_v52, %s7203_s0 }
 0x4d5   : > { %3334 = vrot.lane.b32.xlu0 %v3202_v6, %s7203_s0 }
 0x4d7   : > { %3336 = vrot.lane.b32.xlu1 %v3201_v4, %s7203_s0 }
 0x4d9   : > { %3338 = vrot.lane.b32.xlu0 %v3203_v9, %s7203_s0 }
 0x4db   : > { %3398 = vrot.lane.b32.xlu1 %v3200_v52, %s7204_s17 }
 0x4dd   : > { %3400 = vrot.lane.b32.xlu0 %v3202_v6, %s7204_s17 }
 0x4df   : > { %3402 = vrot.lane.b32.xlu1 %v3201_v4, %s7204_s17 }
 0x4e1   : > { %3404 = vrot.lane.b32.xlu0 %v3203_v9, %s7204_s17 }
 0x4e3   : > { %3518 = vrot.lane.b32.xlu1 %v3200_v52, %s10354_s18 }
 0x4e5   : > { %3520 = vrot.lane.b32.xlu0 %v3202_v6, %s10354_s18 }
 0x4e7   : > { %3522 = vrot.lane.b32.xlu1 %v3201_v4, %s10354_s18 }
 0x4e9   : > { %3524 = vrot.lane.b32.xlu0 %v3203_v9, %s10354_s18 }
 0x4eb   : > { %3584 = vrot.lane.b32.xlu1 %v3200_v52, %s10352_s19 }
 0x4ed   : > { %3586 = vrot.lane.b32.xlu0 %v3202_v6, %s10352_s19 }
 0x4ef   : > { %3588 = vrot.lane.b32.xlu1 %v3201_v4, %s10352_s19 }
 0x4f1   : > { %3590 = vrot.lane.b32.xlu0 %v3203_v9, %s10352_s19  ;;  %s6369_s19 = sshll.u32 %s10580_s24, 1 }
 0x4f3   : > { %3650 = vrot.lane.b32.xlu1 %v3200_v52, %s10441_s27 }
 0x4f5   : > { %3652 = vrot.lane.b32.xlu0 %v3202_v6, %s10441_s27 }
 0x4f7   : > { %3654 = vrot.lane.b32.xlu1 %v3201_v4, %s10441_s27 }
 0x4f9   : > { %3656 = vrot.lane.b32.xlu0 %v3203_v9, %s10441_s27 }
 0x4fb   : > { %3716 = vrot.lane.b32.xlu1 %v3200_v52, %s10445_s28  ;;  %v8935_v52 = vld [vmem:[%s10284_s6] sm:$0xff]  }
 0x4fc   : > { %v3860_v41 = vunpack.c.h.bf16 %v8935_v52 }
 0x4fd   : > { %3718 = vrot.lane.b32.xlu0 %v3202_v6, %s10445_s28 }
 0x4ff   : > { %3720 = vrot.lane.b32.xlu1 %v3201_v4, %s10445_s28  ;;  %v3864_v4 = vunpack.c.h.bf16 %v8927_v42 }
 0x501   : > { %3722 = vrot.lane.b32.xlu0 %v3203_v9, %s10445_s28 }
 0x503   : > { %3785 = vperm.xlu1 %6831, %v3782_v35  }
 0x507   : > { %6838 = vset.pattern.permute.xlu1 %v10356_v43 }
 0x508   : > { %6840 = vperm.xlu1 %6838, %v6839_v23   ;;  %v4318_v23 = vld [vmem:[%s10290_s12 + $0x10] sm:$0xff] }
 0x50c   : > { %6844 = vset.pattern.permute.xlu1 %v10449_v32 }
 0x50d   : > { %4342 = vperm.xlu1 %6844, %v4316_v53  }
 0x511   : > { %6845 = vset.pattern.permute.xlu1 %v10356_v43 }
 0x535   : > { %v3224_v57 = vpop.permute.xlu1 %3223 }
 0x537   : > { %v3226_v14 = vpop.permute.xlu0 %3225 }
 0x539   : > { %v3228_v3 = vpop.permute.xlu1 %3227 }
 0x53a   : > { %v3231_v16 = vsel %vm605_vm1, %v3224_v57, %v3228_v3  ;;  %v3233_v12 = vsel %vm605_vm1, %v3228_v3, %v3224_v57 }
 0x53b   : > { %v3230_v33 = vpop.permute.xlu0 %3229  ;;  %v3235_v39 = vmul.f32 %v3233_v12, %v7373_v22  ;;  %v3236_v1 = vmul.f32 %v3231_v16, %v7370_v21 }
 0x53c   : > { %v3232_v54 = vsel %vm605_vm1, %v3226_v14, %v3230_v33  ;;  %v3234_v44 = vsel %vm605_vm1, %v3230_v33, %v3226_v14  ;;  %v6846_v14 = vpack.i.bf16 %v3864_v4, %v3863_v56  ;;  %v4319_v56 = vld [vmem:[%s10290_s12 + $0x18] sm:$0xff] }
 0x53d   : > { %v3237_v27 = vmul.f32 %v3234_v44, %v7373_v22  ;;  %v3238_v28 = vmul.f32 %v3232_v54, %v7370_v21  ;;  %v3205_v13 = vpop.permute.xlu1 %3204 }
 0x53e   : > { %6847 = vperm.xlu1 %6845, %v6846_v14   ;;  %v4321_v14 = vld [vmem:[%s10290_s12 + $0x28] sm:$0xff] }
 0x53f   : > { %v3239_v7 = vpack.c.bf16 %v3237_v27, %v3235_v39  ;;  %v3207_v8 = vpop.permute.xlu0 %3206  ;;  %v3240_v31 = vpack.c.bf16 %v3238_v28, %v3236_v1  ;;  %v3222_v1 = vld [vmem:[%s10283_s5] sm:$0x1] }
 0x541   : > { %v3209_v29 = vpop.permute.xlu1 %3208  ;;  %3247 = vmatprep.subr.bf16.mxu1 %v3240_v31  ;;  %v8973_v31 = vld [vmem:[%s10284_s6 + $0x18] sm:$0xff]  }
 0x542   : > { %v3212_v22 = vsel %vm574_vm0, %v3205_v13, %v3209_v29  ;;  %v3214_v21 = vsel %vm574_vm0, %v3209_v29, %v3205_v13  ;;  %3248 = vmatpush1.bf16.msra.mxu1 %v3239_v7  ;;  %v3865_v29 = vunpack.c.l.bf16 %v8973_v31  ;;  %6851 = vset.pattern.permute.xlu1 %v10449_v32 }
 0x543   : > { %v3211_v17 = vpop.permute.xlu0 %3210  ;;  %v3216_v34 = vmul.f32 %v3214_v21, %v7364_v19  ;;  %v3217_v26 = vmul.f32 %v3212_v22, %v7367_v20  ;;  %4352 = vperm.xlu1 %6851, %v4318_v23   ;;  %v4325_v23 = vld [vmem:[%s10290_s12 + $0x48] sm:$0xff] }
 0x544   : > { %v3213_v37 = vsel %vm574_vm0, %v3207_v8, %v3211_v17  ;;  %v3215_v50 = vsel %vm574_vm0, %v3211_v17, %v3207_v8 }
 0x545   : > { %v3218_v5 = vmul.f32 %v3215_v50, %v7364_v19  ;;  %v3219_v46 = vmul.f32 %v3213_v37, %v7367_v20  ;;  %v3333_v58 = vpop.permute.xlu1 %3332  ;;  %6558 = vmatmul.mubr.msk.bf16.vlgmr.msra.gmra.mrb[4].mxu1 %vm3243_vm11, %v6557_v2  ;;  %v8946_v19 = vld [vmem:[%s10284_s6 + $0x20] sm:$0xff]   ;;  %v3859_v20 = vunpack.c.l.bf16 %v8935_v52  ;;  %v4317_v2 = vld [vmem:[%s10290_s12 + $0x8] sm:$0xff] }
 0x546   : > { %3323 = vmatprep.mubr.bf16.mxu1 %v10449_v32  ;;  %v3867_v57 = vunpack.c.l.bf16 %v8946_v19  ;;  %v3868_v16 = vunpack.c.h.bf16 %v8946_v19  ;;  %v6560_v37 = vld [vmem:[%s10283_s5 + $0x2] sm:$0x1] }
 0x547   : > { %v3220_v6 = vpack.c.bf16 %v3218_v5, %v3216_v34  ;;  %v3335_v9 = vpop.permute.xlu0 %3334  ;;  %v3221_v35 = vpack.c.bf16 %v3219_v46, %v3217_v26  ;;  %v6833_v3 = vpack.i.bf16 %v3860_v41, %v3859_v20  ;;  %6852 = vset.pattern.permute.xlu1 %v10356_v43 }
 0x548   : > { %v6859_v54 = vpack.i.bf16 %v3868_v16, %v3867_v57  ;;  %v6562_v16 = vld [vmem:[%s10283_s5 + $0x3] sm:$0x1] }
 0x549   : > { %v3337_v12 = vpop.permute.xlu1 %3336  ;;  %3291 = vmatprep.subr.bf16.mxu1 %v3221_v35  ;;  %6834 = vperm.xlu0 %6832, %v6833_v3  }
 0x54a   : > { %v3340_v33 = vsel %vm862_vm2, %v3333_v58, %v3337_v12  ;;  %v3342_v39 = vsel %vm862_vm2, %v3337_v12, %v3333_v58  ;;  %3292 = vmatpush1.bf16.msra.mxu1 %v3220_v6 }
 0x54b   : > { %v3339_v44 = vpop.permute.xlu0 %3338  ;;  %v3344_v13 = vmul.f32 %v3342_v39, %v7415_v48  ;;  %v3345_v45 = vmul.f32 %v3340_v33, %v7377_v25  ;;  %v9025_v33 = vld [vmem:[%s10284_s6 + $0x28] sm:$0xff]  }
 0x54c   : > { %v3341_v27 = vsel %vm862_vm2, %v3335_v9, %v3339_v44  ;;  %v3343_v28 = vsel %vm862_vm2, %v3339_v44, %v3335_v9  ;;  %v3870_v44 = vunpack.c.h.bf16 %v9025_v33 }
 0x54d   : > { %v3346_v18 = vmul.f32 %v3343_v28, %v7415_v48  ;;  %v3347_v7 = vmul.f32 %v3341_v27, %v7377_v25  ;;  %v3399_v8 = vpop.permute.xlu1 %3398  ;;  %6559 = vmatmul.mubr.msk.bf16.vlgmr.msra.gmra.mrb[8].mxu1 %vm3243_vm11, %v3222_v1  ;;  %v3866_v48 = vunpack.c.h.bf16 %v8973_v31  ;;  %6860 = vperm.xlu0 %6832, %v6859_v54   ;;  %v4323_v1 = vld [vmem:[%s10290_s12 + $0x38] sm:$0xff]  ;;  %v3869_v54 = vunpack.c.l.bf16 %v9025_v33  ;;  %v4322_v28 = vld [vmem:[%s10290_s12 + $0x30] sm:$0xff] }
 0x54e   : > { %3387 = vmatprep.mubr.bf16.mxu1 %v10449_v32 }
 0x54f   : > { %v3348_v25 = vpack.c.bf16 %v3346_v18, %v3344_v13  ;;  %v3401_v22 = vpop.permute.xlu0 %3400  ;;  %v3349_v21 = vpack.c.bf16 %v3347_v7, %v3345_v45  ;;  %v6853_v50 = vpack.i.bf16 %v3866_v48, %v3865_v29  ;;  %v6866_v7 = vpack.i.bf16 %v3870_v44, %v3869_v54  ;;  %v4326_v44 = vld [vmem:[%s10290_s12 + $0x50] sm:$0xff] }
 0x551   : > { %v3403_v17 = vpop.permute.xlu1 %3402  ;;  %3355 = vmatprep.subr.bf16.mxu1 %v3349_v21  ;;  %6864 = vset.pattern.permute.xlu0 %v10449_v32 }
 0x552   : > { %v3406_v34 = vsel %vm1022_vm5, %v3399_v8, %v3403_v17  ;;  %v3408_v26 = vsel %vm1022_vm5, %v3403_v17, %v3399_v8  ;;  %3356 = vmatpush1.bf16.msra.mxu1 %v3348_v25  ;;  %4347 = vperm.xlu0 %6864, %v4317_v2   ;;  %v4327_v17 = vld [vmem:[%s10290_s12 + $0x58] sm:$0xff] }
 0x553   : > { %v3405_v5 = vpop.permute.xlu0 %3404  ;;  %v3410_v46 = vmul.f32 %v3408_v26, %v10450_v24  ;;  %v3411_v4 = vmul.f32 %v3406_v34, %v7428_v55  ;;  %6854 = vperm.xlu1 %6852, %v6853_v50   ;;  %v9073_v34 = vld [vmem:[%s10284_s6 + $0x30] sm:$0xff]   ;;  %v4324_v26 = vld [vmem:[%s10290_s12 + $0x40] sm:$0xff] }
 0x554   : > { %v3407_v58 = vsel %vm1022_vm5, %v3401_v22, %v3405_v5  ;;  %v3409_v53 = vsel %vm1022_vm5, %v3405_v5, %v3401_v22  ;;  %v3871_v5 = vunpack.c.l.bf16 %v9073_v34 }
 0x555   : > { %v3412_v20 = vmul.f32 %v3409_v53, %v10450_v24  ;;  %v3413_v41 = vmul.f32 %v3407_v58, %v7428_v55  ;;  %v3519_v6 = vpop.permute.xlu1 %3518  ;;  %6561 = vmatmul.mubr.msk.bf16.vlgmr.msra.gmra.mrb[12].mxu1 %vm3243_vm11, %v6560_v37  ;;  %v4320_v55 = vld [vmem:[%s10290_s12 + $0x20] sm:$0xff] }
 0x556   : > { %3453 = vmatprep.mubr.bf16.mxu1 %v10449_v32  ;;  %4357 = vperm.xlu0 %6864, %v4319_v56   ;;  %v4328_v56 = vld [vmem:[%s10290_s12 + $0x60] sm:$0xff] }
 0x557   : > { %v3414_v9 = vpack.c.bf16 %v3412_v20, %v3410_v46  ;;  %v3521_v35 = vpop.permute.xlu0 %3520  ;;  %v3415_v57 = vpack.c.bf16 %v3413_v41, %v3411_v4  ;;  %6858 = vset.pattern.permute.xlu1 %v10449_v32  ;;  %v3872_v46 = vunpack.c.h.bf16 %v9073_v34  ;;  %v6566_v41 = vld [vmem:[%s10283_s5 + $0x5] sm:$0x1] }
 0x558   : > { %4367 = vperm.xlu1 %6858, %v4321_v14  }
 0x559   : > { %v3523_v3 = vpop.permute.xlu1 %3522  ;;  %3421 = vmatprep.subr.bf16.mxu1 %v3415_v57 }
 0x55a   : > { %v3528_v24 = vsel %vm1352_vm6, %v3523_v3, %v3519_v6  ;;  %3422 = vmatpush1.bf16.msra.mxu1 %v3414_v9  ;;  %4362 = vperm.xlu0 %6864, %v4320_v55   ;;  %v3526_v13 = vsel %vm1352_vm6, %v3519_v6, %v3523_v3  ;;  %v6873_v9 = vpack.i.bf16 %v3872_v46, %v3871_v5 }
 0x55b   : > { %3475 = vmatprep.subr.bf16.mxu1 %v3469_v38  ;;  %v3525_v12 = vpop.permute.xlu0 %3524  ;;  %v3531_v40 = vmul.f32 %v3528_v24, %v10474_v0  ;;  %v3530_v47 = vmul.f32 %v3526_v13, %v10476_v51  ;;  %v4330_v24 = vld [vmem:[%s10290_s12 + $0x70] sm:$0xff] }
 0x55c   : > { %v3529_v39 = vsel %vm1352_vm6, %v3525_v12, %v3521_v35  ;;  %v3527_v63 = vsel %vm1352_vm6, %v3521_v35, %v3525_v12  ;;  %4377 = vperm.xlu1 %6858, %v4323_v1   ;;  %v9112_v1 = vld [vmem:[%s10284_s6 + $0x38] sm:$0xff]  }
 0x55d   : > { %v3533_v38 = vmul.f32 %v3529_v39, %v10474_v0  ;;  %v3585_v27 = vpop.permute.xlu1 %3584  ;;  %6563 = vmatmul.mubr.msk.bf16.vlgmr.msra.gmra.mrb[16].mxu1 %vm3243_vm11, %v6562_v16  ;;  %v3532_v0 = vmul.f32 %v3527_v63, %v10476_v51  ;;  %v3874_v63 = vunpack.c.h.bf16 %v9112_v1 }
 0x55e   : > { %3476 = vmatpush1.bf16.msra.mxu1 %v3468_v62  ;;  %3507 = vmatprep.mubr.bf16.mxu1 %v10449_v32  ;;  %v6564_v62 = vld [vmem:[%s10283_s5 + $0x4] sm:$0x1] }
 0x55f   : > { %v3587_v45 = vpop.permute.xlu0 %3586  ;;  %v3535_v18 = vpack.c.bf16 %v3533_v38, %v3531_v40  ;;  %4372 = vperm.xlu0 %6864, %v4322_v28   ;;  %v3534_v48 = vpack.c.bf16 %v3532_v0, %v3530_v47  ;;  %v3873_v40 = vunpack.c.l.bf16 %v9112_v1  ;;  %v6568_v28 = vld [vmem:[%s10283_s5 + $0x6] sm:$0x1] }
 0x560   : > { %6865 = vset.pattern.permute.xlu1 %v10356_v43  ;;  %v3829_v0 = vld [vmem:[%s545_s11] sm:$0xff]  ;;  %s554_s11 = scalar_lea.vmem %s10294_s16, %s6369_s19 }
 0x561   : > { %v3589_v8 = vpop.permute.xlu1 %3588  ;;  %3541 = vmatprep.subr.bf16.mxu1 %v3535_v18  ;;  %6867 = vperm.xlu1 %6865, %v6866_v7  }
 0x562   : > { %v3594_v59 = vsel %vm1512_vm7, %v3589_v8, %v3585_v27 }
 0x563   : > { %v3591_v29 = vpop.permute.xlu0 %3590  ;;  %4387 = vperm.xlu0 %6864, %v4325_v23   ;;  %v3597_v22 = vmul.f32 %v3594_v59, %v10478_v49  ;;  %v6880_v23 = vpack.i.bf16 %v3874_v63, %v3873_v40 }
 0x564   : > { %v3595_v25 = vsel %vm1512_vm7, %v3591_v29, %v3587_v45  ;;  %v3593_v51 = vsel %vm1512_vm7, %v3587_v45, %v3591_v29 }
 0x565   : > { %v3599_v21 = vmul.f32 %v3595_v25, %v10478_v49  ;;  %v3651_v2 = vpop.permute.xlu1 %3650  ;;  %6565 = vmatmul.mubr.msk.bf16.vlgmr.msra.gmra.mrb[20].mxu1 %vm3243_vm11, %v6564_v62  ;;  %v3592_v49 = vsel %vm1512_vm7, %v3585_v27, %v3589_v8  ;;  %v3598_v58 = vmul.f32 %v3593_v51, %v10479_v36  ;;  %6871 = vset.pattern.permute.xlu1 %v10449_v32  ;;  %v4329_v51 = vld [vmem:[%s10290_s12 + $0x68] sm:$0xff] }
 0x566   : > { %3542 = vmatpush1.bf16.msra.mxu1 %v3534_v48  ;;  %3573 = vmatprep.mubr.bf16.mxu1 %v10449_v32  ;;  %v3596_v4 = vmul.f32 %v3592_v49, %v10479_v36  ;;  %v3831_v62 = vcombine.high %v3829_v0, %v3829_v0 }
 0x567   : > { %v3653_v37 = vpop.permute.xlu0 %3652  ;;  %v3601_v50 = vpack.c.bf16 %v3599_v21, %v3597_v22  ;;  %4397 = vperm.xlu0 %6864, %v4327_v17   ;;  %4382 = vperm.xlu1 %6871, %v4324_v26   ;;  %v6572_v21 = vld [vmem:[%s10283_s5 + $0x8] sm:$0x1]  ;;  %v4331_v17 = vld [vmem:[%s10290_s12 + $0x78] sm:$0xff] }
 0x568   : > { %v3600_v35 = vpack.c.bf16 %v3598_v58, %v3596_v4  ;;  %v3834_v25 = vpack.c.bf16 %v3831_v62, %v3831_v62 }
 0x569   : > { %v3655_v53 = vpop.permute.xlu1 %3654  ;;  %3607 = vmatprep.subr.bf16.mxu1 %v3601_v50 }
 0x56a   : > { %v3660_v20 = vsel %vm1672_vm8, %v3655_v53, %v3651_v2  ;;  %v3658_v16 = vsel %vm1672_vm8, %v3651_v2, %v3655_v53 }
 0x56b   : > { %v3657_v6 = vpop.permute.xlu0 %3656  ;;  %4402 = vperm.xlu0 %6864, %v4328_v56   ;;  %v3663_v14 = vmul.f32 %v3660_v20, %v10480_v30  ;;  %6872 = vset.pattern.permute.xlu1 %v10356_v43  ;;  %v3662_v38 = vmul.f32 %v3658_v16, %v10481_v61 }
 0x56c   : > { %v3661_v57 = vsel %vm1672_vm8, %v3657_v6, %v3653_v37  ;;  %v3659_v36 = vsel %vm1672_vm8, %v3653_v37, %v3657_v6  ;;  %6874 = vperm.xlu1 %6872, %v6873_v9  }
 0x56d   : > { %v3665_v3 = vmul.f32 %v3661_v57, %v10480_v30  ;;  %v3717_v55 = vpop.permute.xlu1 %3716  ;;  %6567 = vmatmul.mubr.msk.bf16.vlgmr.msra.gmra.mrb[24].mxu1 %vm3243_vm11, %v6566_v41  ;;  %v3664_v30 = vmul.f32 %v3659_v36, %v10481_v61 }
 0x56e   : > { %3608 = vmatpush1.bf16.msra.mxu1 %v3600_v35  ;;  %3639 = vmatprep.mubr.bf16.mxu1 %v10449_v32 }
 0x56f   : > { %v3719_v12 = vpop.permute.xlu0 %3718  ;;  %v3667_v39 = vpack.c.bf16 %v3665_v3, %v3663_v14  ;;  %4412 = vperm.xlu0 %6864, %v4330_v24   ;;  %v3666_v45 = vpack.c.bf16 %v3664_v30, %v3662_v38 }
 0x570   : > { %6878 = vset.pattern.permute.xlu1 %v10449_v32 }
 0x571   : > { %v3721_v54 = vpop.permute.xlu1 %3720  ;;  %3673 = vmatprep.subr.bf16.mxu1 %v3667_v39  ;;  %4392 = vperm.xlu1 %6878, %v4326_v44  }
 0x572   : > { %v3726_v27 = vsel %vm1832_vm9, %v3721_v54, %v3717_v55  ;;  %v3724_v47 = vsel %vm1832_vm9, %v3717_v55, %v3721_v54 }
 0x573   : > { %v3723_v13 = vpop.permute.xlu0 %3722  ;;  %v3729_v7 = vmul.f32 %v3726_v27, %v10482_v15  ;;  %v3728_v48 = vmul.f32 %v3724_v47, %v10483_v60 }
 0x574   : > { %v3727_v18 = vsel %vm1832_vm9, %v3723_v13, %v3719_v12  ;;  %v3725_v61 = vsel %vm1832_vm9, %v3719_v12, %v3723_v13 }
 0x575   : > { %v3731_v8 = vmul.f32 %v3727_v18, %v10482_v15  ;;  %6569 = vmatmul.mubr.msk.bf16.vlgmr.msra.gmra.mrb[28].mxu1 %vm3243_vm11, %v6568_v28  ;;  %v3730_v29 = vmul.f32 %v3725_v61, %v10483_v60  ;;  %6879 = vset.pattern.permute.xlu1 %v10356_v43  ;;  %v6570_v15 = vld [vmem:[%s10283_s5 + $0x7] sm:$0x1]  ;;  %v3833_v60 = vpack.c.bf16 %v3829_v0, %v3829_v0 }
 0x576   : > { %3674 = vmatpush1.bf16.msra.mxu1 %v3666_v45  ;;  %3705 = vmatprep.mubr.bf16.mxu1 %v10449_v32 }
 0x577   : > { %v3733_v59 = vpack.c.bf16 %v3731_v8, %v3729_v7  ;;  %6881 = vperm.xlu1 %6879, %v6880_v23   ;;  %v3732_v22 = vpack.c.bf16 %v3730_v29, %v3728_v48  ;;  %v4158_v2 = vsel %vm4156_vm12, %v3833_v60, 0  ;;  %v10484_v29 = vld [vmem:[#allocation5_spill] sm:$0xff] }
 0x579   : > { %3739 = vmatprep.subr.bf16.mxu1 %v3733_v59 }
 0x57b   : > { %6885 = vset.pattern.permute.xlu1 %v10449_v32 }
 0x57c   : > { %4407 = vperm.xlu1 %6885, %v4329_v51  }
 0x57d   : > { %6571 = vmatmul.mubr.msk.bf16.vlgmr.msra.gmra.mrb[32].mxu1 %vm3243_vm11, %v6570_v15 }
 0x57e   : > { %3740 = vmatpush1.bf16.msra.mxu1 %v3732_v22  ;;  %3771 = vmatprep.mubr.bf16.mxu1 %v10449_v32 }
 0x57f   : > { %6588 = vmatprep.subr.msk.bf16.mxu1 %vm4156_vm12, %v3834_v25 }
 0x580   : > { %4417 = vperm.xlu1 %6885, %v4331_v17  }
 0x582   : > { %v3786_v44 = vpop.permute.xlu1 %3785 }
 0x583   : > { %v3791_v48 = vrot.slane %v3786_v44, %v10484_v29 }
 0x585   : > { %6573 = vmatmul.mubr.msk.bf16.vlgmr.msra.gmra.mrb[36].mxu1 %vm3243_vm11, %v6572_v21 }
 0x586   : > { %4164 = vmatpush1.bf16.msra.mxu1 %v4158_v2  ;;  %4195 = vmatprep.mubr.bf16.mxu1 %v10449_v32 }
 0x587   : > { %v9185_v45 = vpop.permute.xlu1 %6840 }
 0x58c   : > { %v9187_v61 = vpop.permute.xlu1 %4342 }
 0x58d   : > { %6589 = vmatmul.mubr.msk.bf16.vlgmr.msra.gmra.mrb[40].mxu1 %vm4119_vm13, %v8935_v52 }
 0x58e   : > { %4205 = vmatprep.mubr.bf16.mxu1 %v10449_v32 }
 0x595   : > { %6590 = vmatmul.mubr.msk.bf16.gmra.mrb[44].mxu1 %vm4119_vm13, %v8903_v10 }
 0x596   : > { %4215 = vmatprep.mubr.bf16.mxu1 %v10449_v32 }
 0x59d   : > { %6591 = vmatmul.mubr.msk.bf16.gmra.mrb[48].mxu1 %vm4119_vm13, %v8927_v42 }
 0x59e   : > { %4225 = vmatprep.mubr.bf16.mxu1 %v10449_v32 }
 0x5a5   : > { %6592 = vmatmul.mubr.msk.bf16.gmra.mrb[52].mxu1 %vm4119_vm13, %v8973_v31 }
 0x5a6   : > { %4235 = vmatprep.mubr.bf16.mxu1 %v10449_v32 }
 0x5ad   : > { %6593 = vmatmul.mubr.msk.bf16.gmra.mrb[56].mxu1 %vm4119_vm13, %v8946_v19 }
 0x5ae   : > { %4245 = vmatprep.mubr.bf16.mxu1 %v10449_v32 }
 0x5b5   : > { %6594 = vmatmul.mubr.msk.bf16.gmra.mrb[60].mxu1 %vm4119_vm13, %v9025_v33 }
 0x5b6   : > { %4255 = vmatprep.mubr.bf16.mxu1 %v10449_v32 }
 0x5bd   : > { %6595 = vmatmul.mubr.msk.bf16.gmra.mrb[64].mxu1 %vm4119_vm13, %v9073_v34  ;;  %v9189_v59 = vpop.permute.xlu1 %6847 }
 0x5be   : > { %4265 = vmatprep.mubr.bf16.mxu1 %v10449_v32 }
 0x5c5   : > { %6596 = vmatmul.mubr.msk.bf16.gmra.mrb[68].mxu1 %vm4119_vm13, %v9112_v1 }
 0x5c6   : > { %4275 = vmatprep.mubr.bf16.mxu1 %v10449_v32 }
 0x618   : > { %v3281_v10 = vpop.f32.mrb[4].mxu1 }
 0x619   : > { %v3283_v42 = vpop.f32.mrb[5].mxu1 }
 0x61a   : > { %v3285_v52 = vpop.f32.mrb[6].mxu1 }
 0x61b   : > { %v3286_v19 = vpop.f32.mrb[7].mxu1 }
 0x620   : > { %v3325_v31 = vpop.f32.mrb[8].mxu1 }
 0x621   : > { %v3326_v26 = vadd.f32 %v3325_v31, %v3281_v10  ;;  %v3327_v49 = vpop.f32.mrb[9].mxu1  ;;  %v9192_v10 = vpop.permute.xlu1 %4352 }
 0x622   : > { %v3328_v33 = vadd.f32 %v3327_v49, %v3283_v42  ;;  %v3329_v37 = vpop.f32.mrb[10].mxu1  ;;  %v6835_v31 = vpop.permute.xlu0 %6834 }
 0x623   : > { %v3330_v50 = vpop.f32.mrb[11].mxu1 }
 0x626   : > { %v9196_v37 = vpop.permute.xlu0 %6860 }
 0x628   : > { %v3389_v5 = vpop.f32.mrb[12].mxu1 }
 0x629   : > { %v3396_v46 = vadd.f32 %v3389_v5, %v3326_v26  ;;  %v3391_v34 = vpop.f32.mrb[13].mxu1 }
 0x62a   : > { %v3397_v58 = vadd.f32 %v3391_v34, %v3328_v33  ;;  %v3393_v53 = vpop.f32.mrb[14].mxu1  ;;  %v9194_v33 = vpop.permute.xlu1 %6854 }
 0x62b   : > { %v3394_v56 = vpop.f32.mrb[15].mxu1 }
 0x62e   : > { %v9198_v53 = vpop.permute.xlu1 %4367 }
 0x630   : > { %v3455_v4 = vpop.f32.mrb[16].mxu1 }
 0x631   : > { %v3462_v20 = vadd.f32 %v3455_v4, %v3396_v46  ;;  %v3457_v41 = vpop.f32.mrb[17].mxu1 }
 0x632   : > { %v3463_v6 = vadd.f32 %v3457_v41, %v3397_v58  ;;  %v3459_v9 = vpop.f32.mrb[18].mxu1  ;;  %v7210_v41 = vmov 1966171168  }
 0x633   : > { %v3460_v35 = vpop.f32.mrb[19].mxu1  ;;  %v4348_v9 = vpop.permute.xlu0 %4347 }
 0x634   : > { %v9202_v35 = vpop.permute.xlu1 %4377 }
 0x638   : > { %v3509_v57 = vpop.f32.mrb[20].mxu1 }
 0x639   : > { %v3516_v14 = vadd.f32 %v3509_v57, %v3462_v20  ;;  %v3511_v36 = vpop.f32.mrb[21].mxu1 }
 0x63a   : > { %v3517_v3 = vadd.f32 %v3511_v36, %v3463_v6  ;;  %v3513_v55 = vpop.f32.mrb[22].mxu1  ;;  %v3810_v6 = vunpack.c.l.s4 %v7210_v41 }
 0x63b   : > { %v3514_v24 = vpop.f32.mrb[23].mxu1 }
 0x63c   : > { %v3811_v36 = vunpack.c.0.s8 %v3810_v6  ;;  %v9212_v24 = vpop.permute.xlu0 %4357 }
 0x640   : > { %v3575_v16 = vpop.f32.mrb[24].mxu1 }
 0x641   : > { %v3582_v12 = vadd.f32 %v3575_v16, %v3516_v14  ;;  %v3577_v39 = vpop.f32.mrb[25].mxu1  ;;  %v6837_v16 = vunpack.i.h.bf16 %v6835_v31 }
 0x642   : > { %v3583_v30 = vadd.f32 %v3577_v39, %v3517_v3  ;;  %v3579_v1 = vpop.f32.mrb[26].mxu1 }
 0x643   : > { %v3580_v54 = vpop.f32.mrb[27].mxu1 }
 0x644   : > { %v9217_v54 = vpop.permute.xlu1 %6867 }
 0x648   : > { %v3641_v40 = vpop.f32.mrb[28].mxu1 }
 0x649   : > { %v3648_v63 = vadd.f32 %v3641_v40, %v3582_v12  ;;  %v3643_v38 = vpop.f32.mrb[29].mxu1  ;;  %v6836_v12 = vunpack.i.l.bf16 %v6835_v31  ;;  %v6842_v40 = vunpack.i.l.bf16 %v9185_v45 }
 0x64a   : > { %v3649_v27 = vadd.f32 %v3643_v38, %v3583_v30  ;;  %v3645_v28 = vpop.f32.mrb[30].mxu1  ;;  %v10486_v30 = vld [vmem:[#allocation3_spill] sm:$0xff]  ;;  %v6843_v38 = vunpack.i.h.bf16 %v9185_v45 }
 0x64b   : > { %v3646_v13 = vpop.f32.mrb[31].mxu1  ;;  %v3814_v1 = vsub.s32 %v3811_v36, %v10486_v30  ;;  %v6863_v36 = vunpack.i.h.bf16 %v9196_v37  ;;  %v6850_v30 = vunpack.i.h.bf16 %v9189_v59 }
 0x650   : > { %v3707_v18 = vpop.f32.mrb[32].mxu1 }
 0x651   : > { %v3714_v0 = vadd.f32 %v3707_v18, %v3648_v63  ;;  %v3709_v7 = vpop.f32.mrb[33].mxu1 }
 0x652   : > { %v3715_v8 = vadd.f32 %v3709_v7, %v3649_v27  ;;  %v3711_v23 = vpop.f32.mrb[34].mxu1 }
 0x653   : > { %v3712_v47 = vpop.f32.mrb[35].mxu1  ;;  %v9240_v23 = vpop.permute.xlu0 %4362 }
 0x658   : > { %v3773_v62 = vpop.f32.mrb[36].mxu1 }
 0x659   : > { %v3780_v15 = vadd.f32 %v3773_v62, %v3714_v0  ;;  %v3775_v25 = vpop.f32.mrb[37].mxu1 }
 0x65a   : > { %v3781_v22 = vadd.f32 %v3775_v25, %v3715_v8  ;;  %v3777_v51 = vpop.f32.mrb[38].mxu1 }
 0x65b   : > { %v3792_v60 = vadd.f32 %v3791_v48, %v3780_v15  ;;  %v3778_v21 = vpop.f32.mrb[39].mxu1 }
 0x65c   : > { %v3793_v2 = vadd.f32 %v3791_v48, %v3781_v22  ;;  %v10490_v48 = vlaneseq }
 0x65d   : > { %v6574_v17 = vmul.f32 -1.442695, %v3792_v60  ;;  %v4383_v60 = vpop.permute.xlu1 %4382 }
 0x65e   : > { %v6575_v42 = vmul.f32 -1.442695, %v3793_v2  ;;  %vm3826_vm14 = vcmp.lt.s32.totalorder %v10490_v48, 256 }
 0x65f   : > { %6983 = vpow2.f32 %v6574_v17 }
 0x660   : > { %6985 = vpow2.f32 %v6575_v42  ;;  %v4197_v52 = vpop.f32.mrb[40].mxu1 }
 0x661   : > { %v4199_v19 = vpop.f32.mrb[41].mxu1 }
 0x662   : > { %v4201_v26 = vpop.f32.mrb[42].mxu1 }
 0x663   : > { %v4203_v49 = vpop.f32.mrb[43].mxu1 }
 0x668   : > { %v4207_v50 = vpop.f32.mrb[44].mxu1 }
 0x669   : > { %v6984_v5 = vpop.eup %6983  ;;  %v4209_v46 = vpop.f32.mrb[45].mxu1 }
 0x66a   : > { %v6986_v34 = vpop.eup %6985  ;;  %v3800_v58 = vadd.f32 1.0, %v6984_v5  ;;  %v4211_v56 = vpop.f32.mrb[46].mxu1  ;;  %v6849_v5 = vunpack.i.l.bf16 %v9189_v59 }
 0x66b   : > { %v3801_v4 = vadd.f32 1.0, %v6986_v34  ;;  %v9200_v20 = vpop.f32.mrb[47].mxu1 }
 0x66c   : > { %6987 = vrcp.f32 %v3800_v58  ;;  %v9258_v58 = vpop.permute.xlu0 %4372 }
 0x66d   : > { %6989 = vrcp.f32 %v3801_v4 }
 0x670   : > { %v9204_v57 = vpop.f32.mrb[48].mxu1 }
 0x671   : > { %v9206_v14 = vpop.f32.mrb[49].mxu1 }
 0x672   : > { %v9208_v3 = vpop.f32.mrb[50].mxu1 }
 0x673   : > { %v9210_v55 = vpop.f32.mrb[51].mxu1 }
 0x676   : > { %v9214_v39 = vpop.eup %6987 }
 0x677   : > { %10485 = vst [vmem:[#allocation9_spill] sm:$0xff] %v9214_v39  ;;  %v9219_v44 = vpop.eup %6989  ;;  %v9224_v63 = vrot.slane %v9214_v39, %v10484_v29 }
 0x678   : > { %10487 = vst [vmem:[#allocation34_spill] sm:$0xff] %v9219_v44  ;;  %v3808_v27 = vcombine.low %v9214_v39, %v9219_v44  ;;  %v9232_v28 = vrot.slane %v9219_v44, %v10484_v29  ;;  %v9234_v13 = vpop.f32.mrb[52].mxu1 }
 0x679   : > { %10488 = vst [vmem:[#allocation31_spill] sm:$0xff] %v9224_v63  ;;  %v4011_v18 = vmul.f32 %v6836_v12, %v9224_v63  ;;  %v4013_v0 = vmul.f32 %v6837_v16, %v9224_v63  ;;  %v9238_v7 = vpop.f32.mrb[53].mxu1  ;;  %v4015_v25 = vmul.f32 %v6842_v40, %v9224_v63  ;;  %v4017_v17 = vmul.f32 %v6843_v38, %v9224_v63 }
 0x67a   : > { %10489 = vst [vmem:[#allocation38_spill] sm:$0xff] %v9232_v28  ;;  %v3815_v8 = vrot.slane %v3808_v27, %v3814_v1  ;;  %v4012_v45 = vmul.f32 %v6836_v12, %v9232_v28  ;;  %v4014_v47 = vmul.f32 %v6837_v16, %v9232_v28  ;;  %v9244_v62 = vpop.f32.mrb[54].mxu1  ;;  %v4016_v2 = vmul.f32 %v6842_v40, %v9232_v28 }
 0x67b   : > { %v4198_v15 = vadd.f32 %v4197_v52, %v4011_v18  ;;  %v9251_v22 = vpop.f32.mrb[55].mxu1  ;;  %v4202_v31 = vadd.f32 %v4201_v26, %v4013_v0  ;;  %v4208_v4 = vadd.f32 %v4207_v50, %v4015_v25  ;;  %v4212_v6 = vadd.f32 %v4211_v56, %v4017_v17 }
 0x67c   : > { %v3822_v51 = vrot.slane %v3815_v8, %v3814_v1  ;;  %v4200_v21 = vadd.f32 %v4199_v19, %v4012_v45  ;;  %v4204_v52 = vadd.f32 %v4203_v49, %v4014_v47  ;;  %v4210_v41 = vadd.f32 %v4209_v46, %v4016_v2  ;;  %v9263_v1 = vpop.permute.xlu1 %6874 }
 0x67d   : > { %v4460_v42 = vadd.f32 %v9187_v61, %v4198_v15  ;;  %v6862_v16 = vunpack.i.l.bf16 %v9196_v37  ;;  %v4462_v12 = vadd.f32 %v4348_v9, %v4202_v31  ;;  %v4018_v49 = vmul.f32 %v6843_v38, %v9232_v28  ;;  %v4388_v15 = vpop.permute.xlu0 %4387 }
 0x67e   : > { %3828 = vst.msk [vmem:[%s554_s11] sm:$0x3] %vm3826_vm14, %v3822_v51  ;;  %v4461_v34 = vadd.f32 %v9187_v61, %v4200_v21  ;;  %v4463_v61 = vadd.f32 %v4348_v9, %v4204_v52  ;;  %v4019_v40 = vmul.f32 %v6849_v5, %v9224_v63  ;;  %v6857_v46 = vunpack.i.h.bf16 %v9194_v33 }
 0x67f   : > { %4508 = vxpose.xlu0.b32.start [1/8] (short) %v4460_v42, 128  ;;  %v6856_v56 = vunpack.i.l.bf16 %v9194_v33  ;;  %v6870_v27 = vunpack.i.h.bf16 %v9217_v54  ;;  %v6869_v37 = vunpack.i.l.bf16 %v9217_v54  ;;  %v4464_v59 = vadd.f32 %v9192_v10, %v4208_v4 }
 0x680   : > { %v4237_v19 = vpop.f32.mrb[56].mxu1  ;;  %4540 = vxpose.xlu1.b32.start [1/8] (short) %v4461_v34, 128  ;;  %v4465_v0 = vadd.f32 %v9192_v10, %v4210_v41  ;;  %v4466_v9 = vadd.f32 %v9212_v24, %v4212_v6  ;;  %v4020_v38 = vmul.f32 %v6849_v5, %v9232_v28  ;;  %v4027_v8 = vmul.f32 %v6862_v16, %v9224_v63  ;;  %v4393_v31 = vpop.permute.xlu1 %4392 }
 0x681   : > { %v4239_v26 = vpop.f32.mrb[57].mxu1  ;;  %v4028_v45 = vmul.f32 %v6862_v16, %v9232_v28  ;;  %v4029_v47 = vmul.f32 %v6863_v36, %v9224_v63  ;;  %v4030_v48 = vmul.f32 %v6863_v36, %v9232_v28  ;;  %v4214_v54 = vadd.f32 %v9200_v20, %v4018_v49 }
 0x682   : > { %v4241_v50 = vpop.f32.mrb[58].mxu1  ;;  %v4218_v25 = vadd.f32 %v9204_v57, %v4019_v40  ;;  %v4021_v10 = vmul.f32 %v6850_v30, %v9224_v63  ;;  %v4022_v51 = vmul.f32 %v6850_v30, %v9232_v28  ;;  %v4238_v21 = vadd.f32 %v4237_v19, %v4027_v8 }
 0x683   : > { %v4243_v18 = vpop.f32.mrb[59].mxu1  ;;  %4509 = vxpose.xlu0.b32.cont [2/8] (short) %v4462_v12, 128  ;;  %v4240_v2 = vadd.f32 %v4239_v26, %v4028_v45  ;;  %v4242_v17 = vadd.f32 %v4241_v50, %v4029_v47  ;;  %v4220_v5 = vadd.f32 %v9206_v14, %v4020_v38  ;;  %v4031_v34 = vmul.f32 %v6869_v37, %v9224_v63 }
 0x684   : > { %4541 = vxpose.xlu1.b32.cont [2/8] (short) %v4463_v61, 128  ;;  %v4244_v42 = vadd.f32 %v4243_v18, %v4030_v48  ;;  %v4032_v20 = vmul.f32 %v6869_v37, %v9232_v28  ;;  %v4033_v57 = vmul.f32 %v6870_v27, %v9224_v63  ;;  %v4476_v4 = vadd.f32 %v4383_v60, %v4238_v21  ;;  %v6882_v48 = vpop.permute.xlu1 %6881 }
 0x685   : > { %v4477_v41 = vadd.f32 %v4383_v60, %v4240_v2  ;;  %v4478_v6 = vadd.f32 %v4388_v15, %v4242_v17  ;;  %v4467_v16 = vadd.f32 %v9212_v24, %v4214_v54  ;;  %v4034_v14 = vmul.f32 %v6870_v27, %v9232_v28  ;;  %v4398_v60 = vpop.permute.xlu0 %4397 }
 0x686   : > { %v4479_v36 = vadd.f32 %v4388_v15, %v4244_v42  ;;  %v6876_v61 = vunpack.i.l.bf16 %v9263_v1  ;;  %v6877_v18 = vunpack.i.h.bf16 %v9263_v1  ;;  %v4468_v38 = vadd.f32 %v9240_v23, %v4218_v25 }
 0x687   : > { %4510 = vxpose.xlu0.b32.cont [3/8] (short) %v4464_v59, 128  ;;  %v4588_v49 = vpack.c.bf16 %v4478_v6, %v4476_v4  ;;  %v4023_v59 = vmul.f32 %v6856_v56, %v9224_v63  ;;  %v4222_v27 = vadd.f32 %v9208_v3, %v4021_v10  ;;  %v4469_v47 = vadd.f32 %v9240_v23, %v4220_v5 }
 0x688   : > { %v4247_v52 = vpop.f32.mrb[60].mxu1  ;;  %4542 = vxpose.xlu1.b32.cont [3/8] (short) %v4465_v0, 128  ;;  %v4589_v50 = vpack.c.bf16 %v4479_v36, %v4477_v41  ;;  %v4024_v0 = vmul.f32 %v6856_v56, %v9232_v28  ;;  %v4035_v56 = vmul.f32 %v6876_v61, %v9224_v63  ;;  %v4025_v3 = vmul.f32 %v6857_v46, %v9224_v63 }
 0x689   : > { %v4249_v19 = vpop.f32.mrb[61].mxu1  ;;  %v4248_v12 = vadd.f32 %v4247_v52, %v4031_v34  ;;  %v4228_v21 = vadd.f32 %v9234_v13, %v4023_v59  ;;  %v4036_v23 = vmul.f32 %v6876_v61, %v9232_v28  ;;  %v4037_v42 = vmul.f32 %v6877_v18, %v9224_v63  ;;  %v4403_v6 = vpop.permute.xlu0 %4402 }
 0x68a   : > { %v4250_v26 = vadd.f32 %v4249_v19, %v4032_v20  ;;  %v4251_v30 = vpop.f32.mrb[62].mxu1  ;;  %4644 = vmatprep.subr.bf16.mxu0 %v4589_v50  ;;  %v4026_v13 = vmul.f32 %v6857_v46, %v9232_v28  ;;  %v4038_v52 = vmul.f32 %v6877_v18, %v9232_v28  ;;  %v4408_v20 = vpop.permute.xlu1 %4407  ;;  %v4232_v33 = vadd.f32 %v9244_v62, %v4025_v3 }
 0x68b   : > { %v4252_v40 = vadd.f32 %v4251_v30, %v4033_v57  ;;  %v4253_v37 = vpop.f32.mrb[63].mxu1  ;;  %4511 = vxpose.xlu0.b32.cont [4/8] (short) %v4466_v9, 128  ;;  %v4480_v8 = vadd.f32 %v4393_v31, %v4248_v12  ;;  %v4224_v9 = vadd.f32 %v9210_v55, %v4022_v51  ;;  %4645 = vmatpush1.bf16.msra.mxu0 %v4588_v49  ;;  %v6883_v57 = vunpack.i.l.bf16 %v6882_v48 }
 0x68c   : > { %v4254_v24 = vadd.f32 %v4253_v37, %v4034_v14  ;;  %4543 = vxpose.xlu1.b32.cont [4/8] (short) %v4467_v16, 128  ;;  %v4481_v1 = vadd.f32 %v4393_v31, %v4250_v26  ;;  %v4470_v55 = vadd.f32 %v9198_v53, %v4222_v27  ;;  %v4230_v51 = vadd.f32 %v9238_v7, %v4024_v0 }
 0x68d   : > { %v4482_v45 = vadd.f32 %v4398_v60, %v4252_v40  ;;  %v4471_v31 = vadd.f32 %v9198_v53, %v4224_v9  ;;  %v6884_v7 = vunpack.i.h.bf16 %v6882_v48  ;;  %v4472_v53 = vadd.f32 %v9258_v58, %v4228_v21 }
 0x68e   : > { %v4483_v54 = vadd.f32 %v4398_v60, %v4254_v24  ;;  %v4473_v16 = vadd.f32 %v9258_v58, %v4230_v51  ;;  %v4234_v12 = vadd.f32 %v9251_v22, %v4026_v13  ;;  %v4039_v61 = vmul.f32 %v6883_v57, %v9224_v63  ;;  %v4418_v24 = vpop.permute.xlu1 %4417 }
 0x68f   : > { %v4590_v15 = vpack.c.bf16 %v4482_v45, %v4480_v8  ;;  %4512 = vxpose.xlu0.b32.cont [5/8] (short) %v4468_v38, 128  ;;  %v4040_v40 = vmul.f32 %v6883_v57, %v9232_v28  ;;  %v4474_v37 = vadd.f32 %v9202_v35, %v4232_v33  ;;  %v4041_v60 = vmul.f32 %v6884_v7, %v9224_v63  ;;  %v4413_v8 = vpop.permute.xlu0 %4412 }
 0x690   : > { %v4257_v25 = vpop.f32.mrb[64].mxu1  ;;  %4544 = vxpose.xlu1.b32.cont [5/8] (short) %v4469_v47, 128  ;;  %v4591_v10 = vpack.c.bf16 %v4483_v54, %v4481_v1  ;;  %v4475_v58 = vadd.f32 %v9202_v35, %v4234_v12  ;;  %v4042_v0 = vmul.f32 %v6884_v7, %v9232_v28 }
 0x691   : > { %v4258_v2 = vadd.f32 %v4257_v25, %v4035_v56  ;;  %v4259_v17 = vpop.f32.mrb[65].mxu1 }
 0x692   : > { %v4260_v5 = vadd.f32 %v4259_v17, %v4036_v23  ;;  %v4261_v34 = vpop.f32.mrb[66].mxu1  ;;  %4646 = vmatprep.subr.bf16.mxu0 %v4591_v10 }
 0x693   : > { %v4262_v4 = vadd.f32 %v4261_v34, %v4037_v42  ;;  %v4263_v41 = vpop.f32.mrb[67].mxu1  ;;  %4647 = vmatpush1.bf16.msra.mxu0 %v4590_v15  ;;  %4513 = vxpose.xlu0.b32.cont [6/8] (short) %v4470_v55, 128  ;;  %v4484_v46 = vadd.f32 %v4403_v6, %v4258_v2 }
 0x694   : > { %v4264_v36 = vadd.f32 %v4263_v41, %v4038_v52  ;;  %4545 = vxpose.xlu1.b32.cont [6/8] (short) %v4471_v31, 128  ;;  %v4485_v26 = vadd.f32 %v4403_v6, %v4260_v5 }
 0x695   : > { %v4486_v19 = vadd.f32 %v4408_v20, %v4262_v4 }
 0x696   : > { %v4487_v30 = vadd.f32 %v4408_v20, %v4264_v36 }
 0x697   : > { %v4592_v14 = vpack.c.bf16 %v4486_v19, %v4484_v46  ;;  %4514 = vxpose.xlu0.b32.cont [7/8] (short) %v4472_v53, 128 }
 0x698   : > { %v4267_v49 = vpop.f32.mrb[68].mxu1  ;;  %4546 = vxpose.xlu1.b32.cont [7/8] (short) %v4473_v16, 128  ;;  %v4593_v50 = vpack.c.bf16 %v4487_v30, %v4485_v26 }
 0x699   : > { %v4268_v62 = vadd.f32 %v4267_v49, %v4039_v61  ;;  %v4269_v18 = vpop.f32.mrb[69].mxu1 }
 0x69a   : > { %v4270_v22 = vadd.f32 %v4269_v18, %v4040_v40  ;;  %v4271_v59 = vpop.f32.mrb[70].mxu1  ;;  %4648 = vmatprep.subr.bf16.mxu0 %v4593_v50 }
 0x69b   : > { %v4272_v38 = vadd.f32 %v4271_v59, %v4041_v60  ;;  %v4273_v27 = vpop.f32.mrb[71].mxu1  ;;  %4649 = vmatpush1.bf16.msra.mxu0 %v4592_v14  ;;  %4515 = vxpose.xlu0.b32.end [8/8] (short) %v4474_v37, 128  ;;  %v4488_v47 = vadd.f32 %v4413_v8, %v4268_v62 }
 0x69c   : > { %v4274_v45 = vadd.f32 %v4273_v27, %v4042_v0  ;;  %4547 = vxpose.xlu1.b32.end [8/8] (short) %v4475_v58, 128  ;;  %v4489_v9 = vadd.f32 %v4413_v8, %v4270_v22  ;;  %v9357_v8 = vld [vmem:[%s10284_s6 + $0x40] sm:$0xff]  }
 0x69d   : > { %v4490_v48 = vadd.f32 %v4418_v24, %v4272_v38  ;;  %6597 = vmatmul.mubr.msk.bf16.gmra.mrb[72].mxu1 %vm4119_vm13, %v9357_v8 }
 0x69e   : > { %v4491_v1 = vadd.f32 %v4418_v24, %v4274_v45  ;;  %4285 = vmatprep.mubr.bf16.mxu1 %v10449_v32 }
 0x69f   : > { %v4594_v54 = vpack.c.bf16 %v4490_v48, %v4488_v47 }
 0x6a0   : > { %v4595_v15 = vpack.c.bf16 %v4491_v1, %v4489_v9 }
 0x6a2   : > { %4650 = vmatprep.subr.bf16.mxu0 %v4595_v15 }
 0x6a3   : > { %4651 = vmatpush1.bf16.msra.mxu0 %v4594_v54 }
 0x6ba   : > { %6886 = vset.pattern.permute.xlu1 %v10356_v43 }
 0x6ff   : > { %v4524_v35 = vpop.trf.xlu0 }
 0x700   : > { %v4556_v13 = vpop.trf.xlu1 }
 0x703   : > { %v4525_v56 = vpop.trf.xlu0 }
 0x704   : > { %v4572_v21 = vpack.c.bf16 %v4525_v56, %v4524_v35  ;;  %v4557_v52 = vpop.trf.xlu1 }
 0x705   : > { %v4580_v26 = vpack.c.bf16 %v4557_v52, %v4556_v13 }
 0x706   : > { %6601 = vmatmul.mubr.msk.bf16.vlgmr.msra.gmra.mrb[16].mxu0 %vm2222_vm10, %v4572_v21 }
 0x707   : > { %v4526_v3 = vpop.trf.xlu0  ;;  %4686 = vmatprep.mubr.bf16.mxu0 %v10449_v32 }
 0x708   : > { %v4558_v4 = vpop.trf.xlu1 }
 0x70b   : > { %v4527_v25 = vpop.trf.xlu0 }
 0x70c   : > { %v4573_v23 = vpack.c.bf16 %v4527_v25, %v4526_v3  ;;  %v4559_v6 = vpop.trf.xlu1 }
 0x70d   : > { %v4581_v61 = vpack.c.bf16 %v4559_v6, %v4558_v4 }
 0x70e   : > { %6602 = vmatmul.mubr.msk.bf16.gmra.mrb[20].mxu0 %vm2222_vm10, %v4573_v23 }
 0x70f   : > { %v4528_v10 = vpop.trf.xlu0  ;;  %4696 = vmatprep.mubr.bf16.mxu0 %v10449_v32 }
 0x710   : > { %v4560_v46 = vpop.trf.xlu1 }
 0x713   : > { %v4529_v55 = vpop.trf.xlu0 }
 0x714   : > { %v4574_v51 = vpack.c.bf16 %v4529_v55, %v4528_v10  ;;  %v4561_v12 = vpop.trf.xlu1 }
 0x715   : > { %v4582_v40 = vpack.c.bf16 %v4561_v12, %v4560_v46 }
 0x716   : > { %6603 = vmatmul.mubr.msk.bf16.gmra.mrb[24].mxu0 %vm2222_vm10, %v4574_v51 }
 0x717   : > { %v4530_v2 = vpop.trf.xlu0  ;;  %4706 = vmatprep.mubr.bf16.mxu0 %v10449_v32 }
 0x718   : > { %v4562_v30 = vpop.trf.xlu1 }
 0x71b   : > { %v4531_v17 = vpop.trf.xlu0 }
 0x71c   : > { %v4575_v42 = vpack.c.bf16 %v4531_v17, %v4530_v2  ;;  %v4563_v14 = vpop.trf.xlu1 }
 0x71d   : > { %v4583_v37 = vpack.c.bf16 %v4563_v14, %v4562_v30 }
 0x71e   : > { %6604 = vmatmul.mubr.msk.bf16.gmra.mrb[28].mxu0 %vm2222_vm10, %v4575_v42 }
 0x71f   : > { %v4532_v31 = vpop.trf.xlu0  ;;  %4716 = vmatprep.mubr.bf16.mxu0 %v10449_v32 }
 0x720   : > { %v4564_v49 = vpop.trf.xlu1 }
 0x723   : > { %v4533_v5 = vpop.trf.xlu0 }
 0x724   : > { %v4576_v34 = vpack.c.bf16 %v4533_v5, %v4532_v31  ;;  %v4565_v50 = vpop.trf.xlu1 }
 0x725   : > { %v4584_v60 = vpack.c.bf16 %v4565_v50, %v4564_v49 }
 0x726   : > { %6605 = vmatmul.mubr.msk.bf16.gmra.mrb[32].mxu0 %vm2222_vm10, %v4576_v34 }
 0x727   : > { %v4534_v20 = vpop.trf.xlu0  ;;  %4726 = vmatprep.mubr.bf16.mxu0 %v10449_v32 }
 0x728   : > { %v4566_v62 = vpop.trf.xlu1 }
 0x72b   : > { %v4535_v57 = vpop.trf.xlu0 }
 0x72c   : > { %v4577_v41 = vpack.c.bf16 %v4535_v57, %v4534_v20  ;;  %v4567_v18 = vpop.trf.xlu1 }
 0x72d   : > { %v4585_v22 = vpack.c.bf16 %v4567_v18, %v4566_v62 }
 0x72e   : > { %6606 = vmatmul.mubr.msk.bf16.gmra.mrb[36].mxu0 %vm2222_vm10, %v4577_v41 }
 0x72f   : > { %v4536_v7 = vpop.trf.xlu0  ;;  %4736 = vmatprep.mubr.bf16.mxu0 %v10449_v32 }
 0x730   : > { %v4568_v58 = vpop.trf.xlu1 }
 0x733   : > { %v4537_v36 = vpop.trf.xlu0 }
 0x734   : > { %v4578_v53 = vpack.c.bf16 %v4537_v36, %v4536_v7  ;;  %v4569_v59 = vpop.trf.xlu1 }
 0x735   : > { %v4586_v24 = vpack.c.bf16 %v4569_v59, %v4568_v58 }
 0x736   : > { %6607 = vmatmul.mubr.msk.bf16.gmra.mrb[40].mxu0 %vm2222_vm10, %v4578_v53 }
 0x737   : > { %v4538_v33 = vpop.trf.xlu0  ;;  %4746 = vmatprep.mubr.bf16.mxu0 %v10449_v32 }
 0x738   : > { %v4570_v0 = vpop.trf.xlu1 }
 0x73b   : > { %v4539_v19 = vpop.trf.xlu0 }
 0x73c   : > { %v4579_v16 = vpack.c.bf16 %v4539_v19, %v4538_v33  ;;  %v4571_v38 = vpop.trf.xlu1 }
 0x73d   : > { %v4587_v27 = vpack.c.bf16 %v4571_v38, %v4570_v0 }
 0x73e   : > { %6608 = vmatmul.mubr.msk.bf16.gmra.mrb[44].mxu0 %vm2222_vm10, %v4579_v16 }
 0x73f   : > { %4756 = vmatprep.mubr.bf16.mxu0 %v10449_v32 }
 0x746   : > { %6609 = vmatmul.mubr.msk.bf16.gmra.mrb[48].mxu0 %vm2222_vm10, %v4580_v26 }
 0x747   : > { %4766 = vmatprep.mubr.bf16.mxu0 %v10449_v32 }
 0x74e   : > { %6610 = vmatmul.mubr.msk.bf16.gmra.mrb[52].mxu0 %vm2222_vm10, %v4581_v61 }
 0x74f   : > { %4776 = vmatprep.mubr.bf16.mxu0 %v10449_v32 }
 0x756   : > { %6611 = vmatmul.mubr.msk.bf16.gmra.mrb[56].mxu0 %vm2222_vm10, %v4582_v40 }
 0x757   : > { %4786 = vmatprep.mubr.bf16.mxu0 %v10449_v32 }
 0x75e   : > { %6612 = vmatmul.mubr.msk.bf16.gmra.mrb[60].mxu0 %vm2222_vm10, %v4583_v37 }
 0x75f   : > { %4796 = vmatprep.mubr.bf16.mxu0 %v10449_v32 }
 0x766   : > { %6613 = vmatmul.mubr.msk.bf16.gmra.mrb[64].mxu0 %vm2222_vm10, %v4584_v60 }
 0x767   : > { %4806 = vmatprep.mubr.bf16.mxu0 %v10449_v32 }
 0x76e   : > { %6614 = vmatmul.mubr.msk.bf16.gmra.mrb[68].mxu0 %vm2222_vm10, %v4585_v22 }
 0x76f   : > { %4816 = vmatprep.mubr.bf16.mxu0 %v10449_v32 }
 0x776   : > { %6615 = vmatmul.mubr.msk.bf16.gmra.mrb[72].mxu0 %vm2222_vm10, %v4586_v24 }
 0x777   : > { %4826 = vmatprep.mubr.bf16.mxu0 %v10449_v32 }
 0x77e   : > { %6616 = vmatmul.mubr.msk.bf16.gmra.mrb[76].mxu0 %vm2222_vm10, %v4587_v27 }
 0x77f   : > { %5885 = vmatprep.mubr.bf16.mxu0 %v10449_v32 }
 0x7d9   : > { %v9362_v45 = vpop.f32.mrb[16].mxu0 }
 0x7da   : > { %v9364_v47 = vpop.f32.mrb[17].mxu0 }
 0x7db   : > { %v4837_v48 = vmax.f32 %v9362_v45, %v9364_v47  ;;  %v9368_v9 = vpop.f32.mrb[18].mxu0 }
 0x7dc   : > { %v9370_v1 = vpop.f32.mrb[19].mxu0 }
 0x7dd   : > { %v4840_v54 = vmax.f32 %v9368_v9, %v9370_v1  ;;  %4838 = vmax.xlane.f32.xlu0 %v4837_v48 }
 0x7df   : > { %4841 = vmax.xlane.f32.xlu1 %v4840_v54 }
 0x7e1   : > { %v9374_v15 = vpop.f32.mrb[20].mxu0 }
 0x7e2   : > { %v9376_v35 = vpop.f32.mrb[21].mxu0 }
 0x7e3   : > { %v4843_v56 = vmax.f32 %v9374_v15, %v9376_v35  ;;  %v9380_v21 = vpop.f32.mrb[22].mxu0 }
 0x7e4   : > { %v9382_v3 = vpop.f32.mrb[23].mxu0 }
 0x7e5   : > { %v4846_v25 = vmax.f32 %v9380_v21, %v9382_v3  ;;  %4844 = vmax.xlane.f32.xlu0 %v4843_v56 }
 0x7e9   : > { %4847 = vmax.xlane.f32.xlu0 %v4846_v25  ;;  %v9386_v23 = vpop.f32.mrb[24].mxu0 }
 0x7ea   : > { %v9388_v10 = vpop.f32.mrb[25].mxu0 }
 0x7eb   : > { %v4849_v55 = vmax.f32 %v9386_v23, %v9388_v10  ;;  %v9392_v51 = vpop.f32.mrb[26].mxu0 }
 0x7ec   : > { %v9394_v2 = vpop.f32.mrb[27].mxu0 }
 0x7ed   : > { %v4852_v17 = vmax.f32 %v9392_v51, %v9394_v2  ;;  %4850 = vmax.xlane.f32.xlu1 %v4849_v55 }
 0x7ef   : > { %4853 = vmax.xlane.f32.xlu0 %v4852_v17 }
 0x7f1   : > { %v9398_v42 = vpop.f32.mrb[28].mxu0 }
 0x7f2   : > { %v9400_v31 = vpop.f32.mrb[29].mxu0 }
 0x7f3   : > { %v4855_v13 = vmax.f32 %v9398_v42, %v9400_v31  ;;  %v9404_v5 = vpop.f32.mrb[30].mxu0 }
 0x7f4   : > { %v9406_v34 = vpop.f32.mrb[31].mxu0 }
 0x7f5   : > { %v4858_v52 = vmax.f32 %v9404_v5, %v9406_v34  ;;  %4856 = vmax.xlane.f32.xlu1 %v4855_v13 }
 0x7f7   : > { %4859 = vmax.xlane.f32.xlu0 %v4858_v52 }
 0x7f9   : > { %v9410_v20 = vpop.f32.mrb[32].mxu0 }
 0x7fa   : > { %v9412_v57 = vpop.f32.mrb[33].mxu0 }
 0x7fb   : > { %v4861_v4 = vmax.f32 %v9410_v20, %v9412_v57  ;;  %v9416_v41 = vpop.f32.mrb[34].mxu0 }
 0x7fc   : > { %v9418_v7 = vpop.f32.mrb[35].mxu0 }
 0x7fd   : > { %v4864_v6 = vmax.f32 %v9416_v41, %v9418_v7  ;;  %4862 = vmax.xlane.f32.xlu1 %v4861_v4 }
 0x7ff   : > { %4865 = vmax.xlane.f32.xlu0 %v4864_v6 }
 0x801   : > { %v9422_v36 = vpop.f32.mrb[36].mxu0 }
 0x802   : > { %v9424_v53 = vpop.f32.mrb[37].mxu0 }
 0x803   : > { %v4867_v33 = vmax.f32 %v9422_v36, %v9424_v53  ;;  %v9428_v46 = vpop.f32.mrb[38].mxu0 }
 0x804   : > { %v9430_v19 = vpop.f32.mrb[39].mxu0 }
 0x805   : > { %v4870_v16 = vmax.f32 %v9428_v46, %v9430_v19  ;;  %4868 = vmax.xlane.f32.xlu1 %v4867_v33 }
 0x807   : > { %4871 = vmax.xlane.f32.xlu0 %v4870_v16 }
 0x809   : > { %v9434_v12 = vpop.f32.mrb[40].mxu0 }
 0x80a   : > { %v9436_v26 = vpop.f32.mrb[41].mxu0 }
 0x80b   : > { %v4873_v30 = vmax.f32 %v9434_v12, %v9436_v26  ;;  %v9440_v14 = vpop.f32.mrb[42].mxu0 }
 0x80c   : > { %v9442_v61 = vpop.f32.mrb[43].mxu0 }
 0x80d   : > { %v4876_v49 = vmax.f32 %v9440_v14, %v9442_v61  ;;  %4874 = vmax.xlane.f32.xlu1 %v4873_v30 }
 0x80f   : > { %4877 = vmax.xlane.f32.xlu0 %v4876_v49 }
 0x811   : > { %v9446_v40 = vpop.f32.mrb[44].mxu0 }
 0x812   : > { %v9448_v50 = vpop.f32.mrb[45].mxu0 }
 0x813   : > { %v4879_v37 = vmax.f32 %v9446_v40, %v9448_v50  ;;  %v9452_v62 = vpop.f32.mrb[46].mxu0 }
 0x814   : > { %v9454_v18 = vpop.f32.mrb[47].mxu0 }
 0x815   : > { %v4882_v60 = vmax.f32 %v9452_v62, %v9454_v18  ;;  %4880 = vmax.xlane.f32.xlu1 %v4879_v37 }
 0x817   : > { %4883 = vmax.xlane.f32.xlu0 %v4882_v60 }
 0x819   : > { %v9458_v58 = vpop.f32.mrb[48].mxu0 }
 0x81a   : > { %v9460_v22 = vpop.f32.mrb[49].mxu0 }
 0x81b   : > { %v4885_v59 = vmax.f32 %v9458_v58, %v9460_v22  ;;  %v9464_v0 = vpop.f32.mrb[50].mxu0 }
 0x81c   : > { %v9466_v24 = vpop.f32.mrb[51].mxu0 }
 0x81d   : > { %v4888_v38 = vmax.f32 %v9464_v0, %v9466_v24  ;;  %4886 = vmax.xlane.f32.xlu1 %v4885_v59 }
 0x81f   : > { %4889 = vmax.xlane.f32.xlu0 %v4888_v38 }
 0x821   : > { %v9470_v27 = vpop.f32.mrb[52].mxu0 }
 0x822   : > { %10491 = vst [vmem:[#allocation36_spill] sm:$0xff] %v9470_v27  ;;  %v9472_v48 = vpop.f32.mrb[53].mxu0 }
 0x823   : > { %10492 = vst [vmem:[#allocation37_spill] sm:$0xff] %v9472_v48  ;;  %v4891_v54 = vmax.f32 %v9470_v27, %v9472_v48  ;;  %v9476_v56 = vpop.f32.mrb[54].mxu0 }
 0x824   : > { %v9478_v25 = vpop.f32.mrb[55].mxu0 }
 0x825   : > { %v4894_v55 = vmax.f32 %v9476_v56, %v9478_v25  ;;  %4892 = vmax.xlane.f32.xlu1 %v4891_v54 }
 0x827   : > { %4895 = vmax.xlane.f32.xlu0 %v4894_v55 }
 0x829   : > { %v9482_v17 = vpop.f32.mrb[56].mxu0 }
 0x82a   : > { %10493 = vst [vmem:[#allocation35_spill] sm:$0xff] %v9482_v17  ;;  %v9484_v13 = vpop.f32.mrb[57].mxu0 }
 0x82b   : > { %10494 = vst [vmem:[#allocation39_spill] sm:$0xff] %v9484_v13  ;;  %v4897_v52 = vmax.f32 %v9482_v17, %v9484_v13  ;;  %v9488_v4 = vpop.f32.mrb[58].mxu0 }
 0x82c   : > { %v9490_v6 = vpop.f32.mrb[59].mxu0 }
 0x82d   : > { %v4900_v33 = vmax.f32 %v9488_v4, %v9490_v6  ;;  %4898 = vmax.xlane.f32.xlu1 %v4897_v52 }
 0x82f   : > { %4901 = vmax.xlane.f32.xlu0 %v4900_v33 }
 0x831   : > { %v9494_v16 = vpop.f32.mrb[60].mxu0 }
 0x832   : > { %10495 = vst [vmem:[#allocation40_spill] sm:$0xff] %v9494_v16  ;;  %v9496_v30 = vpop.f32.mrb[61].mxu0 }
 0x833   : > { %10496 = vst [vmem:[#allocation8_spill] sm:$0xff] %v9496_v30  ;;  %v4903_v49 = vmax.f32 %v9494_v16, %v9496_v30  ;;  %v9500_v37 = vpop.f32.mrb[62].mxu0 }
 0x834   : > { %10497 = vst [vmem:[#allocation21_spill] sm:$0xff] %v9500_v37  ;;  %v9502_v60 = vpop.f32.mrb[63].mxu0 }
 0x835   : > { %10498 = vst [vmem:[#allocation20_spill] sm:$0xff] %v9502_v60  ;;  %v4906_v59 = vmax.f32 %v9500_v37, %v9502_v60  ;;  %4904 = vmax.xlane.f32.xlu1 %v4903_v49 }
 0x837   : > { %4907 = vmax.xlane.f32.xlu0 %v4906_v59 }
 0x839   : > { %v9506_v38 = vpop.f32.mrb[64].mxu0 }
 0x83a   : > { %10499 = vst [vmem:[#allocation7_spill] sm:$0xff] %v9506_v38  ;;  %v9508_v54 = vpop.f32.mrb[65].mxu0 }
 0x83b   : > { %10500 = vst [vmem:[#allocation19_spill] sm:$0xff] %v9508_v54  ;;  %v4909_v55 = vmax.f32 %v9506_v38, %v9508_v54  ;;  %v9512_v52 = vpop.f32.mrb[66].mxu0 }
 0x83c   : > { %10501 = vst [vmem:[#allocation25_spill] sm:$0xff] %v9512_v52  ;;  %v9514_v33 = vpop.f32.mrb[67].mxu0 }
 0x83d   : > { %10502 = vst [vmem:[#allocation18_spill] sm:$0xff] %v9514_v33  ;;  %v4912_v43 = vmax.f32 %v9512_v52, %v9514_v33  ;;  %4910 = vmax.xlane.f32.xlu1 %v4909_v55 }
 0x83f   : > { %4913 = vmax.xlane.f32.xlu0 %v4912_v43 }
 0x841   : > { %v9518_v11 = vpop.f32.mrb[68].mxu0 }
 0x842   : > { %10503 = vst [vmem:[#allocation24_spill] sm:$0xff] %v9518_v11  ;;  %v9520_v49 = vpop.f32.mrb[69].mxu0 }
 0x843   : > { %10504 = vst [vmem:[#allocation23_spill] sm:$0xff] %v9520_v49  ;;  %v4915_v59 = vmax.f32 %v9518_v11, %v9520_v49  ;;  %v9524_v29 = vpop.f32.mrb[70].mxu0 }
 0x844   : > { %v9526_v44 = vpop.f32.mrb[71].mxu0 }
 0x845   : > { %4916 = vmax.xlane.f32.xlu1 %v4915_v59 }
 0x849   : > { %v9530_v28 = vpop.f32.mrb[72].mxu0 }
 0x84a   : > { %10505 = vst [vmem:[#allocation22_spill] sm:$0xff] %v9530_v28  ;;  %v9532_v63 = vpop.f32.mrb[73].mxu0 }
 0x84b   : > { %10506 = vst [vmem:[#allocation28_spill] sm:$0xff] %v9532_v63  ;;  %v4921_v43 = vmax.f32 %v9530_v28, %v9532_v63  ;;  %v9536_v55 = vpop.f32.mrb[74].mxu0  ;;  %v9557_v28 = vld [vmem:[%s10284_s6 + $0x48] sm:$0xff]  }
 0x84c   : > { %v9538_v54 = vpop.f32.mrb[75].mxu0  ;;  %10507 = vst [vmem:[#allocation30_spill] sm:$0xff] %v9557_v28  ;;  %6598 = vmatmul.mubr.msk.bf16.gmra.mrb[76].mxu1 %vm4119_vm13, %v9557_v28 }
 0x84d   : > { %4295 = vmatprep.mubr.bf16.mxu1 %v10449_v32 }
 0x851   : > { %v9542_v11 = vpop.f32.mrb[76].mxu0 }
 0x852   : > { %v9544_v59 = vpop.f32.mrb[77].mxu0 }
 0x853   : > { %v9548_v38 = vpop.f32.mrb[78].mxu0 }
 0x854   : > { %v9550_v33 = vpop.f32.mrb[79].mxu0 }
 0x86a   : > { %v4839_v49 = vpop.xlane.xlu0 %4838 }
 0x86b   : > { %v4933_v39 = vsub.f32 %v9362_v45, %v4839_v49  ;;  %v4934_v52 = vsub.f32 %v9364_v47, %v4839_v49 }
 0x86c   : > { %v4842_v30 = vpop.xlane.xlu1 %4841 }
 0x86d   : > { %v4997_v16 = vmul.f32 1.442695, %v4933_v39  ;;  %v4999_v13 = vmul.f32 1.442695, %v4934_v52  ;;  %v4935_v63 = vsub.f32 %v9368_v9, %v4842_v30  ;;  %v4936_v60 = vsub.f32 %v9370_v1, %v4842_v30 }
 0x86f   : > { %6991 = vpow2.f32 %v4997_v16  ;;  %v5001_v37 = vmul.f32 1.442695, %v4935_v63  ;;  %v5003_v17 = vmul.f32 1.442695, %v4936_v60 }
 0x870   : > { %6993 = vpow2.f32 %v4999_v13 }
 0x871   : > { %6995 = vpow2.f32 %v5001_v37 }
 0x872   : > { %6997 = vpow2.f32 %v5003_v17  ;;  %v4845_v28 = vpop.xlane.xlu0 %4844 }
 0x873   : > { %v4937_v48 = vsub.f32 %v9374_v15, %v4845_v28  ;;  %v4938_v45 = vsub.f32 %v9376_v35, %v4845_v28 }
 0x875   : > { %v5005_v27 = vmul.f32 1.442695, %v4937_v48  ;;  %v5007_v47 = vmul.f32 1.442695, %v4938_v45 }
 0x876   : > { %v4848_v49 = vpop.xlane.xlu0 %4847 }
 0x877   : > { %6999 = vpow2.f32 %v5005_v27  ;;  %v4939_v39 = vsub.f32 %v9380_v21, %v4848_v49  ;;  %v4940_v9 = vsub.f32 %v9382_v3, %v4848_v49 }
 0x878   : > { %7001 = vpow2.f32 %v5007_v47 }
 0x879   : > { %v9570_v1 = vpop.eup %6991  ;;  %v5009_v63 = vmul.f32 1.442695, %v4939_v39  ;;  %v5011_v13 = vmul.f32 1.442695, %v4940_v9 }
 0x87a   : > { %v9572_v16 = vpop.eup %6993  ;;  %v4851_v17 = vpop.xlane.xlu1 %4850 }
 0x87b   : > { %v9574_v30 = vpop.eup %6995  ;;  %7003 = vpow2.f32 %v5009_v63  ;;  %v4941_v28 = vsub.f32 %v9386_v23, %v4851_v17  ;;  %v4942_v15 = vsub.f32 %v9388_v10, %v4851_v17  ;;  %v5125_v35 = vadd.f32 %v9572_v16, %v9570_v1 }
 0x87c   : > { %v9580_v21 = vpop.eup %6997  ;;  %7005 = vpow2.f32 %v5011_v13  ;;  %v4854_v3 = vpop.xlane.xlu0 %4853 }
 0x87d   : > { %v5013_v27 = vmul.f32 1.442695, %v4941_v28  ;;  %v5015_v48 = vmul.f32 1.442695, %v4942_v15  ;;  %5126 = vadd.xlane.f32.xlu1 %v5125_v35  ;;  %v4943_v37 = vsub.f32 %v9392_v51, %v4854_v3  ;;  %v4944_v60 = vsub.f32 %v9394_v2, %v4854_v3 }
 0x87e   : > { %v5128_v52 = vadd.f32 %v9580_v21, %v9574_v30  ;;  %v10508_v2 = vmax.f32 %v9524_v29, %v9526_v44  ;;  %v10509_v35 = vmax.f32 %v9542_v11, %v9544_v59 }
 0x87f   : > { %7007 = vpow2.f32 %v5013_v27  ;;  %v5017_v23 = vmul.f32 1.442695, %v4943_v37  ;;  %v5019_v10 = vmul.f32 1.442695, %v4944_v60  ;;  %v10510_v37 = vmax.f32 %v9536_v55, %v9538_v54 }
 0x880   : > { %7009 = vpow2.f32 %v5015_v48  ;;  %5129 = vadd.xlane.f32.xlu0 %v5128_v52 }
 0x881   : > { %v9586_v45 = vpop.eup %6999  ;;  %7011 = vpow2.f32 %v5017_v23  ;;  %4922 = vmax.xlane.f32.xlu1 %v4921_v43 }
 0x882   : > { %v9588_v47 = vpop.eup %7001  ;;  %7013 = vpow2.f32 %v5019_v10 }
 0x883   : > { %v5131_v51 = vadd.f32 %v9588_v47, %v9586_v45 }
 0x884   : > { %4919 = vmax.xlane.f32.xlu0 %v10508_v2  ;;  %v4860_v49 = vpop.xlane.xlu0 %4859 }
 0x885   : > { %v9595_v39 = vpop.eup %7003  ;;  %5132 = vadd.xlane.f32.xlu1 %v5131_v51  ;;  %v4947_v9 = vsub.f32 %v9404_v5, %v4860_v49  ;;  %v4948_v63 = vsub.f32 %v9406_v34, %v4860_v49 }
 0x886   : > { %v9599_v13 = vpop.eup %7005 }
 0x887   : > { %v5025_v43 = vmul.f32 1.442695, %v4947_v9  ;;  %v5027_v17 = vmul.f32 1.442695, %v4948_v63  ;;  %v5134_v28 = vadd.f32 %v9599_v13, %v9595_v39  ;;  %v10511_v63 = vmax.f32 %v9548_v38, %v9550_v33 }
 0x889   : > { %v9603_v15 = vpop.eup %7007  ;;  %7015 = vpow2.f32 %v5025_v43  ;;  %4928 = vmax.xlane.f32.xlu1 %v10509_v35  ;;  %5135 = vadd.xlane.f32.xlu0 %v5134_v28  ;;  %v3875_v43 = vunpack.c.l.bf16 %v9357_v8 }
 0x88a   : > { %v9608_v3 = vpop.eup %7009  ;;  %7017 = vpow2.f32 %v5027_v17  ;;  %v3876_v17 = vunpack.c.h.bf16 %v9357_v8 }
 0x88b   : > { %v9610_v5 = vpop.eup %7011  ;;  %v5137_v34 = vadd.f32 %v9608_v3, %v9603_v15 }
 0x88c   : > { %v9614_v27 = vpop.eup %7013  ;;  %v4866_v48 = vpop.xlane.xlu0 %4865 }
 0x88d   : > { %5138 = vadd.xlane.f32.xlu1 %v5137_v34  ;;  %4925 = vmax.xlane.f32.xlu0 %v10510_v37  ;;  %v4951_v60 = vsub.f32 %v9416_v41, %v4866_v48  ;;  %v4952_v52 = vsub.f32 %v9418_v7, %v4866_v48  ;;  %v5140_v51 = vadd.f32 %v9614_v27, %v9610_v5 }
 0x88e   : > { %v6887_v48 = vpack.i.bf16 %v3876_v17, %v3875_v43 }
 0x88f   : > { %v5033_v23 = vmul.f32 1.442695, %v4951_v60  ;;  %v5035_v10 = vmul.f32 1.442695, %v4952_v52 }
 0x891   : > { %7019 = vpow2.f32 %v5033_v23  ;;  %5141 = vadd.xlane.f32.xlu0 %v5140_v51  ;;  %v9644_v51 = vpop.f32.mrb[72].mxu1 }
 0x892   : > { %7021 = vpow2.f32 %v5035_v10 }
 0x893   : > { %v9623_v2 = vpop.eup %7015 }
 0x894   : > { %v9625_v49 = vpop.eup %7017  ;;  %v4872_v9 = vpop.xlane.xlu0 %4871 }
 0x895   : > { %4931 = vmax.xlane.f32.xlu0 %v10511_v63  ;;  %v4955_v41 = vsub.f32 %v9428_v46, %v4872_v9  ;;  %v4956_v7 = vsub.f32 %v9430_v19, %v4872_v9  ;;  %v5146_v34 = vadd.f32 %v9625_v49, %v9623_v2  ;;  %v9649_v63 = vpop.f32.mrb[73].mxu1 }
 0x897   : > { %v5041_v28 = vmul.f32 1.442695, %v4955_v41  ;;  %v5043_v35 = vmul.f32 1.442695, %v4956_v7  ;;  %v9653_v41 = vpop.f32.mrb[74].mxu1  ;;  %v4857_v7 = vpop.xlane.xlu1 %4856 }
 0x899   : > { %7023 = vpow2.f32 %v5041_v28  ;;  %5147 = vadd.xlane.f32.xlu0 %v5146_v34  ;;  %v9657_v28 = vpop.f32.mrb[75].mxu1 }
 0x89a   : > { %7025 = vpow2.f32 %v5043_v35 }
 0x89b   : > { %v9636_v37 = vpop.eup %7019 }
 0x89c   : > { %v9638_v60 = vpop.eup %7021  ;;  %v4878_v46 = vpop.xlane.xlu0 %4877 }
 0x89d   : > { %v4959_v19 = vsub.f32 %v9440_v14, %v4878_v46  ;;  %v4960_v52 = vsub.f32 %v9442_v61, %v4878_v46  ;;  %v5152_v8 = vadd.f32 %v9638_v60, %v9636_v37  ;;  %v4945_v46 = vsub.f32 %v9398_v42, %v4857_v7 }
 0x89e   : > { %6888 = vperm.xlu1 %6886, %v6887_v48  }
 0x89f   : > { %v5049_v23 = vmul.f32 1.442695, %v4959_v19  ;;  %v5051_v10 = vmul.f32 1.442695, %v4960_v52  ;;  %5153 = vadd.xlane.f32.xlu0 %v5152_v8  ;;  %v9665_v19 = vld [vmem:[%s10284_s6 + $0x50] sm:$0xff]   ;;  %v4863_v52 = vpop.xlane.xlu1 %4862 }
 0x8a0   : > { %10512 = vst [vmem:[#allocation26_spill] sm:$0xff] %v9665_v19  ;;  %6599 = vmatmul.mubr.msk.bf16.gmra.mrb[80].mxu1 %vm4119_vm13, %v9665_v19 }
 0x8a1   : > { %7027 = vpow2.f32 %v5049_v23  ;;  %v5021_v23 = vmul.f32 1.442695, %v4945_v46  ;;  %4305 = vmatprep.mubr.bf16.mxu1 %v10449_v32 }
 0x8a2   : > { %7029 = vpow2.f32 %v5051_v10  ;;  %6892 = vset.pattern.permute.xlu1 %v10449_v32 }
 0x8a3   : > { %v9647_v9 = vpop.eup %7023  ;;  %v4869_v10 = vpop.xlane.xlu1 %4868 }
 0x8a4   : > { %v9651_v14 = vpop.eup %7025  ;;  %v4884_v61 = vpop.xlane.xlu0 %4883  ;;  %v4954_v19 = vsub.f32 %v9424_v53, %v4869_v10 }
 0x8a5   : > { %v4963_v43 = vsub.f32 %v9452_v62, %v4884_v61  ;;  %v4964_v17 = vsub.f32 %v9454_v18, %v4884_v61  ;;  %v5158_v35 = vadd.f32 %v9651_v14, %v9647_v9  ;;  %v4946_v62 = vsub.f32 %v9400_v31, %v4857_v7 }
 0x8a6   : > { %v4949_v31 = vsub.f32 %v9410_v20, %v4863_v52 }
 0x8a7   : > { %v5057_v34 = vmul.f32 1.442695, %v4963_v43  ;;  %v5059_v48 = vmul.f32 1.442695, %v4964_v17  ;;  %5159 = vadd.xlane.f32.xlu0 %v5158_v35  ;;  %v5023_v17 = vmul.f32 1.442695, %v4946_v62 }
 0x8a8   : > { %v9683_v35 = vld [vmem:[%s10284_s6 + $0x58] sm:$0xff]   ;;  %v5029_v62 = vmul.f32 1.442695, %v4949_v31 }
 0x8a9   : > { %7031 = vpow2.f32 %v5057_v34  ;;  %10514 = vst [vmem:[#allocation29_spill] sm:$0xff] %v9683_v35  ;;  %v4950_v34 = vsub.f32 %v9412_v57, %v4863_v52  ;;  %6600 = vmatmul.mubr.msk.bf16.gmra.mrb[84].mxu1 %vm4119_vm13, %v9683_v35 }
 0x8aa   : > { %7033 = vpow2.f32 %v5059_v48 }
 0x8ab   : > { %v9668_v18 = vpop.eup %7027  ;;  %7035 = vpow2.f32 %v5021_v23 }
 0x8ac   : > { %10513 = vst [vmem:[#allocation27_spill] sm:$0xff] %v9668_v18  ;;  %v9672_v8 = vpop.eup %7029  ;;  %v4890_v42 = vpop.xlane.xlu0 %4889 }
 0x8ad   : > { %v4967_v61 = vsub.f32 %v9464_v0, %v4890_v42  ;;  %v4968_v43 = vsub.f32 %v9466_v24, %v4890_v42  ;;  %v5164_v7 = vadd.f32 %v9672_v8, %v9668_v18  ;;  %v4953_v0 = vsub.f32 %v9422_v36, %v4869_v10  ;;  %v4875_v24 = vpop.xlane.xlu1 %4874 }
 0x8ae   : > { %v5031_v42 = vmul.f32 1.442695, %v4950_v34  ;;  %v4957_v36 = vsub.f32 %v9434_v12, %v4875_v24  ;;  %v5039_v10 = vmul.f32 1.442695, %v4954_v19 }
 0x8af   : > { %v5065_v48 = vmul.f32 1.442695, %v4967_v61  ;;  %v5067_v46 = vmul.f32 1.442695, %v4968_v43  ;;  %5165 = vadd.xlane.f32.xlu0 %v5164_v7  ;;  %v5037_v52 = vmul.f32 1.442695, %v4953_v0 }
 0x8b0   : > { %v5045_v12 = vmul.f32 1.442695, %v4957_v36 }
 0x8b1   : > { %7037 = vpow2.f32 %v5065_v48  ;;  %v4881_v61 = vpop.xlane.xlu1 %4880 }
 0x8b2   : > { %7039 = vpow2.f32 %v5067_v46  ;;  %v4961_v48 = vsub.f32 %v9446_v40, %v4881_v61 }
 0x8b3   : > { %v9687_v20 = vpop.eup %7031  ;;  %7041 = vpow2.f32 %v5023_v17  ;;  %v4958_v17 = vsub.f32 %v9436_v26, %v4875_v24  ;;  %v4962_v26 = vsub.f32 %v9448_v50, %v4881_v61 }
 0x8b4   : > { %10515 = vst [vmem:[#allocation10_spill] sm:$0xff] %v9687_v20  ;;  %v9692_v57 = vpop.eup %7033  ;;  %v4896_v23 = vpop.xlane.xlu0 %4895  ;;  %7043 = vpow2.f32 %v5029_v62  ;;  %v5053_v19 = vmul.f32 1.442695, %v4961_v48 }
 0x8b5   : > { %10516 = vst [vmem:[#allocation33_spill] sm:$0xff] %v9692_v57  ;;  %v4971_v43 = vsub.f32 %v9476_v56, %v4896_v23  ;;  %v4972_v31 = vsub.f32 %v9478_v25, %v4896_v23  ;;  %v5170_v53 = vadd.f32 %v9692_v57, %v9687_v20  ;;  %7045 = vpow2.f32 %v5031_v42  ;;  %v4887_v46 = vpop.xlane.xlu1 %4886  ;;  %v9701_v56 = vpop.eup %7035 }
 0x8b6   : > { %7047 = vpow2.f32 %v5037_v52  ;;  %v5047_v25 = vmul.f32 1.442695, %v4958_v17  ;;  %v4965_v36 = vsub.f32 %v9458_v58, %v4887_v46  ;;  %v4966_v50 = vsub.f32 %v9460_v22, %v4887_v46  ;;  %v10521_v46 = vld [vmem:[#allocation37_spill] sm:$0xff] }
 0x8b7   : > { %v5073_v7 = vmul.f32 1.442695, %v4971_v43  ;;  %v5075_v34 = vmul.f32 1.442695, %v4972_v31  ;;  %5171 = vadd.xlane.f32.xlu0 %v5170_v53  ;;  %v5055_v31 = vmul.f32 1.442695, %v4962_v26 }
 0x8b8   : > { %v5061_v48 = vmul.f32 1.442695, %v4965_v36 }
 0x8b9   : > { %7049 = vpow2.f32 %v5073_v7  ;;  %v4893_v40 = vpop.xlane.xlu1 %4892 }
 0x8ba   : > { %7051 = vpow2.f32 %v5075_v34 }
 0x8bb   : > { %v9703_v0 = vpop.eup %7037  ;;  %7053 = vpow2.f32 %v5039_v10  ;;  %v10519_v10 = vld [vmem:[#allocation36_spill] sm:$0xff] }
 0x8bc   : > { %10517 = vst [vmem:[#allocation11_spill] sm:$0xff] %v9703_v0  ;;  %v9706_v24 = vpop.eup %7039  ;;  %v4902_v62 = vpop.xlane.xlu0 %4901  ;;  %7055 = vpow2.f32 %v5045_v12  ;;  %v4969_v7 = vsub.f32 %v10519_v10, %v4893_v40  ;;  %v5063_v12 = vmul.f32 1.442695, %v4966_v50 }
 0x8bd   : > { %10518 = vst [vmem:[#allocation32_spill] sm:$0xff] %v9706_v24  ;;  %v9708_v42 = vpop.eup %7041  ;;  %v4975_v52 = vsub.f32 %v9488_v4, %v4902_v62  ;;  %v4976_v23 = vsub.f32 %v9490_v6, %v4902_v62  ;;  %7057 = vpow2.f32 %v5047_v25  ;;  %v5176_v43 = vadd.f32 %v9706_v24, %v9703_v0  ;;  %v4899_v58 = vpop.xlane.xlu1 %4898 }
 0x8be   : > { %v9716_v53 = vpop.eup %7043  ;;  %7059 = vpow2.f32 %v5053_v19  ;;  %v5143_v4 = vadd.f32 %v9708_v42, %v9701_v56  ;;  %v4970_v25 = vsub.f32 %v10521_v46, %v4893_v40  ;;  %v5069_v19 = vmul.f32 1.442695, %v4969_v7 }
 0x8bf   : > { %v5081_v61 = vmul.f32 1.442695, %v4975_v52  ;;  %v5083_v17 = vmul.f32 1.442695, %v4976_v23  ;;  %5177 = vadd.xlane.f32.xlu0 %v5176_v43  ;;  %v9721_v6 = vpop.eup %7045  ;;  %v10523_v43 = vld [vmem:[#allocation35_spill] sm:$0xff] }
 0x8c0   : > { %v9723_v34 = vpop.eup %7047  ;;  %v5149_v52 = vadd.f32 %v9721_v6, %v9716_v53  ;;  %v5071_v46 = vmul.f32 1.442695, %v4970_v25 }
 0x8c1   : > { %7061 = vpow2.f32 %v5081_v61  ;;  %v4973_v61 = vsub.f32 %v10523_v43, %v4899_v58  ;;  %v10527_v43 = vld [vmem:[#allocation40_spill] sm:$0xff] }
 0x8c2   : > { %7063 = vpow2.f32 %v5083_v17  ;;  %5144 = vadd.xlane.f32.xlu1 %v5143_v4  ;;  %v4905_v36 = vpop.xlane.xlu1 %4904  ;;  %v10524_v17 = vld [vmem:[#allocation21_spill] sm:$0xff]  ;;  %v10525_v4 = vld [vmem:[#allocation20_spill] sm:$0xff] }
 0x8c3   : > { %v9725_v22 = vpop.eup %7049  ;;  %7065 = vpow2.f32 %v5055_v31  ;;  %v10526_v31 = vld [vmem:[#allocation39_spill] sm:$0xff] }
 0x8c4   : > { %10520 = vst [vmem:[#allocation12_spill] sm:$0xff] %v9725_v22  ;;  %v9728_v26 = vpop.eup %7051  ;;  %v4908_v62 = vpop.xlane.xlu0 %4907  ;;  %7067 = vpow2.f32 %v5061_v48  ;;  %v4974_v50 = vsub.f32 %v10526_v31, %v4899_v58  ;;  %v5077_v58 = vmul.f32 1.442695, %v4973_v61 }
 0x8c5   : > { %10522 = vst [vmem:[#allocation13_spill] sm:$0xff] %v9728_v26  ;;  %v9732_v23 = vpop.eup %7053  ;;  %v4979_v10 = vsub.f32 %v10524_v17, %v4908_v62  ;;  %v4980_v0 = vsub.f32 %v10525_v4, %v4908_v62  ;;  %v5182_v40 = vadd.f32 %v9728_v26, %v9725_v22  ;;  %7069 = vpow2.f32 %v5063_v12 }
 0x8c6   : > { %5150 = vadd.xlane.f32.xlu1 %v5149_v52  ;;  %v9740_v7 = vpop.eup %7055  ;;  %7071 = vpow2.f32 %v5069_v19  ;;  %v4977_v17 = vsub.f32 %v10527_v43, %v4905_v36  ;;  %v5155_v48 = vadd.f32 %v9732_v23, %v9723_v34  ;;  %v5079_v52 = vmul.f32 1.442695, %v4974_v50 }
 0x8c7   : > { %v5089_v24 = vmul.f32 1.442695, %v4979_v10  ;;  %v5091_v20 = vmul.f32 1.442695, %v4980_v0  ;;  %v9742_v35 = vpop.eup %7057  ;;  %5183 = vadd.xlane.f32.xlu0 %v5182_v40  ;;  %v10529_v0 = vld [vmem:[#allocation8_spill] sm:$0xff] }
 0x8c8   : > { %v9747_v62 = vpop.eup %7059  ;;  %v4978_v25 = vsub.f32 %v10529_v0, %v4905_v36  ;;  %v5085_v4 = vmul.f32 1.442695, %v4977_v17  ;;  %v5161_v40 = vadd.f32 %v9742_v35, %v9740_v7  ;;  %v10533_v17 = vld [vmem:[#allocation19_spill] sm:$0xff] }
 0x8c9   : > { %7073 = vpow2.f32 %v5089_v24  ;;  %v10530_v24 = vld [vmem:[#allocation25_spill] sm:$0xff] }
 0x8ca   : > { %7075 = vpow2.f32 %v5091_v20  ;;  %5156 = vadd.xlane.f32.xlu1 %v5155_v48  ;;  %v4911_v10 = vpop.xlane.xlu1 %4910  ;;  %v10531_v20 = vld [vmem:[#allocation18_spill] sm:$0xff]  ;;  %v10532_v48 = vld [vmem:[#allocation7_spill] sm:$0xff]  ;;  %v5087_v0 = vmul.f32 1.442695, %v4978_v25 }
 0x8cb   : > { %v9749_v12 = vpop.eup %7061  ;;  %7077 = vpow2.f32 %v5071_v46  ;;  %v4981_v46 = vsub.f32 %v10532_v48, %v4911_v10  ;;  %v4982_v22 = vsub.f32 %v10533_v17, %v4911_v10 }
 0x8cc   : > { %10528 = vst [vmem:[#allocation14_spill] sm:$0xff] %v9749_v12  ;;  %v9752_v19 = vpop.eup %7063  ;;  %v4914_v31 = vpop.xlane.xlu0 %4913  ;;  %7079 = vpow2.f32 %v5077_v58 }
 0x8cd   : > { %v9756_v61 = vpop.eup %7065  ;;  %v4983_v50 = vsub.f32 %v10530_v24, %v4914_v31  ;;  %v4984_v43 = vsub.f32 %v10531_v20, %v4914_v31  ;;  %7081 = vpow2.f32 %v5079_v52  ;;  %v5188_v36 = vadd.f32 %v9752_v19, %v9749_v12 }
 0x8ce   : > { %5162 = vadd.xlane.f32.xlu1 %v5161_v40  ;;  %v9764_v18 = vpop.eup %7067  ;;  %7083 = vpow2.f32 %v5085_v4  ;;  %v5167_v58 = vadd.f32 %v9756_v61, %v9747_v62  ;;  %v5093_v40 = vmul.f32 1.442695, %v4981_v46  ;;  %v5095_v10 = vmul.f32 1.442695, %v4982_v22  ;;  %v10536_v4 = vld [vmem:[#allocation23_spill] sm:$0xff] }
 0x8cf   : > { %v5097_v26 = vmul.f32 1.442695, %v4983_v50  ;;  %v5099_v57 = vmul.f32 1.442695, %v4984_v43  ;;  %5189 = vadd.xlane.f32.xlu0 %v5188_v36  ;;  %v9768_v31 = vpop.eup %7069  ;;  %v10535_v50 = vld [vmem:[#allocation24_spill] sm:$0xff] }
 0x8d0   : > { %v9770_v52 = vpop.eup %7071  ;;  %v5173_v36 = vadd.f32 %v9768_v31, %v9764_v18 }
 0x8d1   : > { %7085 = vpow2.f32 %v5097_v26 }
 0x8d2   : > { %7087 = vpow2.f32 %v5099_v57  ;;  %5168 = vadd.xlane.f32.xlu1 %v5167_v58  ;;  %v4917_v25 = vpop.xlane.xlu1 %4916 }
 0x8d3   : > { %v9772_v24 = vpop.eup %7073  ;;  %7089 = vpow2.f32 %v5087_v0  ;;  %v4985_v20 = vsub.f32 %v10535_v50, %v4917_v25  ;;  %v4986_v43 = vsub.f32 %v10536_v4, %v4917_v25 }
 0x8d4   : > { %10534 = vst [vmem:[#allocation15_spill] sm:$0xff] %v9772_v24  ;;  %v9776_v48 = vpop.eup %7075  ;;  %7091 = vpow2.f32 %v5093_v40 }
 0x8d5   : > { %10537 = vst [vmem:[#allocation16_spill] sm:$0xff] %v9776_v48  ;;  %v9780_v26 = vpop.eup %7077  ;;  %v5194_v57 = vadd.f32 %v9776_v48, %v9772_v24  ;;  %v5101_v46 = vmul.f32 1.442695, %v4985_v20  ;;  %7093 = vpow2.f32 %v5095_v10  ;;  %v5103_v22 = vmul.f32 1.442695, %v4986_v43  ;;  %v10546_v24 = vld [vmem:[#allocation22_spill] sm:$0xff] }
 0x8d6   : > { %5174 = vadd.xlane.f32.xlu1 %v5173_v36  ;;  %v9784_v17 = vpop.eup %7079  ;;  %v5179_v58 = vadd.f32 %v9780_v26, %v9770_v52 }
 0x8d7   : > { %10538 = vst [vmem:[#allocation17_spill] sm:$0xff] %v9784_v17  ;;  %5195 = vadd.xlane.f32.xlu0 %v5194_v57  ;;  %v9786_v0 = vpop.eup %7081  ;;  %7095 = vpow2.f32 %v5101_v46 }
 0x8d8   : > { %v9790_v25 = vpop.eup %7083  ;;  %7097 = vpow2.f32 %v5103_v22  ;;  %v5185_v20 = vadd.f32 %v9786_v0, %v9784_v17 }
 0x8d9   : > { %10539 = vst [vmem:[#allocation3_spill] sm:$0xff] %v9790_v25 }
 0x8da   : > { %5180 = vadd.xlane.f32.xlu1 %v5179_v58 }
 0x8db   : > { %v9792_v50 = vpop.eup %7085 }
 0x8dc   : > { %10540 = vst [vmem:[#allocation36_spill] sm:$0xff] %v9792_v50  ;;  %v9794_v40 = vpop.eup %7087 }
 0x8dd   : > { %10541 = vst [vmem:[#allocation37_spill] sm:$0xff] %v9794_v40  ;;  %v9798_v10 = vpop.eup %7089  ;;  %v5200_v4 = vadd.f32 %v9794_v40, %v9792_v50 }
 0x8de   : > { %10542 = vst [vmem:[#allocation35_spill] sm:$0xff] %v9798_v10  ;;  %5186 = vadd.xlane.f32.xlu1 %v5185_v20  ;;  %v9802_v43 = vpop.eup %7091  ;;  %v5191_v36 = vadd.f32 %v9798_v10, %v9790_v25 }
 0x8df   : > { %5201 = vadd.xlane.f32.xlu0 %v5200_v4  ;;  %10543 = vst [vmem:[#allocation21_spill] sm:$0xff] %v9802_v43  ;;  %v9806_v57 = vpop.eup %7093 }
 0x8e0   : > { %10544 = vst [vmem:[#allocation20_spill] sm:$0xff] %v9806_v57  ;;  %v5197_v22 = vadd.f32 %v9806_v57, %v9802_v43 }
 0x8e1   : > { %v9808_v46 = vpop.eup %7095 }
 0x8e2   : > { %5192 = vadd.xlane.f32.xlu1 %v5191_v36  ;;  %10545 = vst [vmem:[#allocation39_spill] sm:$0xff] %v9808_v46  ;;  %v9812_v58 = vpop.eup %7097  ;;  %v10547_v36 = vld [vmem:[#allocation28_spill] sm:$0xff] }
 0x8e3   : > { %v5203_v20 = vadd.f32 %v9812_v58, %v9808_v46 }
 0x8e6   : > { %5198 = vadd.xlane.f32.xlu1 %v5197_v22 }
 0x8ea   : > { %5204 = vadd.xlane.f32.xlu1 %v5203_v20 }
 0x90a   : > { %v5127_v4 = vpop.xlane.xlu1 %5126 }
 0x90b   : > { %7099 = vrcp.f32 %v5127_v4 }
 0x90d   : > { %v5130_v50 = vpop.xlane.xlu0 %5129 }
 0x90e   : > { %7101 = vrcp.f32 %v5130_v50  ;;  %v4923_v40 = vpop.xlane.xlu1 %4922 }
 0x90f   : > { %v4989_v25 = vsub.f32 %v10546_v24, %v4923_v40  ;;  %v4990_v48 = vsub.f32 %v10547_v36, %v4923_v40 }
 0x911   : > { %v5109_v12 = vmul.f32 1.442695, %v4989_v25  ;;  %v5111_v10 = vmul.f32 1.442695, %v4990_v48  ;;  %v4920_v17 = vpop.xlane.xlu0 %4919 }
 0x912   : > { %v4987_v43 = vsub.f32 %v9524_v29, %v4920_v17  ;;  %v4988_v22 = vsub.f32 %v9526_v44, %v4920_v17  ;;  %v5133_v57 = vpop.xlane.xlu1 %5132 }
 0x913   : > { %7103 = vpow2.f32 %v5109_v12 }
 0x914   : > { %7105 = vpow2.f32 %v5111_v10  ;;  %v5105_v20 = vmul.f32 1.442695, %v4987_v43  ;;  %v5107_v46 = vmul.f32 1.442695, %v4988_v22 }
 0x915   : > { %7107 = vrcp.f32 %v5133_v57  ;;  %v7100_v4 = vpop.eup %7099 }
 0x916   : > { %7109 = vpow2.f32 %v5105_v20  ;;  %v9820_v50 = vpop.xlane.xlu1 %4928  ;;  %v5136_v24 = vpop.xlane.xlu0 %5135  ;;  %v5254_v48 = vmul.f32 %v7100_v4, %v9572_v16  ;;  %v5253_v25 = vmul.f32 %v7100_v4, %v9570_v1 }
 0x917   : > { %7111 = vpow2.f32 %v5107_v46 }
 0x918   : > { %v7102_v40 = vpop.eup %7101  ;;  %7113 = vrcp.f32 %v5136_v24 }
 0x919   : > { %v5256_v29 = vmul.f32 %v7102_v40, %v9580_v21  ;;  %v5255_v44 = vmul.f32 %v7102_v40, %v9574_v30 }
 0x91a   : > { %v5139_v17 = vpop.xlane.xlu1 %5138  ;;  %v4926_v12 = vpop.xlane.xlu0 %4925 }
 0x91b   : > { %v4991_v10 = vsub.f32 %v9536_v55, %v4926_v12  ;;  %v4992_v43 = vsub.f32 %v9538_v54, %v4926_v12  ;;  %v5326_v57 = vpack.c.bf16 %v5256_v29, %v5254_v48  ;;  %v5325_v36 = vpack.c.bf16 %v5255_v44, %v5253_v25  ;;  %v10548_v48 = vld [vmem:[#allocation31_spill] sm:$0xff]  ;;  %v10549_v44 = vld [vmem:[#allocation38_spill] sm:$0xff] }
 0x91c   : > { %7115 = vrcp.f32 %v5139_v17 }
 0x91d   : > { %v9828_v22 = vpop.eup %7103  ;;  %v5113_v46 = vmul.f32 1.442695, %v4991_v10  ;;  %v5115_v20 = vmul.f32 1.442695, %v4992_v43  ;;  %5357 = vmatprep.subr.bf16.mxu1 %v5326_v57 }
 0x91e   : > { %v9830_v16 = vpop.eup %7105  ;;  %5358 = vmatpush1.bf16.xpose.msra.mxu1 %v5325_v36  ;;  %v6889_v30 = vpop.permute.xlu1 %6888 }
 0x91f   : > { %v5142_v21 = vpop.xlane.xlu0 %5141  ;;  %v7108_v24 = vpop.eup %7107  ;;  %7117 = vpow2.f32 %v5113_v46  ;;  %v6891_v1 = vunpack.i.h.bf16 %v6889_v30  ;;  %v6890_v4 = vunpack.i.l.bf16 %v6889_v30  ;;  %v5209_v54 = vadd.f32 %v9830_v16, %v9828_v22 }
 0x920   : > { %v9834_v55 = vpop.eup %7109  ;;  %7119 = vpow2.f32 %v5115_v20  ;;  %v5258_v20 = vmul.f32 %v7108_v24, %v9588_v47 }
 0x921   : > { %v9836_v40 = vpop.eup %7111  ;;  %7121 = vrcp.f32 %v5142_v21  ;;  %v4043_v29 = vmul.f32 %v6890_v4, %v10548_v48  ;;  %v4044_v17 = vmul.f32 %v6890_v4, %v10549_v44  ;;  %5210 = vadd.xlane.f32.xlu1 %v5209_v54  ;;  %v4045_v12 = vmul.f32 %v6891_v1, %v10548_v48 }
 0x922   : > { %v7114_v25 = vpop.eup %7113  ;;  %v4046_v10 = vmul.f32 %v6891_v1, %v10549_v44  ;;  %v5206_v43 = vadd.f32 %v9836_v40, %v9834_v55  ;;  %v5257_v1 = vmul.f32 %v7108_v24, %v9586_v45 }
 0x923   : > { %v9845_v57 = vadd.f32 %v9644_v51, %v4043_v29  ;;  %v9848_v36 = vadd.f32 %v9649_v63, %v4044_v17  ;;  %v9851_v46 = vadd.f32 %v9653_v41, %v4045_v12  ;;  %v5260_v21 = vmul.f32 %v7114_v25, %v9599_v13 }
 0x924   : > { %v9855_v30 = vadd.f32 %v9657_v28, %v4046_v10  ;;  %5207 = vadd.xlane.f32.xlu0 %v5206_v43  ;;  %v5259_v4 = vmul.f32 %v7114_v25, %v9595_v39  ;;  %v4333_v25 = vld [vmem:[%s10290_s12 + $0x88] sm:$0xff]  ;;  %v10550_v10 = vld [vmem:[#allocation30_spill] sm:$0xff] }
 0x925   : > { %v5328_v51 = vpack.c.bf16 %v5260_v21, %v5258_v20  ;;  %v3877_v43 = vunpack.c.l.bf16 %v10550_v10  ;;  %v3878_v20 = vunpack.c.h.bf16 %v10550_v10 }
 0x926   : > { %v5327_v54 = vpack.c.bf16 %v5259_v4, %v5257_v1  ;;  %v7116_v29 = vpop.eup %7115  ;;  %v4332_v4 = vld [vmem:[%s10290_s12 + $0x80] sm:$0xff] }
 0x927   : > { %5359 = vmatprep.subr.bf16.mxu1 %v5328_v51  ;;  %v5262_v17 = vmul.f32 %v7116_v29, %v9608_v3  ;;  %v5261_v45 = vmul.f32 %v7116_v29, %v9603_v15  ;;  %v6894_v3 = vpack.i.bf16 %v3878_v20, %v3877_v43  ;;  %v9876_v15 = vpop.f32.mrb[76].mxu1  ;;  %v4993_v51 = vsub.f32 %v9542_v11, %v9820_v50  ;;  %v4932_v29 = vpop.xlane.xlu0 %4931 }
 0x928   : > { %5360 = vmatpush1.bf16.xpose.msra.mxu1 %v5327_v54  ;;  %v4994_v54 = vsub.f32 %v9544_v59, %v9820_v50 }
 0x929   : > { %v9860_v63 = vpop.eup %7117 }
 0x92a   : > { %v9862_v41 = vpop.eup %7119 }
 0x92b   : > { %v7122_v47 = vpop.eup %7121  ;;  %v5212_v28 = vadd.f32 %v9862_v41, %v9860_v63 }
 0x92c   : > { %v5264_v13 = vmul.f32 %v7122_v47, %v9614_v27  ;;  %v5263_v39 = vmul.f32 %v7122_v47, %v9610_v5  ;;  %v10551_v27 = vmov 3   ;;  %v9879_v5 = vpop.f32.mrb[77].mxu1  ;;  %v5117_v47 = vmul.f32 1.442695, %v4993_v51 }
 0x92d   : > { %5213 = vadd.xlane.f32.xlu0 %v5212_v28  ;;  %v9881_v21 = vpop.f32.mrb[78].mxu1  ;;  %v5119_v28 = vmul.f32 1.442695, %v4994_v54 }
 0x92e   : > { %v5330_v24 = vpack.c.bf16 %v5264_v13, %v5262_v17  ;;  %v5329_v12 = vpack.c.bf16 %v5263_v39, %v5261_v45  ;;  %v9883_v1 = vpop.f32.mrb[79].mxu1  ;;  %v4995_v17 = vsub.f32 %v9548_v38, %v4932_v29  ;;  %7123 = vpow2.f32 %v5117_v47  ;;  %v5148_v45 = vpop.xlane.xlu0 %5147 }
 0x92f   : > { %v4996_v13 = vsub.f32 %v9550_v33, %v4932_v29  ;;  %7125 = vpow2.f32 %v5119_v28 }
 0x930   : > { %5361 = vmatprep.subr.bf16.mxu1 %v5330_v24  ;;  %v5121_v39 = vmul.f32 1.442695, %v4995_v17  ;;  %7127 = vrcp.f32 %v5148_v45 }
 0x931   : > { %5362 = vmatpush1.bf16.xpose.msra.mxu1 %v5329_v12  ;;  %v5123_v24 = vmul.f32 1.442695, %v4996_v13 }
 0x932   : > { %4427 = vperm.xlu1 %6892, %v4333_v25   ;;  %v5154_v12 = vpop.xlane.xlu0 %5153 }
 0x936   : > { %6893 = vset.pattern.permute.xlu1 %v10551_v27  ;;  %v5160_v59 = vpop.xlane.xlu0 %5159 }
 0x937   : > { %6895 = vperm.xlu1 %6893, %v6894_v3  }
 0x938   : > { %v9894_v50 = vpop.eup %7123 }
 0x939   : > { %v9896_v38 = vpop.eup %7125 }
 0x93a   : > { %v7128_v10 = vpop.eup %7127  ;;  %v5215_v43 = vadd.f32 %v9896_v38, %v9894_v50 }
 0x93b   : > { %6899 = vset.pattern.permute.xlu1 %v10449_v32  ;;  %v5268_v54 = vmul.f32 %v7128_v10, %v9625_v49  ;;  %v5267_v47 = vmul.f32 %v7128_v10, %v9623_v2 }
 0x93c   : > { %v5166_v13 = vpop.xlane.xlu0 %5165 }
 0x943   : > { %4422 = vperm.xlu0 %6864, %v4332_v4  }
 0x94f   : > { %v5145_v25 = vpop.xlane.xlu1 %5144 }
 0x950   : > { %7129 = vrcp.f32 %v5145_v25 }
 0x951   : > { %7131 = vpow2.f32 %v5121_v39 }
 0x952   : > { %7133 = vrcp.f32 %v5154_v12 }
 0x953   : > { %7135 = vpow2.f32 %v5123_v24  ;;  %v5151_v11 = vpop.xlane.xlu1 %5150 }
 0x954   : > { %7137 = vrcp.f32 %v5151_v11 }
 0x955   : > { %7139 = vrcp.f32 %v5160_v59 }
 0x957   : > { %v5157_v33 = vpop.xlane.xlu1 %5156 }
 0x958   : > { %7141 = vrcp.f32 %v5157_v33 }
 0x95a   : > { %v7130_v20 = vpop.eup %7129 }
 0x95b   : > { %v9900_v3 = vpop.eup %7131  ;;  %5216 = vadd.xlane.f32.xlu1 %v5215_v43  ;;  %v5163_v4 = vpop.xlane.xlu1 %5162  ;;  %v5266_v51 = vmul.f32 %v7130_v20, %v9708_v42  ;;  %v5265_v29 = vmul.f32 %v7130_v20, %v9701_v56 }
 0x95c   : > { %v7134_v28 = vpop.eup %7133  ;;  %7143 = vrcp.f32 %v5163_v4 }
 0x95d   : > { %v9906_v17 = vpop.eup %7135  ;;  %v5332_v45 = vpack.c.bf16 %v5268_v54, %v5266_v51  ;;  %v5331_v39 = vpack.c.bf16 %v5267_v47, %v5265_v29  ;;  %v5272_v25 = vmul.f32 %v7134_v28, %v9638_v60  ;;  %7145 = vrcp.f32 %v5166_v13 }
 0x95e   : > { %v7138_v24 = vpop.eup %7137  ;;  %v5218_v49 = vadd.f32 %v9906_v17, %v9900_v3  ;;  %v5271_v10 = vmul.f32 %v7134_v28, %v9636_v37  ;;  %v4336_v28 = vld [vmem:[%s10290_s12 + $0xa0] sm:$0xff] }
 0x95f   : > { %5363 = vmatprep.subr.bf16.mxu1 %v5332_v45  ;;  %v5270_v12 = vmul.f32 %v7138_v24, %v9721_v6  ;;  %v7140_v56 = vpop.eup %7139  ;;  %v5269_v11 = vmul.f32 %v7138_v24, %v9716_v53  ;;  %v5169_v59 = vpop.xlane.xlu1 %5168  ;;  %v4335_v53 = vld [vmem:[%s10290_s12 + $0x98] sm:$0xff] }
 0x960   : > { %5364 = vmatpush1.bf16.xpose.msra.mxu1 %v5331_v39  ;;  %v5172_v6 = vpop.xlane.xlu0 %5171  ;;  %v5276_v60 = vmul.f32 %v7140_v56, %v9651_v14  ;;  %7147 = vrcp.f32 %v5169_v59  ;;  %v5275_v14 = vmul.f32 %v7140_v56, %v9647_v9  ;;  %v4334_v56 = vld [vmem:[%s10290_s12 + $0x90] sm:$0xff] }
 0x961   : > { %v5334_v2 = vpack.c.bf16 %v5272_v25, %v5270_v12  ;;  %v5333_v43 = vpack.c.bf16 %v5271_v10, %v5269_v11  ;;  %7149 = vrcp.f32 %v5172_v6  ;;  %v10552_v12 = vld [vmem:[#allocation27_spill] sm:$0xff]  ;;  %v10554_v11 = vld [vmem:[#allocation26_spill] sm:$0xff] }
 0x962   : > { %v7142_v42 = vpop.eup %7141  ;;  %5219 = vadd.xlane.f32.xlu0 %v5218_v49  ;;  %v3879_v59 = vunpack.c.l.bf16 %v10554_v11 }
 0x963   : > { %5365 = vmatprep.subr.bf16.mxu1 %v5334_v2  ;;  %v5274_v33 = vmul.f32 %v7142_v42, %v9732_v23  ;;  %v5273_v54 = vmul.f32 %v7142_v42, %v9723_v34  ;;  %v5175_v23 = vpop.xlane.xlu1 %5174  ;;  %v10553_v2 = vld [vmem:[#allocation33_spill] sm:$0xff] }
 0x964   : > { %v5178_v29 = vpop.xlane.xlu0 %5177  ;;  %7151 = vrcp.f32 %v5175_v23 }
 0x965   : > { %v5336_v20 = vpack.c.bf16 %v5276_v60, %v5274_v33  ;;  %v5335_v13 = vpack.c.bf16 %v5275_v14, %v5273_v54  ;;  %7153 = vrcp.f32 %v5178_v29  ;;  %v3880_v33 = vunpack.c.h.bf16 %v10554_v11  ;;  %v5440_v54 = vld [vmem:[%s10291_s13] sm:$0xff]  ;;  %v10559_v11 = vld [vmem:[#allocation13_spill] sm:$0xff] }
 0x966   : > { %v7144_v4 = vpop.eup %7143  ;;  %v10556_v14 = vld [vmem:[#allocation10_spill] sm:$0xff] }
 0x967   : > { %v7146_v51 = vpop.eup %7145  ;;  %v5278_v37 = vmul.f32 %v7144_v4, %v9742_v35  ;;  %v4337_v35 = vld [vmem:[%s10290_s12 + $0xa8] sm:$0xff]  ;;  %v5277_v34 = vmul.f32 %v7144_v4, %v9740_v7  ;;  %v4338_v7 = vld [vmem:[%s10290_s12 + $0xb0] sm:$0xff]  ;;  %v6901_v60 = vpack.i.bf16 %v3880_v33, %v3879_v59 }
 0x968   : > { %5366 = vmatpush1.bf16.xpose.msra.mxu1 %v5333_v43  ;;  %v5280_v47 = vmul.f32 %v7146_v51, %v9672_v8  ;;  %v5181_v8 = vpop.xlane.xlu1 %5180  ;;  %v5279_v25 = vmul.f32 %v7146_v51, %v10552_v12  ;;  %v5184_v49 = vpop.xlane.xlu0 %5183  ;;  %v10555_v43 = vld [vmem:[#allocation29_spill] sm:$0xff] }
 0x969   : > { %5367 = vmatprep.subr.bf16.mxu1 %v5336_v20  ;;  %7155 = vrcp.f32 %v5181_v8  ;;  %v3881_v20 = vunpack.c.l.bf16 %v10555_v43  ;;  %v3882_v4 = vunpack.c.h.bf16 %v10555_v43 }
 0x96a   : > { %v5338_v45 = vpack.c.bf16 %v5280_v47, %v5278_v37  ;;  %v7148_v39 = vpop.eup %7147  ;;  %v5337_v10 = vpack.c.bf16 %v5279_v25, %v5277_v34  ;;  %7157 = vrcp.f32 %v5184_v49  ;;  %v10558_v49 = vld [vmem:[#allocation11_spill] sm:$0xff] }
 0x96b   : > { %v7150_v9 = vpop.eup %7149  ;;  %v5282_v24 = vmul.f32 %v7148_v39, %v9756_v61  ;;  %v5281_v51 = vmul.f32 %v7148_v39, %v9747_v62  ;;  %v5441_v39 = vld [vmem:[%s10291_s13 + $0x8] sm:$0xff] }
 0x96c   : > { %4437 = vperm.xlu1 %6899, %v4335_v53   ;;  %v5284_v42 = vmul.f32 %v7150_v9, %v10553_v2  ;;  %v5187_v23 = vpop.xlane.xlu1 %5186  ;;  %v5283_v29 = vmul.f32 %v7150_v9, %v10556_v14  ;;  %v5190_v47 = vpop.xlane.xlu0 %5189 }
 0x96d   : > { %7159 = vrcp.f32 %v5187_v23 }
 0x96e   : > { %v5340_v61 = vpack.c.bf16 %v5284_v42, %v5282_v24  ;;  %v7152_v6 = vpop.eup %7151  ;;  %7161 = vrcp.f32 %v5190_v47  ;;  %v4339_v24 = vld [vmem:[%s10290_s12 + $0xb8] sm:$0xff] }
 0x96f   : > { %v7154_v53 = vpop.eup %7153  ;;  %v5286_v37 = vmul.f32 %v7152_v6, %v9768_v31  ;;  %v5285_v9 = vmul.f32 %v7152_v6, %v9764_v18 }
 0x970   : > { %5368 = vmatpush1.bf16.xpose.msra.mxu1 %v5335_v13  ;;  %4442 = vperm.xlu1 %6899, %v4336_v28   ;;  %v6906_v28 = vpack.i.bf16 %v3882_v4, %v3881_v20  ;;  %v10557_v13 = vld [vmem:[#allocation32_spill] sm:$0xff]  ;;  %v5193_v8 = vpop.xlane.xlu1 %5192  ;;  %v5196_v42 = vpop.xlane.xlu0 %5195 }
 0x971   : > { %5369 = vmatprep.subr.bf16.mxu1 %v5338_v45  ;;  %v5288_v45 = vmul.f32 %v7154_v53, %v10557_v13  ;;  %7163 = vrcp.f32 %v5193_v8  ;;  %v10561_v13 = vld [vmem:[#allocation17_spill] sm:$0xff] }
 0x972   : > { %7165 = vrcp.f32 %v5196_v42  ;;  %v10567_v42 = vld [vmem:[#allocation15_spill] sm:$0xff] }
 0x973   : > { %v5342_v62 = vpack.c.bf16 %v5288_v45, %v5286_v37  ;;  %v9954_v34 = vpop.f32.mrb[80].mxu1  ;;  %v7156_v31 = vpop.eup %7155  ;;  %v10562_v45 = vld [vmem:[#allocation35_spill] sm:$0xff] }
 0x974   : > { %4447 = vperm.xlu1 %6899, %v4337_v35   ;;  %v5339_v35 = vpack.c.bf16 %v5283_v29, %v5281_v51  ;;  %v5290_v12 = vmul.f32 %v7156_v31, %v9780_v26  ;;  %v9961_v25 = vpop.f32.mrb[81].mxu1  ;;  %v5289_v43 = vmul.f32 %v7156_v31, %v9770_v52  ;;  %v5199_v4 = vpop.xlane.xlu1 %5198  ;;  %v10560_v51 = vld [vmem:[#allocation12_spill] sm:$0xff] }
 0x975   : > { %v9964_v2 = vpop.f32.mrb[82].mxu1  ;;  %v5202_v23 = vpop.xlane.xlu0 %5201  ;;  %7167 = vrcp.f32 %v5199_v4  ;;  %v10570_v4 = vld [vmem:[#allocation36_spill] sm:$0xff] }
 0x976   : > { %v9968_v18 = vpop.f32.mrb[83].mxu1  ;;  %7169 = vrcp.f32 %v5202_v23 }
 0x978   : > { %4432 = vperm.xlu0 %6864, %v4334_v56   ;;  %5370 = vmatpush1.bf16.xpose.msra.mxu1 %v5337_v10  ;;  %v5287_v56 = vmul.f32 %v7154_v53, %v10558_v49  ;;  %v10566_v49 = vld [vmem:[#allocation20_spill] sm:$0xff] }
 0x979   : > { %5371 = vmatprep.subr.bf16.mxu1 %v5340_v61  ;;  %4452 = vperm.xlu1 %6899, %v4338_v7  }
 0x97a   : > { %v5341_v33 = vpack.c.bf16 %v5287_v56, %v5285_v9 }
 0x97c   : > { %6900 = vset.pattern.permute.xlu0 %v10551_v27  ;;  %v7158_v27 = vpop.eup %7157  ;;  %v9970_v10 = vpop.f32.mrb[84].mxu1 }
 0x97d   : > { %6902 = vperm.xlu0 %6900, %v6901_v60   ;;  %5444 = vperm.xlu1 %6899, %v5440_v54   ;;  %v5292_v59 = vmul.f32 %v7158_v27, %v10559_v11  ;;  %v7160_v26 = vpop.eup %7159  ;;  %v9972_v61 = vpop.f32.mrb[85].mxu1  ;;  %v5291_v54 = vmul.f32 %v7158_v27, %v10560_v51 }
 0x97e   : > { %v9974_v6 = vpop.f32.mrb[86].mxu1  ;;  %v7162_v60 = vpop.eup %7161  ;;  %v5294_v53 = vmul.f32 %v7160_v26, %v9786_v0  ;;  %v5293_v52 = vmul.f32 %v7160_v26, %v10561_v13  ;;  %v10564_v0 = vld [vmem:[#allocation16_spill] sm:$0xff] }
 0x97f   : > { %v5344_v7 = vpack.c.bf16 %v5292_v59, %v5290_v12  ;;  %v9977_v20 = vpop.f32.mrb[87].mxu1  ;;  %v5296_v37 = vmul.f32 %v7162_v60, %v9752_v19  ;;  %v5343_v14 = vpack.c.bf16 %v5291_v54, %v5289_v43  ;;  %v7164_v47 = vpop.eup %7163  ;;  %v10568_v59 = vld [vmem:[#allocation37_spill] sm:$0xff] }
 0x980   : > { %5372 = vmatpush1.bf16.xpose.msra.mxu1 %v5339_v35  ;;  %v5298_v35 = vmul.f32 %v7164_v47, %v10562_v45  ;;  %v5205_v54 = vpop.xlane.xlu1 %5204 }
 0x981   : > { %6907 = vperm.xlu0 %6900, %v6906_v28   ;;  %5373 = vmatprep.subr.bf16.mxu1 %v5342_v62  ;;  %v5346_v29 = vpack.c.bf16 %v5296_v37, %v5294_v53  ;;  %v7166_v28 = vpop.eup %7165  ;;  %v10563_v62 = vld [vmem:[#allocation14_spill] sm:$0xff]  ;;  %7171 = vrcp.f32 %v5205_v54 }
 0x982   : > { %5449 = vperm.xlu1 %6899, %v5441_v39   ;;  %v5295_v39 = vmul.f32 %v7162_v60, %v10563_v62  ;;  %v5300_v31 = vmul.f32 %v7166_v28, %v10564_v0  ;;  %v7168_v8 = vpop.eup %7167  ;;  %v5299_v11 = vmul.f32 %v7166_v28, %v10567_v42  ;;  %v10569_v60 = vld [vmem:[#allocation21_spill] sm:$0xff] }
 0x983   : > { %v7170_v19 = vpop.eup %7169  ;;  %v5302_v56 = vmul.f32 %v7168_v8, %v10566_v49  ;;  %v5301_v43 = vmul.f32 %v7168_v8, %v10569_v60 }
 0x984   : > { %v5345_v27 = vpack.c.bf16 %v5295_v39, %v5293_v52  ;;  %v5348_v9 = vpack.c.bf16 %v5300_v31, %v5298_v35  ;;  %v5303_v53 = vmul.f32 %v7170_v19, %v10570_v4  ;;  %v10571_v35 = vld [vmem:[#allocation39_spill] sm:$0xff] }
 0x985   : > { %6911 = vset.pattern.permute.xlu0 %v10449_v32 }
 0x986   : > { %4457 = vperm.xlu0 %6911, %v4339_v24   ;;  %v10565_v24 = vld [vmem:[#allocation3_spill] sm:$0xff]  ;;  %v5349_v51 = vpack.c.bf16 %v5303_v53, %v5301_v43 }
 0x987   : > { %v5297_v12 = vmul.f32 %v7164_v47, %v10565_v24 }
 0x988   : > { %5374 = vmatpush1.bf16.xpose.msra.mxu1 %v5341_v33  ;;  %v5304_v33 = vmul.f32 %v7170_v19, %v10568_v59 }
 0x989   : > { %5375 = vmatprep.subr.bf16.mxu1 %v5344_v7  ;;  %v5347_v7 = vpack.c.bf16 %v5299_v11, %v5297_v12 }
 0x98a   : > { %v5350_v26 = vpack.c.bf16 %v5304_v33, %v5302_v56 }
 0x98b   : > { %v7172_v47 = vpop.eup %7171 }
 0x98c   : > { %v5306_v52 = vmul.f32 %v7172_v47, %v9812_v58  ;;  %v5305_v62 = vmul.f32 %v7172_v47, %v10571_v35 }
 0x990   : > { %5376 = vmatpush1.bf16.xpose.msra.mxu1 %v5343_v14 }
 0x991   : > { %5377 = vmatprep.subr.bf16.mxu1 %v5346_v29 }
 0x998   : > { %5378 = vmatpush1.bf16.xpose.msra.mxu1 %v5345_v27 }
 0x999   : > { %5379 = vmatprep.subr.bf16.mxu1 %v5348_v9 }
 0x9a0   : > { %5380 = vmatpush1.bf16.xpose.msra.mxu1 %v5347_v7 }
 0x9a1   : > { %5381 = vmatprep.subr.bf16.mxu1 %v5350_v26 }
 0x9a8   : > { %5382 = vmatpush1.bf16.xpose.msra.mxu1 %v5349_v51 }
 0x9ae   : > { %v5211_v23 = vpop.xlane.xlu1 %5210 }
 0x9b1   : > { %v5208_v37 = vpop.xlane.xlu0 %5207 }
 0x9b2   : > { %7173 = vrcp.f32 %v5208_v37  ;;  %v4428_v14 = vpop.permute.xlu1 %4427 }
 0x9b3   : > { %v9993_v29 = vadd.f32 %v4428_v14, %v9851_v46  ;;  %7175 = vrcp.f32 %v5211_v23  ;;  %v4495_v46 = vadd.f32 %v4428_v14, %v9855_v30 }
 0x9ba   : > { %v5214_v28 = vpop.xlane.xlu0 %5213 }
 0x9bb   : > { %7177 = vrcp.f32 %v5214_v28 }
 0x9bc   : > { %v7174_v13 = vpop.eup %7173 }
 0x9bd   : > { %v5308_v45 = vmul.f32 %v7174_v13, %v9836_v40  ;;  %v5307_v39 = vmul.f32 %v7174_v13, %v9834_v55  ;;  %v7176_v19 = vpop.eup %7175 }
 0x9be   : > { %v5310_v55 = vmul.f32 %v7176_v19, %v9830_v16  ;;  %v5309_v49 = vmul.f32 %v7176_v19, %v9828_v22 }
 0x9bf   : > { %v5352_v0 = vpack.c.bf16 %v5308_v45, %v5306_v52  ;;  %v5351_v31 = vpack.c.bf16 %v5307_v39, %v5305_v62 }
 0x9c1   : > { %5383 = vmatprep.subr.bf16.mxu1 %v5352_v0 }
 0x9c2   : > { %5384 = vmatpush1.bf16.xpose.msra.mxu1 %v5351_v31  ;;  %v4423_v27 = vpop.permute.xlu0 %4422 }
 0x9c3   : > { %v10001_v9 = vadd.f32 %v4423_v27, %v9845_v57  ;;  %v4493_v8 = vadd.f32 %v4423_v27, %v9848_v36  ;;  %v6896_v36 = vpop.permute.xlu1 %6895 }
 0x9c4   : > { %v6898_v11 = vunpack.i.h.bf16 %v6896_v36  ;;  %v6897_v59 = vunpack.i.l.bf16 %v6896_v36 }
 0x9c5   : > { %v5317_v58 = vpack.c.bf16 %v9993_v29, %v10001_v9  ;;  %v5318_v40 = vpack.c.bf16 %v4495_v46, %v4493_v8  ;;  %v7178_v24 = vpop.eup %7177 }
 0x9c6   : > { %v5312_v12 = vmul.f32 %v7178_v24, %v9862_v41  ;;  %v5311_v30 = vmul.f32 %v7178_v24, %v9860_v63  ;;  %v4047_v7 = vmul.f32 %v6897_v59, %v10548_v48  ;;  %v4048_v16 = vmul.f32 %v6897_v59, %v10549_v44 }
 0x9c7   : > { %5389 = vmatprep.mubr.bf16.mxu1 %v5318_v40  ;;  %v4049_v41 = vmul.f32 %v6898_v11, %v10548_v48  ;;  %v4050_v22 = vmul.f32 %v6898_v11, %v10549_v44 }
 0x9c8   : > { %v5354_v56 = vpack.c.bf16 %v5312_v12, %v5310_v55  ;;  %v5353_v57 = vpack.c.bf16 %v5311_v30, %v5309_v49  ;;  %v4288_v26 = vadd.f32 %v9876_v15, %v4047_v7  ;;  %v4290_v60 = vadd.f32 %v9879_v5, %v4048_v16 }
 0x9c9   : > { %v4292_v43 = vadd.f32 %v9881_v21, %v4049_v41  ;;  %v4294_v4 = vadd.f32 %v9883_v1, %v4050_v22 }
 0x9ca   : > { %5385 = vmatprep.subr.bf16.mxu1 %v5354_v56 }
 0x9cb   : > { %5386 = vmatpush1.bf16.xpose.msra.mxu1 %v5353_v57 }
 0x9e8   : > { %v5217_v42 = vpop.xlane.xlu1 %5216 }
 0x9e9   : > { %7179 = vrcp.f32 %v5217_v42 }
 0x9ec   : > { %v4438_v63 = vpop.permute.xlu1 %4437 }
 0x9ed   : > { %v4498_v54 = vadd.f32 %v4438_v63, %v4292_v43  ;;  %v4499_v23 = vadd.f32 %v4438_v63, %v4294_v4 }
 0x9ef   : > { %v5220_v33 = vpop.xlane.xlu0 %5219 }
 0x9f0   : > { %7181 = vrcp.f32 %v5220_v33  ;;  %v4443_v52 = vpop.permute.xlu1 %4442 }
 0x9f3   : > { %v7180_v51 = vpop.eup %7179 }
 0x9f4   : > { %v5314_v45 = vmul.f32 %v7180_v51, %v9896_v38  ;;  %v5313_v5 = vmul.f32 %v7180_v51, %v9894_v50  ;;  %v4448_v8 = vpop.permute.xlu1 %4447 }
 0x9f7   : > { %v4433_v53 = vpop.permute.xlu0 %4432 }
 0x9f8   : > { %v4496_v37 = vadd.f32 %v4433_v53, %v4288_v26  ;;  %v4497_v14 = vadd.f32 %v4433_v53, %v4290_v60  ;;  %v4453_v16 = vpop.permute.xlu1 %4452 }
 0x9fa   : > { %v7182_v47 = vpop.eup %7181  ;;  %v5319_v28 = vpack.c.bf16 %v4498_v54, %v4496_v37  ;;  %v5320_v13 = vpack.c.bf16 %v4499_v23, %v4497_v14 }
 0x9fb   : > { %v5316_v15 = vmul.f32 %v7182_v47, %v9906_v17  ;;  %v5315_v21 = vmul.f32 %v7182_v47, %v9900_v3 }
 0x9fc   : > { %v6903_v35 = vpop.permute.xlu0 %6902 }
 0x9fd   : > { %v6905_v1 = vunpack.i.h.bf16 %v6903_v35  ;;  %v6904_v62 = vunpack.i.l.bf16 %v6903_v35  ;;  %v5356_v39 = vpack.c.bf16 %v5316_v15, %v5314_v45  ;;  %v5355_v0 = vpack.c.bf16 %v5315_v21, %v5313_v5  ;;  %v6970_v35 = vld [vmem:[%s10285_s7] sm:$0xff]  }
 0x9ff   : > { %v4051_v31 = vmul.f32 %v6904_v62, %v10548_v48  ;;  %v4052_v27 = vmul.f32 %v6904_v62, %v10549_v44  ;;  %v4053_v46 = vmul.f32 %v6905_v1, %v10548_v48  ;;  %5387 = vmatprep.subr.bf16.mxu1 %v5356_v39  ;;  %v4054_v38 = vmul.f32 %v6905_v1, %v10549_v44  ;;  %v10572_v1 = vld [vmem:[#allocation9_spill] sm:$0xff]  ;;  %v5445_v39 = vpop.permute.xlu1 %5444 }
 0xa00   : > { %5388 = vmatpush1.bf16.xpose.msra.mxu1 %v5355_v0  ;;  %v6908_v17 = vpop.permute.xlu0 %6907  ;;  %v5507_v62 = vmul.f32 0.5, %v10572_v1  ;;  %v10573_v0 = vld [vmem:[#allocation34_spill] sm:$0xff] }
 0xa01   : > { %v4298_v50 = vadd.f32 %v9954_v34, %v4051_v31  ;;  %v4300_v3 = vadd.f32 %v9961_v25, %v4052_v27  ;;  %v4302_v19 = vadd.f32 %v9964_v2, %v4053_v46  ;;  %v4304_v40 = vadd.f32 %v9968_v18, %v4054_v38 }
 0xa02   : > { %v6910_v24 = vunpack.i.h.bf16 %v6908_v17  ;;  %v6909_v55 = vunpack.i.l.bf16 %v6908_v17  ;;  %v5508_v31 = vmul.f32 0.5, %v10573_v0  ;;  %v5509_v27 = vadd.f32 0.5, %v5507_v62 }
 0xa03   : > { %v4500_v12 = vadd.f32 %v4443_v52, %v4298_v50  ;;  %v4501_v49 = vadd.f32 %v4443_v52, %v4300_v3  ;;  %v4502_v30 = vadd.f32 %v4448_v8, %v4302_v19  ;;  %v4503_v56 = vadd.f32 %v4448_v8, %v4304_v40  ;;  %v5450_v8 = vpop.permute.xlu1 %5449  ;;  %v6629_v40 = vld [vmem:[%s10280_s2 + $0x8] sm:$0x3] }
 0xa04   : > { %v4055_v57 = vmul.f32 %v6909_v55, %v10548_v48  ;;  %v4056_v36 = vmul.f32 %v6909_v55, %v10549_v44  ;;  %v4057_v42 = vmul.f32 %v6910_v24, %v10548_v48  ;;  %v4058_v34 = vmul.f32 %v6910_v24, %v10549_v44  ;;  %v10574_v55 = vld [vmem:[#allocation5_spill] sm:$0xff] }
 0xa05   : > { %v4458_v11 = vpop.permute.xlu0 %4457  ;;  %v5322_v25 = vpack.c.bf16 %v4503_v56, %v4501_v49  ;;  %v5321_v59 = vpack.c.bf16 %v4502_v30, %v4500_v12  ;;  %v5510_v38 = vadd.f32 0.5, %v5508_v31  ;;  %v5514_v12 = vrot.slane %v5509_v27, %v10574_v55 }
 0xa06   : > { %v4308_v2 = vadd.f32 %v9970_v10, %v4055_v57  ;;  %v4310_v18 = vadd.f32 %v9972_v61, %v4056_v36  ;;  %v4312_v33 = vadd.f32 %v9974_v6, %v4057_v42  ;;  %v4314_v7 = vadd.f32 %v9977_v20, %v4058_v34 }
 0xa07   : > { %5390 = vmatmul.mubr.bf16.vlgmr.msra.gmra.mrb[88].mxu1 %v5317_v58  ;;  %v5518_v57 = vrot.slane %v5510_v38, %v10574_v55 }
 0xa08   : > { %v4504_v41 = vadd.f32 %v4453_v16, %v4308_v2  ;;  %v4505_v48 = vadd.f32 %v4453_v16, %v4310_v18  ;;  %v4506_v22 = vadd.f32 %v4458_v11, %v4312_v33  ;;  %v4507_v44 = vadd.f32 %v4458_v11, %v4314_v7  ;;  %5399 = vmatprep.mubr.bf16.mxu1 %v5320_v13  ;;  %v10575_v2 = vld [vmem:[#allocation6_spill] sm:$0xff] }
 0xa09   : > { %v5835_v11 = vrot.slane %v6629_v40, %v10574_v55  ;;  %v5839_v18 = vrot.slane %v6629_v40, %v10575_v2 }
 0xa0a   : > { %v5323_v63 = vpack.c.bf16 %v4506_v22, %v4504_v41  ;;  %v5324_v26 = vpack.c.bf16 %v4507_v44, %v4505_v48 }
 0xa0f   : > { %5400 = vmatmul.mubr.bf16.gmra.mrb[92].mxu1 %v5319_v28 }
 0xa10   : > { %5409 = vmatprep.mubr.bf16.mxu1 %v5322_v25 }
 0xa17   : > { %5410 = vmatmul.mubr.bf16.gmra.mrb[96].mxu1 %v5321_v59 }
 0xa18   : > { %5419 = vmatprep.mubr.bf16.mxu1 %v5324_v26  ;;  %v6630_v26 = vld [vmem:[%s10286_s8 + $0x8] sm:$0x3] }
 0xa1f   : > { %5420 = vmatmul.mubr.bf16.gmra.mrb[100].mxu1 %v5323_v63 }
 0xa20   : > { %5492 = vmatprep.mubr.bf16.mxu1 %v10449_v32 }
 0xada   : > { %v5391_v10 = vpop.f32.mrb[88].mxu1 }
 0xadb   : > { %v5393_v61 = vpop.f32.mrb[89].mxu1 }
 0xadc   : > { %v5395_v6 = vpop.f32.mrb[90].mxu1 }
 0xadd   : > { %v5432_v20 = vpack.c.bf16 %v5395_v6, %v5391_v10  ;;  %v5397_v29 = vpop.f32.mrb[91].mxu1  ;;  %v6208_v10 = vld [vmem:[%s10292_s14] sm:$0xf] }
 0xade   : > { %v5433_v9 = vpack.c.bf16 %v5397_v29, %v5393_v61 }
 0xae0   : > { %5460 = vmatprep.subr.bf16.mxu1 %v5433_v9 }
 0xae1   : > { %5461 = vmatpush1.bf16.msra.mxu1 %v5432_v20 }
 0xae2   : > { %v5401_v58 = vpop.f32.mrb[92].mxu1 }
 0xae3   : > { %v5403_v60 = vpop.f32.mrb[93].mxu1 }
 0xae4   : > { %v5405_v43 = vpop.f32.mrb[94].mxu1 }
 0xae5   : > { %v5434_v4 = vpack.c.bf16 %v5405_v43, %v5401_v58  ;;  %v5407_v53 = vpop.f32.mrb[95].mxu1  ;;  %v6619_v43 = vld [vmem:[%s10280_s2 + $0x2] sm:$0x3] }
 0xae6   : > { %v5435_v51 = vpack.c.bf16 %v5407_v53, %v5403_v60  ;;  %v5571_v53 = vrot.slane %v6619_v43, %v10574_v55 }
 0xae8   : > { %5462 = vmatprep.subr.bf16.mxu1 %v5435_v51  ;;  %v5575_v51 = vrot.slane %v6619_v43, %v10575_v2 }
 0xae9   : > { %5463 = vmatpush1.bf16.msra.mxu1 %v5434_v4 }
 0xaea   : > { %v5411_v54 = vpop.f32.mrb[96].mxu1 }
 0xaeb   : > { %v5413_v23 = vpop.f32.mrb[97].mxu1 }
 0xaec   : > { %v5415_v37 = vpop.f32.mrb[98].mxu1 }
 0xaed   : > { %v5436_v14 = vpack.c.bf16 %v5415_v37, %v5411_v54  ;;  %v5417_v47 = vpop.f32.mrb[99].mxu1 }
 0xaee   : > { %v5437_v28 = vpack.c.bf16 %v5417_v47, %v5413_v23  ;;  %v6642_v23 = vld [vmem:[%s10286_s8 + $0x10] sm:$0x3] }
 0xaf0   : > { %5464 = vmatprep.subr.bf16.mxu1 %v5437_v28 }
 0xaf1   : > { %5465 = vmatpush1.bf16.msra.mxu1 %v5436_v14 }
 0xaf2   : > { %v5421_v13 = vpop.f32.mrb[100].mxu1 }
 0xaf3   : > { %v5423_v52 = vpop.f32.mrb[101].mxu1 }
 0xaf4   : > { %v5425_v45 = vpop.f32.mrb[102].mxu1 }
 0xaf5   : > { %v5438_v15 = vpack.c.bf16 %v5425_v45, %v5421_v13  ;;  %v5427_v5 = vpop.f32.mrb[103].mxu1 }
 0xaf6   : > { %v5439_v21 = vpack.c.bf16 %v5427_v5, %v5423_v52 }
 0xaf8   : > { %5466 = vmatprep.subr.bf16.mxu1 %v5439_v21 }
 0xaf9   : > { %5467 = vmatpush1.bf16.msra.mxu1 %v5438_v15 }
 0xafc   : > { %6618 = vmatmul.mubr.msk.bf16.vlgmr.msra.gmra.mrb[104].mxu1 %vm2222_vm10, %v6970_v35  ;;  %v5535_v35 = vld [vmem:[%s10280_s2] sm:$0x3] }
 0xafd   : > { %5621 = vmatprep.mubr.bf16.mxu1 %v10449_v32  ;;  %v5540_v0 = vrot.slane %v5535_v35, %v10574_v55  ;;  %v5544_v31 = vrot.slane %v5535_v35, %v10575_v2 }
 0xbcf   : > { %v5494_v46 = vpop.f32.mrb[104].mxu1 }
 0xbd0   : > { %v5495_v17 = vadd.f32 %v5494_v46, %v5445_v39  ;;  %v5496_v50 = vpop.f32.mrb[105].mxu1 }
 0xbd1   : > { %v5497_v3 = vadd.f32 %v5496_v50, %v5445_v39  ;;  %v5498_v19 = vpop.f32.mrb[106].mxu1 }
 0xbd2   : > { %v5503_v24 = vmax.f32 %v5495_v17, 0.0  ;;  %v5499_v49 = vadd.f32 %v5498_v19, %v5450_v8  ;;  %v5500_v30 = vpop.f32.mrb[107].mxu1  ;;  %v6620_v17 = vld [vmem:[%s10286_s8 + $0x2] sm:$0x3] }
 0xbd3   : > { %v5504_v56 = vmax.f32 %v5497_v3, 0.0  ;;  %v5501_v36 = vadd.f32 %v5500_v30, %v5450_v8  ;;  %v6623_v30 = vld [vmem:[%s10280_s2 + $0x4] sm:$0x3] }
 0xbd4   : > { %v5519_v42 = vmul.f32 %v5514_v12, %v5503_v24  ;;  %v5505_v34 = vmax.f32 %v5499_v49, 0.0 }
 0xbd5   : > { %v5520_v25 = vmul.f32 %v5518_v57, %v5504_v56  ;;  %v5506_v59 = vmax.f32 %v5501_v36, 0.0 }
 0xbd6   : > { %v5521_v33 = vmul.f32 %v5514_v12, %v5505_v34  ;;  %5554 = vrot.lane.b32.xlu0 %v5519_v42, %s7200_s29  ;;  %v5842_v16 = vmul.f32 %v5835_v11, %v5519_v42  ;;  %v5695_v34 = vrot.slane %v6623_v30, %v10575_v2 }
 0xbd7   : > { %v5522_v7 = vmul.f32 %v5518_v57, %v5506_v59  ;;  %v5843_v48 = vmul.f32 %v5839_v18, %v5520_v25 }
 0xbd8   : > { %5556 = vrot.lane.b32.xlu1 %v5521_v33, %s7200_s29  ;;  %v5844_v41 = vmul.f32 %v5835_v11, %v5521_v33 }
 0xbd9   : > { %v5845_v22 = vmul.f32 %v5839_v18, %v5522_v7  ;;  %v5553_v18 = vld [vmem:[%s10286_s8] sm:$0x3] }
 0xbda   : > { %5523 = vrot.lane.b32.xlu0 %v5519_v42, %s7201_s30  ;;  %v5846_v44 = vpack.c.bf16 %v5844_v41, %v5842_v16 }
 0xbdb   : > { %v5847_v63 = vpack.c.bf16 %v5845_v22, %v5843_v48 }
 0xbdc   : > { %5525 = vrot.lane.b32.xlu1 %v5521_v33, %s7201_s30 }
 0xbdd   : > { %5853 = vmatprep.subr.bf16.mxu0 %v5847_v63 }
 0xbde   : > { %5674 = vrot.lane.b32.xlu0 %v5519_v42, %s7203_s0  ;;  %5854 = vmatpush1.bf16.msra.mxu0 %v5846_v44 }
 0xbe0   : > { %5676 = vrot.lane.b32.xlu1 %v5521_v33, %s7203_s0 }
 0xbe1   : > { %6631 = vmatmul.mubr.msk.bf16.vlgmr.msra.gmra.mrb[80].mxu0 %vm3243_vm11, %v6630_v26  ;;  %v6626_v26 = vld [vmem:[%s10280_s2 + $0x6] sm:$0x3] }
 0xbe2   : > { %5752 = vrot.lane.b32.xlu0 %v5519_v42, %s7204_s17  ;;  %6041 = vmatprep.mubr.bf16.mxu0 %v10449_v32 }
 0xbe4   : > { %5754 = vrot.lane.b32.xlu1 %v5521_v33, %s7204_s17 }
 0xbe6   : > { %5558 = vrot.lane.b32.xlu0 %v5520_v25, %s7200_s29 }
 0xbe8   : > { %5560 = vrot.lane.b32.xlu1 %v5522_v7, %s7200_s29 }
 0xbea   : > { %5896 = vrot.lane.b32.xlu0 %v5519_v42, %s10576_s26 }
 0xbec   : > { %5898 = vrot.lane.b32.xlu1 %v5521_v33, %s10576_s26 }
 0xbee   : > { %5527 = vrot.lane.b32.xlu0 %v5520_v25, %s7201_s30 }
 0xbf0   : > { %5529 = vrot.lane.b32.xlu1 %v5522_v7, %s7201_s30 }
 0xbf2   : > { %5678 = vrot.lane.b32.xlu0 %v5520_v25, %s7203_s0 }
 0xbf4   : > { %5976 = vrot.lane.b32.xlu1 %v5521_v33, %s10577_s22 }
 0xbf6   : > { %5756 = vrot.lane.b32.xlu0 %v5520_v25, %s7204_s17 }
 0xbf8   : > { %5680 = vrot.lane.b32.xlu1 %v5522_v7, %s7203_s0 }
 0xbfa   : > { %5900 = vrot.lane.b32.xlu0 %v5520_v25, %s10576_s26 }
 0xbfc   : > { %6054 = vrot.lane.b32.xlu1 %v5521_v33, %s10441_s27 }
 0xbfe   : > { %5974 = vrot.lane.b32.xlu0 %v5519_v42, %s10577_s22 }
 0xc00   : > { %5758 = vrot.lane.b32.xlu1 %v5522_v7, %s7204_s17 }
 0xc02   : > { %5978 = vrot.lane.b32.xlu0 %v5520_v25, %s10577_s22 }
 0xc04   : > { %6132 = vrot.lane.b32.xlu1 %v5521_v33, %s10445_s28 }
 0xc06   : > { %6052 = vrot.lane.b32.xlu0 %v5519_v42, %s10441_s27 }
 0xc08   : > { %5902 = vrot.lane.b32.xlu1 %v5522_v7, %s10576_s26 }
 0xc0a   : > { %6056 = vrot.lane.b32.xlu0 %v5520_v25, %s10441_s27 }
 0xc0c   : > { %5980 = vrot.lane.b32.xlu1 %v5522_v7, %s10577_s22  ;;  %s550_s22 = scalar_lea.vmem %s10293_s15, %s6647_s20 }
 0xc0e   : > { %6130 = vrot.lane.b32.xlu0 %v5519_v42, %s10445_s28  ;;  %v5691_v42 = vrot.slane %v6623_v30, %v10574_v55 }
 0xc10   : > { %6058 = vrot.lane.b32.xlu1 %v5522_v7, %s10441_s27 }
 0xc12   : > { %6134 = vrot.lane.b32.xlu0 %v5520_v25, %s10445_s28 }
 0xc14   : > { %6136 = vrot.lane.b32.xlu1 %v5522_v7, %s10445_s28 }
 0xc16   : > { %6211 = vperm.xlu0 %6911, %v6208_v10  }
 0xc48   : > { %v5555_v61 = vpop.permute.xlu0 %5554 }
 0xc4a   : > { %v5557_v6 = vpop.permute.xlu1 %5556 }
 0xc4c   : > { %v5524_v20 = vpop.permute.xlu0 %5523 }
 0xc4e   : > { %v5526_v29 = vpop.permute.xlu1 %5525 }
 0xc50   : > { %v5675_v9 = vpop.permute.xlu0 %5674 }
 0xc52   : > { %v5677_v58 = vpop.permute.xlu1 %5676 }
 0xc54   : > { %v10096_v60 = vpop.permute.xlu0 %5752 }
 0xc56   : > { %v10101_v4 = vpop.permute.xlu1 %5754 }
 0xc58   : > { %v5559_v54 = vpop.permute.xlu0 %5558 }
 0xc59   : > { %v5562_v37 = vsel %vm605_vm1, %v5555_v61, %v5559_v54  ;;  %v5564_v14 = vsel %vm605_vm1, %v5559_v54, %v5555_v61 }
 0xc5a   : > { %v5561_v47 = vpop.permute.xlu1 %5560  ;;  %v5578_v52 = vmul.f32 %v5571_v53, %v5564_v14  ;;  %v5579_v45 = vmul.f32 %v5575_v51, %v5562_v37 }
 0xc5b   : > { %v5563_v28 = vsel %vm605_vm1, %v5557_v6, %v5561_v47  ;;  %v5565_v13 = vsel %vm605_vm1, %v5561_v47, %v5557_v6 }
 0xc5c   : > { %v5580_v15 = vmul.f32 %v5571_v53, %v5565_v13  ;;  %v5581_v5 = vmul.f32 %v5575_v51, %v5563_v28  ;;  %v10113_v21 = vpop.permute.xlu0 %5896  ;;  %v6624_v53 = vld [vmem:[%s10286_s8 + $0x4] sm:$0x3] }
 0xc5e   : > { %v5582_v1 = vpack.c.bf16 %v5580_v15, %v5578_v52  ;;  %v10118_v62 = vpop.permute.xlu1 %5898  ;;  %v5583_v39 = vpack.c.bf16 %v5581_v5, %v5579_v45 }
 0xc60   : > { %5589 = vmatprep.subr.bf16.mxu1 %v5583_v39  ;;  %v5528_v27 = vpop.permute.xlu0 %5527 }
 0xc61   : > { %v5531_v46 = vsel %vm574_vm0, %v5524_v20, %v5528_v27  ;;  %v5533_v38 = vsel %vm574_vm0, %v5528_v27, %v5524_v20  ;;  %5590 = vmatpush1.bf16.msra.mxu1 %v5582_v1  ;;  %v5769_v20 = vrot.slane %v6626_v26, %v10574_v55  ;;  %v6627_v27 = vld [vmem:[%s10286_s8 + $0x6] sm:$0x3] }
 0xc62   : > { %v5530_v50 = vpop.permute.xlu1 %5529  ;;  %v5547_v19 = vmul.f32 %v5540_v0, %v5533_v38  ;;  %v5548_v40 = vmul.f32 %v5544_v31, %v5531_v46 }
 0xc63   : > { %v5532_v8 = vsel %vm574_vm0, %v5526_v29, %v5530_v50  ;;  %v5534_v3 = vsel %vm574_vm0, %v5530_v50, %v5526_v29  ;;  %v5773_v29 = vrot.slane %v6626_v26, %v10575_v2 }
 0xc64   : > { %v5549_v24 = vmul.f32 %v5540_v0, %v5534_v3  ;;  %v5550_v12 = vmul.f32 %v5544_v31, %v5532_v8  ;;  %6621 = vmatmul.mubr.msk.bf16.vlgmr.msra.gmra.mrb[108].mxu1 %vm3243_vm11, %v6620_v17  ;;  %v5679_v49 = vpop.permute.xlu0 %5678 }
 0xc65   : > { %5665 = vmatprep.mubr.bf16.mxu1 %v10449_v32  ;;  %v5682_v25 = vsel %vm862_vm2, %v5675_v9, %v5679_v49  ;;  %v5684_v59 = vsel %vm862_vm2, %v5679_v49, %v5675_v9 }
 0xc66   : > { %v5551_v56 = vpack.c.bf16 %v5549_v24, %v5547_v19  ;;  %v10138_v57 = vpop.permute.xlu1 %5976  ;;  %v5552_v36 = vpack.c.bf16 %v5550_v12, %v5548_v40  ;;  %v5698_v41 = vmul.f32 %v5691_v42, %v5684_v59  ;;  %v5699_v48 = vmul.f32 %v5695_v34, %v5682_v25 }
 0xc68   : > { %5633 = vmatprep.subr.bf16.mxu1 %v5552_v36  ;;  %v5757_v11 = vpop.permute.xlu0 %5756 }
 0xc69   : > { %5634 = vmatpush1.bf16.msra.mxu1 %v5551_v56  ;;  %v5762_v43 = vsel %vm1022_vm5, %v5757_v11, %v10096_v60 }
 0xc6a   : > { %v5681_v33 = vpop.permute.xlu1 %5680  ;;  %v5776_v14 = vmul.f32 %v5769_v20, %v5762_v43 }
 0xc6b   : > { %v5683_v7 = vsel %vm862_vm2, %v5677_v58, %v5681_v33  ;;  %v5685_v16 = vsel %vm862_vm2, %v5681_v33, %v5677_v58  ;;  %v5760_v58 = vsel %vm1022_vm5, %v10096_v60, %v5757_v11  ;;  %v6632_v60 = vld [vmem:[%s10280_s2 + $0xa] sm:$0x3] }
 0xc6c   : > { %v5700_v22 = vmul.f32 %v5691_v42, %v5685_v16  ;;  %v5701_v44 = vmul.f32 %v5695_v34, %v5683_v7  ;;  %6622 = vmatmul.mubr.msk.bf16.vlgmr.msra.gmra.mrb[112].mxu1 %vm3243_vm11, %v5553_v18  ;;  %v5901_v63 = vpop.permute.xlu0 %5900  ;;  %v5777_v47 = vmul.f32 %v5773_v29, %v5760_v58  ;;  %v5913_v35 = vrot.slane %v6632_v60, %v10574_v55  ;;  %v6641_v18 = vld [vmem:[%s10280_s2 + $0x10] sm:$0x3] }
 0xc6d   : > { %5741 = vmatprep.mubr.bf16.mxu1 %v10449_v32  ;;  %v5917_v1 = vrot.slane %v6632_v60, %v10575_v2  ;;  %v5904_v39 = vsel %vm1352_vm6, %v10113_v21, %v5901_v63  ;;  %v5906_v31 = vsel %vm1352_vm6, %v5901_v63, %v10113_v21  ;;  %v6638_v21 = vld [vmem:[%s10280_s2 + $0xe] sm:$0x3]  ;;  %v6147_v26 = vrot.slane %v6641_v18, %v10574_v55 }
 0xc6e   : > { %v5702_v10 = vpack.c.bf16 %v5700_v22, %v5698_v41  ;;  %v10158_v61 = vpop.permute.xlu1 %6054  ;;  %v5703_v6 = vpack.c.bf16 %v5701_v44, %v5699_v48  ;;  %v5920_v17 = vmul.f32 %v5913_v35, %v5904_v39  ;;  %v6073_v11 = vrot.slane %v6638_v21, %v10575_v2 }
 0xc6f   : > { %v5921_v19 = vmul.f32 %v5917_v1, %v5906_v31 }
 0xc70   : > { %5709 = vmatprep.subr.bf16.mxu1 %v5703_v6  ;;  %v5975_v9 = vpop.permute.xlu0 %5974 }
 0xc71   : > { %5710 = vmatpush1.bf16.msra.mxu1 %v5702_v10 }
 0xc72   : > { %v5759_v51 = vpop.permute.xlu1 %5758 }
 0xc73   : > { %v5761_v54 = vsel %vm1022_vm5, %v10101_v4, %v5759_v51  ;;  %v5763_v37 = vsel %vm1022_vm5, %v5759_v51, %v10101_v4  ;;  %v6635_v4 = vld [vmem:[%s10280_s2 + $0xc] sm:$0x3] }
 0xc74   : > { %v5778_v28 = vmul.f32 %v5769_v20, %v5763_v37  ;;  %v5779_v13 = vmul.f32 %v5773_v29, %v5761_v54  ;;  %6625 = vmatmul.mubr.msk.bf16.vlgmr.msra.gmra.mrb[116].mxu1 %vm3243_vm11, %v6624_v53  ;;  %v5979_v52 = vpop.permute.xlu0 %5978  ;;  %v5991_v46 = vrot.slane %v6635_v4, %v10574_v55  ;;  %v5995_v50 = vrot.slane %v6635_v4, %v10575_v2 }
 0xc75   : > { %5819 = vmatprep.mubr.bf16.mxu1 %v10449_v32  ;;  %v5982_v40 = vsel %vm1512_vm7, %v5975_v9, %v5979_v52  ;;  %v5984_v30 = vsel %vm1512_vm7, %v5979_v52, %v5975_v9  ;;  %v6151_v9 = vrot.slane %v6641_v18, %v10575_v2 }
 0xc76   : > { %v5780_v45 = vpack.c.bf16 %v5778_v28, %v5776_v14  ;;  %v10182_v15 = vpop.permute.xlu1 %6132  ;;  %v5781_v5 = vpack.c.bf16 %v5779_v13, %v5777_v47  ;;  %v5998_v34 = vmul.f32 %v5991_v46, %v5982_v40  ;;  %v5999_v33 = vmul.f32 %v5995_v50, %v5984_v30 }
 0xc78   : > { %5787 = vmatprep.subr.bf16.mxu1 %v5781_v5  ;;  %v6053_v0 = vpop.permute.xlu0 %6052  ;;  %v6639_v5 = vld [vmem:[%s10286_s8 + $0xe] sm:$0x3] }
 0xc79   : > { %5788 = vmatpush1.bf16.msra.mxu1 %v5780_v45 }
 0xc7a   : > { %v5903_v38 = vpop.permute.xlu1 %5902 }
 0xc7b   : > { %v5905_v8 = vsel %vm1352_vm6, %v10118_v62, %v5903_v38  ;;  %v5907_v3 = vsel %vm1352_vm6, %v5903_v38, %v10118_v62  ;;  %v6069_v62 = vrot.slane %v6638_v21, %v10574_v55 }
 0xc7c   : > { %v5922_v24 = vmul.f32 %v5913_v35, %v5905_v8  ;;  %v5923_v12 = vmul.f32 %v5917_v1, %v5907_v3  ;;  %6628 = vmatmul.mubr.msk.bf16.vlgmr.msra.gmra.mrb[120].mxu1 %vm3243_vm11, %v6627_v27  ;;  %v6057_v49 = vpop.permute.xlu0 %6056 }
 0xc7d   : > { %5963 = vmatprep.mubr.bf16.mxu1 %v10449_v32  ;;  %v6060_v7 = vsel %vm1672_vm8, %v6053_v0, %v6057_v49  ;;  %v6062_v22 = vsel %vm1672_vm8, %v6057_v49, %v6053_v0 }
 0xc7e   : > { %v5924_v56 = vpack.c.bf16 %v5922_v24, %v5920_v17  ;;  %v5981_v36 = vpop.permute.xlu1 %5980  ;;  %v5925_v42 = vpack.c.bf16 %v5923_v12, %v5921_v19  ;;  %v6076_v6 = vmul.f32 %v6069_v62, %v6060_v7  ;;  %v6077_v58 = vmul.f32 %v6073_v11, %v6062_v22 }
 0xc7f   : > { %v5983_v25 = vsel %vm1512_vm7, %v10138_v57, %v5981_v36  ;;  %v5985_v59 = vsel %vm1512_vm7, %v5981_v36, %v10138_v57  ;;  %v6633_v57 = vld [vmem:[%s10286_s8 + $0xa] sm:$0x3] }
 0xc80   : > { %v6000_v16 = vmul.f32 %v5991_v46, %v5983_v25  ;;  %v6001_v41 = vmul.f32 %v5995_v50, %v5985_v59  ;;  %5931 = vmatprep.subr.bf16.mxu1 %v5925_v42  ;;  %v6131_v48 = vpop.permute.xlu0 %6130 }
 0xc81   : > { %5932 = vmatpush1.bf16.msra.mxu1 %v5924_v56 }
 0xc82   : > { %v6002_v44 = vpack.c.bf16 %v6000_v16, %v5998_v34  ;;  %v6059_v63 = vpop.permute.xlu1 %6058  ;;  %v6003_v10 = vpack.c.bf16 %v6001_v41, %v5999_v33 }
 0xc83   : > { %v6061_v20 = vsel %vm1672_vm8, %v10158_v61, %v6059_v63  ;;  %v6063_v29 = vsel %vm1672_vm8, %v6059_v63, %v10158_v61  ;;  %v6636_v61 = vld [vmem:[%s10286_s8 + $0xc] sm:$0x3] }
 0xc84   : > { %v6078_v43 = vmul.f32 %v6069_v62, %v6061_v20  ;;  %v6079_v53 = vmul.f32 %v6073_v11, %v6063_v29  ;;  %6634 = vmatmul.mubr.msk.bf16.vlgmr.msra.gmra.mrb[124].mxu1 %vm3243_vm11, %v6633_v57  ;;  %v6135_v51 = vpop.permute.xlu0 %6134  ;;  %6009 = vmatprep.subr.bf16.mxu0 %v6003_v10 }
 0xc85   : > { %v6138_v55 = vsel %vm1832_vm9, %v6131_v48, %v6135_v51  ;;  %v6140_v54 = vsel %vm1832_vm9, %v6135_v51, %v6131_v48  ;;  %6010 = vmatpush1.bf16.msra.mxu0 %v6002_v44  ;;  %6119 = vmatprep.mubr.bf16.mxu1 %v10449_v32 }
 0xc86   : > { %v6080_v2 = vpack.c.bf16 %v6078_v43, %v6076_v6  ;;  %v6137_v37 = vpop.permute.xlu1 %6136  ;;  %v6081_v14 = vpack.c.bf16 %v6079_v53, %v6077_v58  ;;  %v6154_v47 = vmul.f32 %v6147_v26, %v6138_v55  ;;  %v6155_v13 = vmul.f32 %v6151_v9, %v6140_v54 }
 0xc87   : > { %v6139_v60 = vsel %vm1832_vm9, %v10182_v15, %v6137_v37  ;;  %v6141_v28 = vsel %vm1832_vm9, %v6137_v37, %v10182_v15 }
 0xc88   : > { %v6156_v52 = vmul.f32 %v6147_v26, %v6139_v60  ;;  %v6157_v45 = vmul.f32 %v6151_v9, %v6141_v28  ;;  %6637 = vmatmul.mubr.msk.bf16.vlgmr.msra.gmra.mrb[84].mxu0 %vm3243_vm11, %v6636_v61  ;;  %6087 = vmatprep.subr.bf16.mxu1 %v6081_v14 }
 0xc89   : > { %6088 = vmatpush1.bf16.msra.mxu1 %v6080_v2  ;;  %6197 = vmatprep.mubr.bf16.mxu0 %v10449_v32 }
 0xc8a   : > { %v6158_v35 = vpack.c.bf16 %v6156_v52, %v6154_v47  ;;  %v6159_v4 = vpack.c.bf16 %v6157_v45, %v6155_v13 }
 0xc8c   : > { %6640 = vmatmul.mubr.msk.bf16.vlgmr.msra.gmra.mrb[128].mxu1 %vm3243_vm11, %v6639_v5  ;;  %6165 = vmatprep.subr.bf16.mxu0 %v6159_v4 }
 0xc8d   : > { %6166 = vmatpush1.bf16.msra.mxu0 %v6158_v35 }
 0xc90   : > { %6643 = vmatmul.mubr.msk.bf16.vlgmr.msra.gmra.mrb[88].mxu0 %vm3243_vm11, %v6642_v23 }
 0xc95   : > { %v6212_v54 = vpop.permute.xlu0 %6211 }
 0xcb4   : > { %v5887_v15 = vpop.f32.mrb[80].mxu0 }
 0xcb5   : > { %v5889_v1 = vpop.f32.mrb[81].mxu0 }
 0xcb6   : > { %v5891_v39 = vpop.f32.mrb[82].mxu0 }
 0xcb7   : > { %v5892_v0 = vpop.f32.mrb[83].mxu0 }
 0xd37   : > { %v5623_v31 = vpop.f32.mrb[108].mxu1 }
 0xd38   : > { %v5625_v27 = vpop.f32.mrb[109].mxu1 }
 0xd39   : > { %v5627_v46 = vpop.f32.mrb[110].mxu1 }
 0xd3a   : > { %v5628_v32 = vpop.f32.mrb[111].mxu1 }
 0xd3f   : > { %v5667_v38 = vpop.f32.mrb[112].mxu1 }
 0xd40   : > { %v5668_v17 = vadd.f32 %v5667_v38, %v5623_v31  ;;  %v5669_v50 = vpop.f32.mrb[113].mxu1 }
 0xd41   : > { %v5670_v8 = vadd.f32 %v5669_v50, %v5625_v27  ;;  %v5671_v3 = vpop.f32.mrb[114].mxu1 }
 0xd42   : > { %v5672_v21 = vpop.f32.mrb[115].mxu1 }
 0xd47   : > { %v5743_v19 = vpop.f32.mrb[116].mxu1 }
 0xd48   : > { %v5750_v40 = vadd.f32 %v5743_v19, %v5668_v17  ;;  %v5745_v24 = vpop.f32.mrb[117].mxu1 }
 0xd49   : > { %v5751_v12 = vadd.f32 %v5745_v24, %v5670_v8  ;;  %v5747_v49 = vpop.f32.mrb[118].mxu1 }
 0xd4a   : > { %v5748_v30 = vpop.f32.mrb[119].mxu1 }
 0xd4f   : > { %v5821_v56 = vpop.f32.mrb[120].mxu1 }
 0xd50   : > { %v5828_v62 = vadd.f32 %v5821_v56, %v5750_v40  ;;  %v5823_v36 = vpop.f32.mrb[121].mxu1 }
 0xd51   : > { %v5829_v42 = vadd.f32 %v5823_v36, %v5751_v12  ;;  %v5825_v34 = vpop.f32.mrb[122].mxu1 }
 0xd52   : > { %v5894_v11 = vadd.f32 %v5887_v15, %v5828_v62  ;;  %v5826_v25 = vpop.f32.mrb[123].mxu1 }
 0xd53   : > { %v5895_v59 = vadd.f32 %v5889_v1, %v5829_v42 }
 0xd57   : > { %v5965_v18 = vpop.f32.mrb[124].mxu1 }
 0xd58   : > { %v5972_v33 = vadd.f32 %v5965_v18, %v5894_v11  ;;  %v5967_v7 = vpop.f32.mrb[125].mxu1 }
 0xd59   : > { %v5973_v16 = vadd.f32 %v5967_v7, %v5895_v59  ;;  %v5969_v41 = vpop.f32.mrb[126].mxu1 }
 0xd5a   : > { %v5970_v48 = vpop.f32.mrb[127].mxu1 }
 0xd5b   : > { %v6043_v22 = vpop.f32.mrb[84].mxu0 }
 0xd5c   : > { %v6050_v57 = vadd.f32 %v6043_v22, %v5972_v33  ;;  %v6045_v44 = vpop.f32.mrb[85].mxu0 }
 0xd5d   : > { %v6051_v63 = vadd.f32 %v6045_v44, %v5973_v16  ;;  %v6047_v26 = vpop.f32.mrb[86].mxu0 }
 0xd5e   : > { %v6048_v10 = vpop.f32.mrb[87].mxu0 }
 0xd5f   : > { %v6121_v6 = vpop.f32.mrb[128].mxu1 }
 0xd60   : > { %v6128_v20 = vadd.f32 %v6121_v6, %v6050_v57  ;;  %v6123_v29 = vpop.f32.mrb[129].mxu1 }
 0xd61   : > { %v6129_v9 = vadd.f32 %v6123_v29, %v6051_v63  ;;  %v6125_v58 = vpop.f32.mrb[130].mxu1 }
 0xd62   : > { %v6126_v43 = vpop.f32.mrb[131].mxu1 }
 0xd63   : > { %v6199_v53 = vpop.f32.mrb[88].mxu0 }
 0xd64   : > { %v6206_v51 = vadd.f32 %v6199_v53, %v6128_v20  ;;  %v6201_v55 = vpop.f32.mrb[89].mxu0 }
 0xd65   : > { %v6207_v61 = vadd.f32 %v6201_v55, %v6129_v9  ;;  %v6203_v2 = vpop.f32.mrb[90].mxu0 }
 0xd66   : > { %v6214_v37 = vadd.f32 %v6212_v54, %v6206_v51  ;;  %v6204_v14 = vpop.f32.mrb[91].mxu0 }
 0xd67   : > { %v6215_v47 = vadd.f32 %v6212_v54, %v6207_v61 }
 0xd68   : > { %v6217_v60 = vsel %vm6216_vm15, %v6214_v37, -inf }
 0xd69   : > { %v6218_v28 = vrot.slane %v6217_v60, 4  ;;  %v6224_v13 = vsel %vm6216_vm15, %v6215_v47, -inf }
 0xd6a   : > { %v6225_v52 = vrot.slane %v6224_v13, 4 }
 0xd6b   : > { %v6219_v45 = vmax.f32 %v6217_v60, %v6218_v28 }
 0xd6c   : > { %v6226_v5 = vmax.f32 %v6224_v13, %v6225_v52 }
 0xd6d   : > { %v6220_v35 = vrot.slane %v6219_v45, 2 }
 0xd6e   : > { %v6227_v4 = vrot.slane %v6226_v5, 2 }
 0xd6f   : > { %v6221_v23 = vmax.f32 %v6219_v45, %v6220_v35 }
 0xd70   : > { %v6228_v15 = vmax.f32 %v6226_v5, %v6227_v4 }
 0xd71   : > { %v6222_v1 = vrot.slane %v6221_v23, 1 }
 0xd72   : > { %v6229_v39 = vrot.slane %v6228_v15, 1 }
 0xd73   : > { %v6223_v0 = vmax.f32 %v6221_v23, %v6222_v1 }
 0xd74   : > { %v6230_v31 = vmax.f32 %v6228_v15, %v6229_v39 }
 0xd75   : > { %v6231_v27 = vsub.f32 %v6214_v37, %v6223_v0 }
 0xd76   : > { %v6232_v46 = vsub.f32 %v6215_v47, %v6230_v31 }
 0xd77   : > { %v6233_v32 = vmul.f32 1.442695, %v6231_v27 }
 0xd78   : > { %v6235_v38 = vmul.f32 1.442695, %v6232_v46 }
 0xd79   : > { %7183 = vpow2.f32 %v6233_v32 }
 0xd7a   : > { %7185 = vpow2.f32 %v6235_v38 }
 0xd83   : > { %v7184_v17 = vpop.eup %7183 }
 0xd84   : > { %v7186_v50 = vpop.eup %7185  ;;  %v6237_v8 = vsel %vm6216_vm15, %v7184_v17, 0.0 }
 0xd85   : > { %v6238_v3 = vrot.slane %v6237_v8, 4  ;;  %v6244_v21 = vsel %vm6216_vm15, %v7186_v50, 0.0 }
 0xd86   : > { %v6245_v19 = vrot.slane %v6244_v21, 4 }
 0xd87   : > { %v6239_v40 = vadd.f32 %v6238_v3, %v6237_v8 }
 0xd88   : > { %v6246_v24 = vadd.f32 %v6245_v19, %v6244_v21 }
 0xd89   : > { %v6240_v12 = vrot.slane %v6239_v40, 2 }
 0xd8a   : > { %v6247_v49 = vrot.slane %v6246_v24, 2 }
 0xd8b   : > { %v6241_v30 = vadd.f32 %v6240_v12, %v6239_v40 }
 0xd8c   : > { %v6248_v56 = vadd.f32 %v6247_v49, %v6246_v24 }
 0xd8d   : > { %v6242_v62 = vrot.slane %v6241_v30, 1 }
 0xd8e   : > { %v6249_v36 = vrot.slane %v6248_v56, 1 }
 0xd8f   : > { %v6243_v42 = vadd.f32 %v6242_v62, %v6241_v30 }
 0xd90   : > { %v6250_v34 = vadd.f32 %v6249_v36, %v6248_v56 }
 0xd91   : > { %7187 = vrcp.f32 %v6243_v42 }
 0xd92   : > { %7189 = vrcp.f32 %v6250_v34 }
 0xd9b   : > { %v7188_v11 = vpop.eup %7187 }
 0xd9c   : > { %v7190_v25 = vpop.eup %7189  ;;  %v6252_v59 = vmul.f32 %v7188_v11, %v7184_v17 }
 0xd9d   : > { %v6254_v18 = vmul.f32 %v7190_v25, %v7186_v50 }
 0xd9f   : > { %v6257_v33 = vcombine.low %v6252_v59, %v6254_v18 }
 0xda1   : > { %6259 = vst [vmem:[%s550_s22] sm:$0xff] %v6257_v33 }
 0xda2 PF: > { %s29_s23 = sadd.s32 1, %s7197_s23  }
 0xda3   : > { %p26_p4 = scmp.ge.s32.totalorder %s29_s23, 4  }
 0xda5   :  { %28 = sbr.rel (!%p26_p4) target bundleno = 3 (0x3), region = 165 }

</bundles_post_ra>
